<compile_context>
chip_gen: v5e
topology: v5e:2x2
jax: 0.10.0
libtpu: 0.0.40
codegen_flags: <defaults>
</compile_context>

<pallas_src>
import jax
import jax.numpy as jnp
import numpy as np
from jax.experimental import pallas as pl
from jax.experimental.pallas import tpu as pltpu

EPS = 0.006        # laplace_kernel default in the PyTorch module
_GB_MAX = 128      # max groups per grid step (keeps VMEM well under limits on v5e/v6e/v7x)


def _round_up(x, m):
    return ((x + m - 1) // m) * m


def imm_loss_kernel(yt_ref, yr_ref, scale_ref, wrow_ref, out_ref):
    """One grid step: Gb groups of M particles each.

    yt_ref/yr_ref : (Gb, M, D)   model / stop-grad outputs
    scale_ref     : (Gb, M, 1)   w_scale[g, j] / D
    wrow_ref      : (Gb, M, 1)   time_weight[g] / (M*M*num_groups)
    out_ref       : (Gb, 1)      per-group weighted kernel sums
    """
    yt = yt_ref[...]
    yr = yr_ref[...]
    scale = scale_ref[...]
    wrow = wrow_ref[...]
    M = yt.shape[1]

    acc = jnp.zeros(scale.shape, jnp.float32)  # (Gb, M, 1)
    # M is small and static -> unrolled Python loop over the "k" particle index.
    for k in range(M):
        bt = yt[:, k:k + 1, :]   # (Gb, 1, D)  broadcast of particle k (yt)
        br = yr[:, k:k + 1, :]   # (Gb, 1, D)  broadcast of particle k (yr)

        # Exact pairwise distances via broadcast-diff (VPU) + lane reduce (XLU).
        d_tt = jnp.sqrt(jnp.sum((yt - bt) ** 2, axis=-1, keepdims=True))  # (Gb, M, 1)
        d_rr = jnp.sqrt(jnp.sum((yr - br) ** 2, axis=-1, keepdims=True))
        d_tr = jnp.sqrt(jnp.sum((yt - br) ** 2, axis=-1, keepdims=True))

        k_tt = jnp.exp(-scale * jnp.maximum(d_tt, EPS))
        k_rr = jnp.exp(-scale * jnp.maximum(d_rr, EPS))
        k_tr = jnp.exp(-scale * jnp.maximum(d_tr, EPS))

        acc = acc + (k_tt + k_rr - 2.0 * k_tr)

    # Per-group weighted sum; padded groups have wrow == 0 and contribute nothing.
    out_ref[...] = jnp.sum(acc * wrow, axis=1)   # (Gb, 1)


def imm_loss(ys_t, ys_r_stop, w_scale, time_weights,
             obs_horizon, pred_horizon, num_particles):
    """Pallas implementation of IMMloss.forward.

    ys_t, ys_r_stop : [B, pred_horizon, obs_horizon]
    w_scale         : [B]
    time_weights    : [B]
    """
    B = ys_t.shape[0]
    M = num_particles
    G = B // M
    D = pred_horizon * obs_horizon

    yt = ys_t.reshape(B, -1).reshape(G, M, D).astype(jnp.float32)
    yr = ys_r_stop.reshape(B, -1).reshape(G, M, D).astype(jnp.float32)

    # Pre-fold all scalar factors in the wrapper (no per-step scalar DMAs/divides).
    scale = (w_scale.reshape(G, M, 1).astype(jnp.float32) / jnp.float32(D))
    tw = time_weights.reshape(G, M)[:, 0].astype(jnp.float32)          # (G,)
    wrow = jnp.broadcast_to((tw / jnp.float32(M * M * G)).reshape(G, 1, 1),
                            (G, M, 1)).astype(jnp.float32)

    # Group batching: Gb groups per grid step, sublane-aligned (multiple of 8).
    Gb = min(_GB_MAX, _round_up(G, 8))
    G_pad = _round_up(G, Gb)
    pad = G_pad - G
    if pad:
        yt = jnp.pad(yt, ((0, pad), (0, 0), (0, 0)))
        yr = jnp.pad(yr, ((0, pad), (0, 0), (0, 0)))
        scale = jnp.pad(scale, ((0, pad), (0, 0), (0, 0)))
        wrow = jnp.pad(wrow, ((0, pad), (0, 0), (0, 0)))   # zero weight -> no contribution
    nblocks = G_pad // Gb

    partials = pl.pallas_call(
        imm_loss_kernel,
        out_shape=jax.ShapeDtypeStruct((G_pad, 1), jnp.float32),
        grid_spec=pltpu.PrefetchScalarGridSpec(
            num_scalar_prefetch=0,
            grid=(nblocks,),
            in_specs=[
                pl.BlockSpec((Gb, M, D), lambda i: (i, 0, 0)),
                pl.BlockSpec((Gb, M, D), lambda i: (i, 0, 0)),
                pl.BlockSpec((Gb, M, 1), lambda i: (i, 0, 0)),
                pl.BlockSpec((Gb, M, 1), lambda i: (i, 0, 0)),
            ],
            out_specs=pl.BlockSpec((Gb, 1), lambda i: (i, 0)),
        ),
        compiler_params=pltpu.CompilerParams(
            # No cross-step accumulator anymore -> grid axis can run in parallel
            # (uses both TensorCores on v7x; harmless on v5e/v6e).
            dimension_semantics=("parallel",),
        ),
    )(yt, yr, scale, wrow)

    # Tiny final reduction done in plain JAX.
    return jnp.sum(partials)


def imm_loss_ref(ys_t, ys_r_stop, w_scale, time_weights,
                 obs_horizon, pred_horizon, num_particles):
    """Pure numpy reference mirroring the PyTorch forward exactly."""
    B = ys_t.shape[0]
    M = num_particles
    G = B // M
    yt = np.asarray(ys_t).reshape(B, -1).reshape(G, M, -1)
    yr = np.asarray(ys_r_stop).reshape(B, -1).reshape(G, M, -1)
    ws = np.asarray(w_scale).reshape(G, M)
    tw = np.asarray(time_weights).reshape(G, M)[:, 0]
    D = yt.shape[-1]

    def lap(a, b, w):
        d = max(float(np.linalg.norm(a - b)), EPS)
        return np.exp(-w * d / D)

    total = 0.0
    for i in range(G):
        gl = 0.0
        for j in range(M):
            for k in range(M):
                gl += lap(yt[i, j], yt[i, k], ws[i, j])
                gl += lap(yr[i, j], yr[i, k], ws[i, j])
                gl += -2.0 * lap(yt[i, j], yr[i, k], ws[i, j])
        total += gl * tw[i] / (M * M)
    return total / G


if __name__ == "__main__":
    obs_horizon, pred_horizon, num_particles = 8, 4, 4
    B = 8  # -> num_groups = 2, D = 32

    key = jax.random.PRNGKey(0)
    k1, k2, k3, k4 = jax.random.split(key, 4)
    ys_t = jax.random.normal(k1, (B, pred_horizon, obs_horizon), dtype=jnp.float32)
    ys_r = jax.random.normal(k2, (B, pred_horizon, obs_horizon), dtype=jnp.float32)
    w_scale = jax.random.uniform(k3, (B,), minval=0.5, maxval=2.0, dtype=jnp.float32)
    time_weights = jax.random.uniform(k4, (B,), minval=0.5, maxval=1.5, dtype=jnp.float32)

    loss = imm_loss(ys_t, ys_r, w_scale, time_weights,
                    obs_horizon, pred_horizon, num_particles)
    loss = jax.block_until_ready(loss)

    ref = imm_loss_ref(ys_t, ys_r, w_scale, time_weights,
                       obs_horizon, pred_horizon, num_particles)
    assert np.allclose(float(loss), float(ref), rtol=1e-4, atol=1e-5), (float(loss), float(ref))
    print("KERNEL_OK")
</pallas_src>

<mosaic_0001>
module attributes {stable_mosaic.version = 11 : i64} {
  func.func @imm_loss_kernel(%arg0: i32, %arg1: memref<8x4x32xf32, #tpu.memory_space<vmem>>, %arg2: memref<8x4x32xf32, #tpu.memory_space<vmem>>, %arg3: memref<8x4x1xf32, #tpu.memory_space<vmem>>, %arg4: memref<8x4x1xf32, #tpu.memory_space<vmem>>, %arg5: memref<8x1xf32, #tpu.memory_space<vmem>>) attributes {dimension_semantics = [#tpu.dimension_semantics<parallel>], iteration_bounds = array<i64: 1>, scalar_prefetch = 0 : i64, scratch_operands = 0 : i64, tpu.core_type = #tpu.core_type<tc>, window_params = [{transform_indices = @transform_0, window_bounds = array<i64: 8, 4, 32>}, {transform_indices = @transform_1, window_bounds = array<i64: 8, 4, 32>}, {transform_indices = @transform_2, window_bounds = array<i64: 8, 4, 1>}, {transform_indices = @transform_3, window_bounds = array<i64: 8, 4, 1>}, {transform_indices = @transform_4, window_bounds = array<i64: 8, 1>}]} {
    %c0 = arith.constant 0 : index
    %c0_0 = arith.constant 0 : index
    %c0_1 = arith.constant 0 : index
    %0 = vector.load %arg1[%c0, %c0_0, %c0_1] : memref<8x4x32xf32, #tpu.memory_space<vmem>>, vector<8x4x32xf32>
    %c0_2 = arith.constant 0 : index
    %c0_3 = arith.constant 0 : index
    %c0_4 = arith.constant 0 : index
    %1 = vector.load %arg2[%c0_2, %c0_3, %c0_4] : memref<8x4x32xf32, #tpu.memory_space<vmem>>, vector<8x4x32xf32>
    %c0_5 = arith.constant 0 : index
    %c0_6 = arith.constant 0 : index
    %c0_7 = arith.constant 0 : index
    %2 = vector.load %arg3[%c0_5, %c0_6, %c0_7] : memref<8x4x1xf32, #tpu.memory_space<vmem>>, vector<8x4x1xf32>
    %c0_8 = arith.constant 0 : index
    %c0_9 = arith.constant 0 : index
    %c0_10 = arith.constant 0 : index
    %3 = vector.load %arg4[%c0_8, %c0_9, %c0_10] : memref<8x4x1xf32, #tpu.memory_space<vmem>>, vector<8x4x1xf32>
    %cst = arith.constant 0.000000e+00 : f32
    %4 = vector.broadcast %cst : f32 to vector<8x4x1xf32>
    %5 = vector.extract_strided_slice %0 {offsets = [0, 0, 0], sizes = [8, 1, 32], strides = [1, 1, 1]} : vector<8x4x32xf32> to vector<8x1x32xf32>
    %6 = vector.extract_strided_slice %1 {offsets = [0, 0, 0], sizes = [8, 1, 32], strides = [1, 1, 1]} : vector<8x4x32xf32> to vector<8x1x32xf32>
    %7 = vector.broadcast %5 : vector<8x1x32xf32> to vector<8x4x32xf32>
    %8 = arith.subf %0, %7 : vector<8x4x32xf32>
    %9 = arith.mulf %8, %8 : vector<8x4x32xf32>
    %cst_11 = arith.constant dense<0.000000e+00> : vector<8x4xf32>
    %10 = vector.multi_reduction <add>, %9, %cst_11 [2] : vector<8x4x32xf32> to vector<8x4xf32>
    %11 = vector.shape_cast %10 : vector<8x4xf32> to vector<8x4x1xf32>
    %12 = math.sqrt %11 : vector<8x4x1xf32>
    %13 = vector.broadcast %6 : vector<8x1x32xf32> to vector<8x4x32xf32>
    %14 = arith.subf %1, %13 : vector<8x4x32xf32>
    %15 = arith.mulf %14, %14 : vector<8x4x32xf32>
    %cst_12 = arith.constant dense<0.000000e+00> : vector<8x4xf32>
    %16 = vector.multi_reduction <add>, %15, %cst_12 [2] : vector<8x4x32xf32> to vector<8x4xf32>
    %17 = vector.shape_cast %16 : vector<8x4xf32> to vector<8x4x1xf32>
    %18 = math.sqrt %17 : vector<8x4x1xf32>
    %19 = vector.broadcast %6 : vector<8x1x32xf32> to vector<8x4x32xf32>
    %20 = arith.subf %0, %19 : vector<8x4x32xf32>
    %21 = arith.mulf %20, %20 : vector<8x4x32xf32>
    %cst_13 = arith.constant dense<0.000000e+00> : vector<8x4xf32>
    %22 = vector.multi_reduction <add>, %21, %cst_13 [2] : vector<8x4x32xf32> to vector<8x4xf32>
    %23 = vector.shape_cast %22 : vector<8x4xf32> to vector<8x4x1xf32>
    %24 = math.sqrt %23 : vector<8x4x1xf32>
    %cst_14 = arith.constant 0.000000e+00 : f32
    %25 = vector.broadcast %cst_14 : f32 to vector<8x4x1xf32>
    %26 = arith.subf %25, %2 : vector<8x4x1xf32>
    %cst_15 = arith.constant 6.000000e-03 : f32
    %27 = vector.broadcast %cst_15 : f32 to vector<8x4x1xf32>
    %28 = arith.maximumf %12, %27 : vector<8x4x1xf32>
    %29 = arith.mulf %26, %28 : vector<8x4x1xf32>
    %30 = math.exp %29 : vector<8x4x1xf32>
    %cst_16 = arith.constant 0.000000e+00 : f32
    %31 = vector.broadcast %cst_16 : f32 to vector<8x4x1xf32>
    %32 = arith.subf %31, %2 : vector<8x4x1xf32>
    %cst_17 = arith.constant 6.000000e-03 : f32
    %33 = vector.broadcast %cst_17 : f32 to vector<8x4x1xf32>
    %34 = arith.maximumf %18, %33 : vector<8x4x1xf32>
    %35 = arith.mulf %32, %34 : vector<8x4x1xf32>
    %36 = math.exp %35 : vector<8x4x1xf32>
    %cst_18 = arith.constant 0.000000e+00 : f32
    %37 = vector.broadcast %cst_18 : f32 to vector<8x4x1xf32>
    %38 = arith.subf %37, %2 : vector<8x4x1xf32>
    %cst_19 = arith.constant 6.000000e-03 : f32
    %39 = vector.broadcast %cst_19 : f32 to vector<8x4x1xf32>
    %40 = arith.maximumf %24, %39 : vector<8x4x1xf32>
    %41 = arith.mulf %38, %40 : vector<8x4x1xf32>
    %42 = math.exp %41 : vector<8x4x1xf32>
    %43 = arith.addf %30, %36 : vector<8x4x1xf32>
    %cst_20 = arith.constant 2.000000e+00 : f32
    %44 = vector.broadcast %cst_20 : f32 to vector<8x4x1xf32>
    %45 = arith.mulf %44, %42 : vector<8x4x1xf32>
    %46 = arith.subf %43, %45 : vector<8x4x1xf32>
    %47 = arith.addf %4, %46 : vector<8x4x1xf32>
    %48 = vector.extract_strided_slice %0 {offsets = [0, 1, 0], sizes = [8, 1, 32], strides = [1, 1, 1]} : vector<8x4x32xf32> to vector<8x1x32xf32>
    %49 = vector.extract_strided_slice %1 {offsets = [0, 1, 0], sizes = [8, 1, 32], strides = [1, 1, 1]} : vector<8x4x32xf32> to vector<8x1x32xf32>
    %50 = vector.broadcast %48 : vector<8x1x32xf32> to vector<8x4x32xf32>
    %51 = arith.subf %0, %50 : vector<8x4x32xf32>
    %52 = arith.mulf %51, %51 : vector<8x4x32xf32>
    %cst_21 = arith.constant dense<0.000000e+00> : vector<8x4xf32>
    %53 = vector.multi_reduction <add>, %52, %cst_21 [2] : vector<8x4x32xf32> to vector<8x4xf32>
    %54 = vector.shape_cast %53 : vector<8x4xf32> to vector<8x4x1xf32>
    %55 = math.sqrt %54 : vector<8x4x1xf32>
    %56 = vector.broadcast %49 : vector<8x1x32xf32> to vector<8x4x32xf32>
    %57 = arith.subf %1, %56 : vector<8x4x32xf32>
    %58 = arith.mulf %57, %57 : vector<8x4x32xf32>
    %cst_22 = arith.constant dense<0.000000e+00> : vector<8x4xf32>
    %59 = vector.multi_reduction <add>, %58, %cst_22 [2] : vector<8x4x32xf32> to vector<8x4xf32>
    %60 = vector.shape_cast %59 : vector<8x4xf32> to vector<8x4x1xf32>
    %61 = math.sqrt %60 : vector<8x4x1xf32>
    %62 = vector.broadcast %49 : vector<8x1x32xf32> to vector<8x4x32xf32>
    %63 = arith.subf %0, %62 : vector<8x4x32xf32>
    %64 = arith.mulf %63, %63 : vector<8x4x32xf32>
    %cst_23 = arith.constant dense<0.000000e+00> : vector<8x4xf32>
    %65 = vector.multi_reduction <add>, %64, %cst_23 [2] : vector<8x4x32xf32> to vector<8x4xf32>
    %66 = vector.shape_cast %65 : vector<8x4xf32> to vector<8x4x1xf32>
    %67 = math.sqrt %66 : vector<8x4x1xf32>
    %cst_24 = arith.constant 0.000000e+00 : f32
    %68 = vector.broadcast %cst_24 : f32 to vector<8x4x1xf32>
    %69 = arith.subf %68, %2 : vector<8x4x1xf32>
    %cst_25 = arith.constant 6.000000e-03 : f32
    %70 = vector.broadcast %cst_25 : f32 to vector<8x4x1xf32>
    %71 = arith.maximumf %55, %70 : vector<8x4x1xf32>
    %72 = arith.mulf %69, %71 : vector<8x4x1xf32>
    %73 = math.exp %72 : vector<8x4x1xf32>
    %cst_26 = arith.constant 0.000000e+00 : f32
    %74 = vector.broadcast %cst_26 : f32 to vector<8x4x1xf32>
    %75 = arith.subf %74, %2 : vector<8x4x1xf32>
    %cst_27 = arith.constant 6.000000e-03 : f32
    %76 = vector.broadcast %cst_27 : f32 to vector<8x4x1xf32>
    %77 = arith.maximumf %61, %76 : vector<8x4x1xf32>
    %78 = arith.mulf %75, %77 : vector<8x4x1xf32>
    %79 = math.exp %78 : vector<8x4x1xf32>
    %cst_28 = arith.constant 0.000000e+00 : f32
    %80 = vector.broadcast %cst_28 : f32 to vector<8x4x1xf32>
    %81 = arith.subf %80, %2 : vector<8x4x1xf32>
    %cst_29 = arith.constant 6.000000e-03 : f32
    %82 = vector.broadcast %cst_29 : f32 to vector<8x4x1xf32>
    %83 = arith.maximumf %67, %82 : vector<8x4x1xf32>
    %84 = arith.mulf %81, %83 : vector<8x4x1xf32>
    %85 = math.exp %84 : vector<8x4x1xf32>
    %86 = arith.addf %73, %79 : vector<8x4x1xf32>
    %cst_30 = arith.constant 2.000000e+00 : f32
    %87 = vector.broadcast %cst_30 : f32 to vector<8x4x1xf32>
    %88 = arith.mulf %87, %85 : vector<8x4x1xf32>
    %89 = arith.subf %86, %88 : vector<8x4x1xf32>
    %90 = arith.addf %47, %89 : vector<8x4x1xf32>
    %91 = vector.extract_strided_slice %0 {offsets = [0, 2, 0], sizes = [8, 1, 32], strides = [1, 1, 1]} : vector<8x4x32xf32> to vector<8x1x32xf32>
    %92 = vector.extract_strided_slice %1 {offsets = [0, 2, 0], sizes = [8, 1, 32], strides = [1, 1, 1]} : vector<8x4x32xf32> to vector<8x1x32xf32>
    %93 = vector.broadcast %91 : vector<8x1x32xf32> to vector<8x4x32xf32>
    %94 = arith.subf %0, %93 : vector<8x4x32xf32>
    %95 = arith.mulf %94, %94 : vector<8x4x32xf32>
    %cst_31 = arith.constant dense<0.000000e+00> : vector<8x4xf32>
    %96 = vector.multi_reduction <add>, %95, %cst_31 [2] : vector<8x4x32xf32> to vector<8x4xf32>
    %97 = vector.shape_cast %96 : vector<8x4xf32> to vector<8x4x1xf32>
    %98 = math.sqrt %97 : vector<8x4x1xf32>
    %99 = vector.broadcast %92 : vector<8x1x32xf32> to vector<8x4x32xf32>
    %100 = arith.subf %1, %99 : vector<8x4x32xf32>
    %101 = arith.mulf %100, %100 : vector<8x4x32xf32>
    %cst_32 = arith.constant dense<0.000000e+00> : vector<8x4xf32>
    %102 = vector.multi_reduction <add>, %101, %cst_32 [2] : vector<8x4x32xf32> to vector<8x4xf32>
    %103 = vector.shape_cast %102 : vector<8x4xf32> to vector<8x4x1xf32>
    %104 = math.sqrt %103 : vector<8x4x1xf32>
    %105 = vector.broadcast %92 : vector<8x1x32xf32> to vector<8x4x32xf32>
    %106 = arith.subf %0, %105 : vector<8x4x32xf32>
    %107 = arith.mulf %106, %106 : vector<8x4x32xf32>
    %cst_33 = arith.constant dense<0.000000e+00> : vector<8x4xf32>
    %108 = vector.multi_reduction <add>, %107, %cst_33 [2] : vector<8x4x32xf32> to vector<8x4xf32>
    %109 = vector.shape_cast %108 : vector<8x4xf32> to vector<8x4x1xf32>
    %110 = math.sqrt %109 : vector<8x4x1xf32>
    %cst_34 = arith.constant 0.000000e+00 : f32
    %111 = vector.broadcast %cst_34 : f32 to vector<8x4x1xf32>
    %112 = arith.subf %111, %2 : vector<8x4x1xf32>
    %cst_35 = arith.constant 6.000000e-03 : f32
    %113 = vector.broadcast %cst_35 : f32 to vector<8x4x1xf32>
    %114 = arith.maximumf %98, %113 : vector<8x4x1xf32>
    %115 = arith.mulf %112, %114 : vector<8x4x1xf32>
    %116 = math.exp %115 : vector<8x4x1xf32>
    %cst_36 = arith.constant 0.000000e+00 : f32
    %117 = vector.broadcast %cst_36 : f32 to vector<8x4x1xf32>
    %118 = arith.subf %117, %2 : vector<8x4x1xf32>
    %cst_37 = arith.constant 6.000000e-03 : f32
    %119 = vector.broadcast %cst_37 : f32 to vector<8x4x1xf32>
    %120 = arith.maximumf %104, %119 : vector<8x4x1xf32>
    %121 = arith.mulf %118, %120 : vector<8x4x1xf32>
    %122 = math.exp %121 : vector<8x4x1xf32>
    %cst_38 = arith.constant 0.000000e+00 : f32
    %123 = vector.broadcast %cst_38 : f32 to vector<8x4x1xf32>
    %124 = arith.subf %123, %2 : vector<8x4x1xf32>
    %cst_39 = arith.constant 6.000000e-03 : f32
    %125 = vector.broadcast %cst_39 : f32 to vector<8x4x1xf32>
    %126 = arith.maximumf %110, %125 : vector<8x4x1xf32>
    %127 = arith.mulf %124, %126 : vector<8x4x1xf32>
    %128 = math.exp %127 : vector<8x4x1xf32>
    %129 = arith.addf %116, %122 : vector<8x4x1xf32>
    %cst_40 = arith.constant 2.000000e+00 : f32
    %130 = vector.broadcast %cst_40 : f32 to vector<8x4x1xf32>
    %131 = arith.mulf %130, %128 : vector<8x4x1xf32>
    %132 = arith.subf %129, %131 : vector<8x4x1xf32>
    %133 = arith.addf %90, %132 : vector<8x4x1xf32>
    %134 = vector.extract_strided_slice %0 {offsets = [0, 3, 0], sizes = [8, 1, 32], strides = [1, 1, 1]} : vector<8x4x32xf32> to vector<8x1x32xf32>
    %135 = vector.extract_strided_slice %1 {offsets = [0, 3, 0], sizes = [8, 1, 32], strides = [1, 1, 1]} : vector<8x4x32xf32> to vector<8x1x32xf32>
    %136 = vector.broadcast %134 : vector<8x1x32xf32> to vector<8x4x32xf32>
    %137 = arith.subf %0, %136 : vector<8x4x32xf32>
    %138 = arith.mulf %137, %137 : vector<8x4x32xf32>
    %cst_41 = arith.constant dense<0.000000e+00> : vector<8x4xf32>
    %139 = vector.multi_reduction <add>, %138, %cst_41 [2] : vector<8x4x32xf32> to vector<8x4xf32>
    %140 = vector.shape_cast %139 : vector<8x4xf32> to vector<8x4x1xf32>
    %141 = math.sqrt %140 : vector<8x4x1xf32>
    %142 = vector.broadcast %135 : vector<8x1x32xf32> to vector<8x4x32xf32>
    %143 = arith.subf %1, %142 : vector<8x4x32xf32>
    %144 = arith.mulf %143, %143 : vector<8x4x32xf32>
    %cst_42 = arith.constant dense<0.000000e+00> : vector<8x4xf32>
    %145 = vector.multi_reduction <add>, %144, %cst_42 [2] : vector<8x4x32xf32> to vector<8x4xf32>
    %146 = vector.shape_cast %145 : vector<8x4xf32> to vector<8x4x1xf32>
    %147 = math.sqrt %146 : vector<8x4x1xf32>
    %148 = vector.broadcast %135 : vector<8x1x32xf32> to vector<8x4x32xf32>
    %149 = arith.subf %0, %148 : vector<8x4x32xf32>
    %150 = arith.mulf %149, %149 : vector<8x4x32xf32>
    %cst_43 = arith.constant dense<0.000000e+00> : vector<8x4xf32>
    %151 = vector.multi_reduction <add>, %150, %cst_43 [2] : vector<8x4x32xf32> to vector<8x4xf32>
    %152 = vector.shape_cast %151 : vector<8x4xf32> to vector<8x4x1xf32>
    %153 = math.sqrt %152 : vector<8x4x1xf32>
    %cst_44 = arith.constant 0.000000e+00 : f32
    %154 = vector.broadcast %cst_44 : f32 to vector<8x4x1xf32>
    %155 = arith.subf %154, %2 : vector<8x4x1xf32>
    %cst_45 = arith.constant 6.000000e-03 : f32
    %156 = vector.broadcast %cst_45 : f32 to vector<8x4x1xf32>
    %157 = arith.maximumf %141, %156 : vector<8x4x1xf32>
    %158 = arith.mulf %155, %157 : vector<8x4x1xf32>
    %159 = math.exp %158 : vector<8x4x1xf32>
    %cst_46 = arith.constant 0.000000e+00 : f32
    %160 = vector.broadcast %cst_46 : f32 to vector<8x4x1xf32>
    %161 = arith.subf %160, %2 : vector<8x4x1xf32>
    %cst_47 = arith.constant 6.000000e-03 : f32
    %162 = vector.broadcast %cst_47 : f32 to vector<8x4x1xf32>
    %163 = arith.maximumf %147, %162 : vector<8x4x1xf32>
    %164 = arith.mulf %161, %163 : vector<8x4x1xf32>
    %165 = math.exp %164 : vector<8x4x1xf32>
    %cst_48 = arith.constant 0.000000e+00 : f32
    %166 = vector.broadcast %cst_48 : f32 to vector<8x4x1xf32>
    %167 = arith.subf %166, %2 : vector<8x4x1xf32>
    %cst_49 = arith.constant 6.000000e-03 : f32
    %168 = vector.broadcast %cst_49 : f32 to vector<8x4x1xf32>
    %169 = arith.maximumf %153, %168 : vector<8x4x1xf32>
    %170 = arith.mulf %167, %169 : vector<8x4x1xf32>
    %171 = math.exp %170 : vector<8x4x1xf32>
    %172 = arith.addf %159, %165 : vector<8x4x1xf32>
    %cst_50 = arith.constant 2.000000e+00 : f32
    %173 = vector.broadcast %cst_50 : f32 to vector<8x4x1xf32>
    %174 = arith.mulf %173, %171 : vector<8x4x1xf32>
    %175 = arith.subf %172, %174 : vector<8x4x1xf32>
    %176 = arith.addf %133, %175 : vector<8x4x1xf32>
    %177 = arith.mulf %176, %3 : vector<8x4x1xf32>
    %cst_51 = arith.constant dense<0.000000e+00> : vector<8x1xf32>
    %178 = vector.multi_reduction <add>, %177, %cst_51 [1] : vector<8x4x1xf32> to vector<8x1xf32>
    %c0_52 = arith.constant 0 : index
    %c0_53 = arith.constant 0 : index
    %179 = vector.load %arg5[%c0_52, %c0_53] : memref<8x1xf32, #tpu.memory_space<vmem>>, vector<8x1xf32>
    tpu.vector_store %arg5[%c0_52, %c0_53], %178 {strides = array<i32>} : memref<8x1xf32, #tpu.memory_space<vmem>>, vector<8x1xf32>,
    return
  }
  func.func @transform_0(%arg0: i32) -> (i32, i32, i32) {
    %c0_i32 = arith.constant 0 : i32
    %c0_i32_0 = arith.constant 0 : i32
    %c0_i32_1 = arith.constant 0 : i32
    return %arg0, %c0_i32, %c0_i32_0 : i32, i32, i32
  }
  func.func @transform_1(%arg0: i32) -> (i32, i32, i32) {
    %c0_i32 = arith.constant 0 : i32
    %c0_i32_0 = arith.constant 0 : i32
    %c0_i32_1 = arith.constant 0 : i32
    return %arg0, %c0_i32, %c0_i32_0 : i32, i32, i32
  }
  func.func @transform_2(%arg0: i32) -> (i32, i32, i32) {
    %c0_i32 = arith.constant 0 : i32
    %c0_i32_0 = arith.constant 0 : i32
    %c0_i32_1 = arith.constant 0 : i32
    return %arg0, %c0_i32, %c0_i32_0 : i32, i32, i32
  }
  func.func @transform_3(%arg0: i32) -> (i32, i32, i32) {
    %c0_i32 = arith.constant 0 : i32
    %c0_i32_0 = arith.constant 0 : i32
    %c0_i32_1 = arith.constant 0 : i32
    return %arg0, %c0_i32, %c0_i32_0 : i32, i32, i32
  }
  func.func @transform_4(%arg0: i32) -> (i32, i32) {
    %c0_i32 = arith.constant 0 : i32
    %c0_i32_0 = arith.constant 0 : i32
    return %arg0, %c0_i32 : i32, i32
  }
}

</mosaic_0001>

<bundles_post_ra>
// kernel: tpu_custom_call.1
= control target key start
LH: loop header
LB: loop body
LE: loop exit
PB: predicated region body
PF: predicated region fallthrough
CT: control target
= control target key end

     0   :  { %vm73_vm0 = vcmask 257024   ;;  %s4875_s0 = inlined_call_operand.vmem [shape: f32[8,4,32], index: 0, kind: input, shape index: {}]   ;;  %s4876_s1 = inlined_call_operand.vmem [shape: f32[8,4,32], index: 1, kind: input, shape index: {}]   ;;  %s4877_s2 = inlined_call_operand.vmem [shape: f32[8,4,1], index: 2, kind: input, shape index: {}]   ;;  %s4878_s3 = inlined_call_operand.vmem [shape: f32[8,4,1], index: 3, kind: input, shape index: {}]   ;;  %s4879_s4 = inlined_call_operand.vmem [shape: f32[8,1], index: 4, kind: output, shape index: {}]  }
   0x1   :  { %v2790_v0 = vld [vmem:[%s4875_s0 + $0x10] sm:$0xf]  ;;  %v2795_v1 = vld [vmem:[%s4875_s0 + $0x8] sm:$0xf]  ;;  %v2800_v2 = vld [vmem:[%s4875_s0] sm:$0xf] }
   0x2   :  { %v53_v3 = vperm.slane %v2790_v0, 0  ;;  %v51_v4 = vperm.slane %v2795_v1, 0  ;;  %v49_v5 = vperm.slane %v2800_v2, 0  ;;  %v2808_v6 = vld [vmem:[%s4875_s0 + $0x14] sm:$0xf] }
   0x3   :  { %v54_v7 = vperm.slane %v2808_v6, 0  ;;  %v2814_v8 = vld [vmem:[%s4875_s0 + $0xc] sm:$0xf]  ;;  %v2819_v9 = vld [vmem:[%s4875_s0 + $0x4] sm:$0xf] }
   0x4   :  { %v61_v10 = vsub.f32 %v2790_v0, %v53_v3  ;;  %v59_v11 = vsub.f32 %v2795_v1, %v51_v4  ;;  %v57_v12 = vsub.f32 %v2800_v2, %v49_v5  ;;  %v52_v13 = vperm.slane %v2814_v8, 0  ;;  %v2832_v21 = vld [vmem:[%s4876_s1] sm:$0xf]  ;;  %v2837_v22 = vld [vmem:[%s4875_s0 + $0x1c] sm:$0xf] }
   0x5   :  { %v62_v14 = vsub.f32 %v2808_v6, %v54_v7  ;;  %v50_v15 = vperm.slane %v2819_v9, 0  ;;  %v2845_v26 = vld [vmem:[%s4875_s0 + $0x18] sm:$0xf]  ;;  %v194_v29 = vperm.slane %v2832_v21, 0  ;;  %v56_v30 = vperm.slane %v2837_v22, 0 }
   0x6   :  { %v69_v16 = vmul.f32 %v61_v10, %v61_v10  ;;  %v67_v17 = vmul.f32 %v59_v11, %v59_v11  ;;  %v65_v18 = vmul.f32 %v57_v12, %v57_v12  ;;  %v60_v19 = vsub.f32 %v2814_v8, %v52_v13  ;;  %v2859_v39 = vld [vmem:[%s4876_s1 + $0xc] sm:$0xf]  ;;  %v2864_v40 = vld [vmem:[%s4876_s1 + $0x8] sm:$0xf]  ;;  %v2869_v41 = vld [vmem:[%s4876_s1 + $0x4] sm:$0xf] }
   0x7   :  { %v58_v20 = vsub.f32 %v2819_v9, %v50_v15  ;;  %v70_v27 = vmul.f32 %v62_v14, %v62_v14  ;;  %v55_v32 = vperm.slane %v2845_v26, 0  ;;  %v202_v35 = vsub.f32 %v2832_v21, %v194_v29  ;;  %v2883_v54 = vld [vmem:[%s4876_s1 + $0x18] sm:$0xf]  ;;  %v2888_v55 = vld [vmem:[%s4876_s1 + $0x14] sm:$0xf] }
   0x8   :  { %v86_v23 = vsel %vm73_vm0, %v69_v16, 0.0  ;;  %v80_v24 = vsel %vm73_vm0, %v67_v17, 0.0  ;;  %v74_v25 = vsel %vm73_vm0, %v65_v18, 0.0  ;;  %v68_v28 = vmul.f32 %v60_v19, %v60_v19  ;;  %v2893_v56 = vld [vmem:[%s4876_s1 + $0x10] sm:$0xf] }
   0x9   :  { %87 = vadd.xlane.f32.xlu2 %v86_v23  ;;  %81 = vadd.xlane.f32.xlu1 %v80_v24  ;;  %v66_v31 = vmul.f32 %v58_v20, %v58_v20  ;;  %v89_v33 = vsel %vm73_vm0, %v70_v27, 0.0  ;;  %v64_v36 = vsub.f32 %v2837_v22, %v56_v30  ;;  %v63_v38 = vsub.f32 %v2845_v26, %v55_v32  ;;  %v2907_v11 = vld [vmem:[%s4876_s1 + $0x1c] sm:$0xf] }
   0xa   :  { %75 = vadd.xlane.f32.xlu0 %v74_v25  ;;  %v83_v34 = vsel %vm73_vm0, %v68_v28, 0.0  ;;  %v210_v42 = vmul.f32 %v202_v35, %v202_v35  ;;  %v197_v44 = vperm.slane %v2859_v39, 0  ;;  %v196_v45 = vperm.slane %v2864_v40, 0 }
   0xb   :  { %v77_v37 = vsel %vm73_vm0, %v66_v31, 0.0  ;;  %v72_v43 = vmul.f32 %v64_v36, %v64_v36  ;;  %v71_v46 = vmul.f32 %v63_v38, %v63_v38  ;;  %v195_v47 = vperm.slane %v2869_v41, 0 }
   0xc   :  { %v218_v48 = vsel %vm73_vm0, %v210_v42, 0.0  ;;  %v205_v50 = vsub.f32 %v2859_v39, %v197_v44  ;;  %v204_v51 = vsub.f32 %v2864_v40, %v196_v45  ;;  %v200_v59 = vperm.slane %v2883_v54, 0 }
   0xd   :  { %v95_v49 = vsel %vm73_vm0, %v72_v43, 0.0  ;;  %v92_v52 = vsel %vm73_vm0, %v71_v46, 0.0  ;;  %v203_v53 = vsub.f32 %v2869_v41, %v195_v47  ;;  %v199_v60 = vperm.slane %v2888_v55, 0 }
   0xe   :  { %v213_v57 = vmul.f32 %v205_v50, %v205_v50  ;;  %v212_v58 = vmul.f32 %v204_v51, %v204_v51  ;;  %v198_v62 = vperm.slane %v2893_v56, 0  ;;  %v208_v4 = vsub.f32 %v2883_v54, %v200_v59 }
   0xf   :  { %v211_v61 = vmul.f32 %v203_v53, %v203_v53  ;;  %v207_v5 = vsub.f32 %v2888_v55, %v199_v60  ;;  %v201_v15 = vperm.slane %v2907_v11, 0  ;;  %v339_v18 = vsub.f32 %v2819_v9, %v195_v47 }
  0x10   :  { %v227_v63 = vsel %vm73_vm0, %v213_v57, 0.0  ;;  %v224_v3 = vsel %vm73_vm0, %v212_v58, 0.0  ;;  %v206_v10 = vsub.f32 %v2893_v56, %v198_v62  ;;  %v216_v12 = vmul.f32 %v208_v4, %v208_v4 }
  0x11   :  { %90 = vadd.xlane.f32.xlu2 %v89_v33  ;;  %84 = vadd.xlane.f32.xlu1 %v83_v34  ;;  %v221_v7 = vsel %vm73_vm0, %v211_v61, 0.0  ;;  %v215_v13 = vmul.f32 %v207_v5, %v207_v5  ;;  %v338_v19 = vsub.f32 %v2800_v2, %v194_v29  ;;  %v209_v23 = vsub.f32 %v2907_v11, %v201_v15 }
  0x12   :  { %78 = vadd.xlane.f32.xlu0 %v77_v37  ;;  %v214_v14 = vmul.f32 %v206_v10, %v206_v10  ;;  %v236_v16 = vsel %vm73_vm0, %v216_v12, 0.0  ;;  %v347_v24 = vmul.f32 %v339_v18, %v339_v18  ;;  %v342_v31 = vsub.f32 %v2790_v0, %v198_v62 }
  0x13   :  { %v233_v17 = vsel %vm73_vm0, %v215_v13, 0.0  ;;  %v346_v25 = vmul.f32 %v338_v19, %v338_v19  ;;  %v217_v27 = vmul.f32 %v209_v23, %v209_v23  ;;  %v341_v32 = vsub.f32 %v2814_v8, %v197_v44 }
  0x14   :  { %v230_v20 = vsel %vm73_vm0, %v214_v14, 0.0  ;;  %v357_v28 = vsel %vm73_vm0, %v347_v24, 0.0  ;;  %v340_v33 = vsub.f32 %v2795_v1, %v196_v45  ;;  %v350_v34 = vmul.f32 %v342_v31, %v342_v31 }
  0x15   :  { %v354_v30 = vsel %vm73_vm0, %v346_v25, 0.0  ;;  %v239_v29 = vsel %vm73_vm0, %v217_v27, 0.0  ;;  %v349_v35 = vmul.f32 %v341_v32, %v341_v32  ;;  %v345_v42 = vsub.f32 %v2837_v22, %v201_v15 }
  0x16   :  { %v348_v36 = vmul.f32 %v340_v33, %v340_v33  ;;  %v366_v37 = vsel %vm73_vm0, %v350_v34, 0.0  ;;  %v344_v43 = vsub.f32 %v2845_v26, %v200_v59  ;;  %v343_v46 = vsub.f32 %v2808_v6, %v199_v60 }
  0x17   :  { %v363_v38 = vsel %vm73_vm0, %v349_v35, 0.0  ;;  %v353_v45 = vmul.f32 %v345_v42, %v345_v42  ;;  %v610_v51 = vperm.slane %v2800_v2, 1  ;;  %v613_v5 = vperm.slane %v2814_v8, 1 }
  0x18   :  { %v360_v44 = vsel %vm73_vm0, %v348_v36, 0.0  ;;  %v352_v47 = vmul.f32 %v344_v43, %v344_v43  ;;  %v351_v50 = vmul.f32 %v343_v46, %v343_v46  ;;  %v754_v18 = vperm.slane %v2832_v21, 1 }
  0x19   :  { %219 = vadd.xlane.f32.xlu2 %v218_v48  ;;  %96 = vadd.xlane.f32.xlu1 %v95_v49  ;;  %v612_v48 = vperm.slane %v2795_v1, 1  ;;  %v611_v49 = vperm.slane %v2819_v9, 1  ;;  %v618_v60 = vsub.f32 %v2800_v2, %v610_v51  ;;  %v621_v15 = vsub.f32 %v2814_v8, %v613_v5 }
  0x1a   :  { %93 = vadd.xlane.f32.xlu0 %v92_v52  ;;  %v375_v52 = vsel %vm73_vm0, %v353_v45, 0.0  ;;  %v372_v53 = vsel %vm73_vm0, %v352_v47, 0.0  ;;  %v369_v59 = vsel %vm73_vm0, %v351_v50, 0.0  ;;  %v617_v19 = vperm.slane %v2837_v22, 1 }
  0x1b   :  { %v620_v57 = vsub.f32 %v2795_v1, %v612_v48  ;;  %v619_v58 = vsub.f32 %v2819_v9, %v611_v49  ;;  %v626_v4 = vmul.f32 %v618_v60, %v618_v60  ;;  %v616_v23 = vperm.slane %v2845_v26, 1 }
  0x1c   :  { %v762_v27 = vsub.f32 %v2832_v21, %v754_v18  ;;  %v757_v33 = vperm.slane %v2859_v39, 1  ;;  %v756_v34 = vperm.slane %v2864_v40, 1  ;;  %v755_v36 = vperm.slane %v2869_v41, 1 }
  0x1d   :  { %v628_v61 = vmul.f32 %v620_v57, %v620_v57  ;;  %v627_v62 = vmul.f32 %v619_v58, %v619_v58  ;;  %v634_v14 = vsel %vm73_vm0, %v626_v4, 0.0  ;;  %v624_v31 = vsub.f32 %v2845_v26, %v616_v23 }
  0x1e   :  { %v770_v32 = vmul.f32 %v762_v27, %v762_v27  ;;  %v765_v42 = vsub.f32 %v2859_v39, %v757_v33  ;;  %v764_v43 = vsub.f32 %v2864_v40, %v756_v34  ;;  %v763_v46 = vsub.f32 %v2869_v41, %v755_v36 }
  0x1f   :  { %v637_v10 = vsel %vm73_vm0, %v627_v62, 0.0  ;;  %v632_v35 = vmul.f32 %v624_v31, %v624_v31  ;;  %v760_v48 = vperm.slane %v2883_v54, 1  ;;  %v759_v49 = vperm.slane %v2888_v55, 1 }
  0x20   :  { %v773_v45 = vmul.f32 %v765_v42, %v765_v42  ;;  %v772_v47 = vmul.f32 %v764_v43, %v764_v43  ;;  %v771_v50 = vmul.f32 %v763_v46, %v763_v46  ;;  %v758_v51 = vperm.slane %v2893_v56, 1 }
  0x21   :  { %228 = vadd.xlane.f32.xlu2 %v227_v63  ;;  %225 = vadd.xlane.f32.xlu1 %v224_v3  ;;  %v615_v63 = vperm.slane %v2808_v6, 1  ;;  %v614_v3 = vperm.slane %v2790_v0, 1  ;;  %v768_v57 = vsub.f32 %v2883_v54, %v760_v48  ;;  %v767_v41 = vsub.f32 %v2888_v55, %v759_v49 }
  0x22   :  { %222 = vadd.xlane.f32.xlu0 %v221_v7  ;;  %v640_v7 = vsel %vm73_vm0, %v628_v61, 0.0  ;;  %v781_v58 = vsel %vm73_vm0, %v771_v50, 0.0  ;;  %v899_v54 = vsub.f32 %v2819_v9, %v755_v36  ;;  %v898_v55 = vsub.f32 %v2800_v2, %v754_v18  ;;  %v33_v50 = vld [vmem:[%s4877_s2] sm:$0xf] }
  0x23   :  { %v623_v12 = vsub.f32 %v2808_v6, %v615_v63  ;;  %v622_v13 = vsub.f32 %v2790_v0, %v614_v3  ;;  %v776_v60 = vmul.f32 %v768_v57, %v768_v57  ;;  %v775_v61 = vmul.f32 %v767_v41, %v767_v41 }
  0x24   :  { %v761_v63 = vperm.slane %v2907_v11, 1  ;;  %v900_v18 = vsub.f32 %v2795_v1, %v756_v34  ;;  %v904_v27 = vsub.f32 %v2845_v26, %v760_v48  ;;  %v1164_v31 = vperm.slane %v2795_v1, 2 }
  0x25   :  { %v796_v3 = vsel %vm73_vm0, %v776_v60, 0.0  ;;  %v793_v4 = vsel %vm73_vm0, %v775_v61, 0.0  ;;  %v1165_v60 = vperm.slane %v2814_v8, 2 }
  0x26   :  { %v912_v34 = vmul.f32 %v904_v27, %v904_v27  ;;  %v1172_v36 = vsub.f32 %v2795_v1, %v1164_v31 }
  0x29   :  { %237 = vadd.xlane.f32.xlu2 %v236_v16  ;;  %234 = vadd.xlane.f32.xlu1 %v233_v17  ;;  %v631_v16 = vmul.f32 %v623_v12, %v623_v12  ;;  %v630_v17 = vmul.f32 %v622_v13, %v622_v13 }
  0x2a   :  { %231 = vadd.xlane.f32.xlu0 %v230_v20  ;;  %v629_v20 = vmul.f32 %v621_v15, %v621_v15  ;;  %v902_v15 = vsub.f32 %v2790_v0, %v758_v51 }
  0x2b   :  { %v649_v24 = vsel %vm73_vm0, %v631_v16, 0.0  ;;  %v646_v25 = vsel %vm73_vm0, %v630_v17, 0.0  ;;  %v901_v16 = vsub.f32 %v2814_v8, %v757_v33 }
  0x31   :  { %358 = vadd.xlane.f32.xlu2 %v357_v28  ;;  %355 = vadd.xlane.f32.xlu1 %v354_v30  ;;  %v625_v28 = vsub.f32 %v2837_v22, %v617_v19  ;;  %v643_v30 = vsel %vm73_vm0, %v629_v20, 0.0  ;;  %v909_v19 = vmul.f32 %v901_v16, %v901_v16  ;;  %v908_v20 = vmul.f32 %v900_v18, %v900_v18 }
  0x32   :  { %240 = vadd.xlane.f32.xlu0 %v239_v29 }
  0x33   :  { %v633_v29 = vmul.f32 %v625_v28, %v625_v28  ;;  %v920_v28 = vsel %vm73_vm0, %v908_v20, 0.0 }
  0x39   :  { %367 = vadd.xlane.f32.xlu2 %v366_v37  ;;  %364 = vadd.xlane.f32.xlu1 %v363_v38  ;;  %v778_v37 = vsel %vm73_vm0, %v770_v32, 0.0  ;;  %v655_v38 = vsel %vm73_vm0, %v633_v29, 0.0  ;;  %v1163_v32 = vperm.slane %v2819_v9, 2  ;;  %v1162_v29 = vperm.slane %v2800_v2, 2 }
  0x3a   :  { %361 = vadd.xlane.f32.xlu0 %v360_v44  ;;  %v652_v44 = vsel %vm73_vm0, %v632_v35, 0.0 }
  0x3b   :  { %v1170_v43 = vsub.f32 %v2800_v2, %v1162_v29  ;;  %v37_v2 = vld [vmem:[%s4877_s2 + $0x10] sm:$0xf] }
  0x3c   :  { %v3024_v41 = vsub.f32 0.0, %v37_v2 }
  0x3d   :  { %v1178_v48 = vmul.f32 %v1170_v43, %v1170_v43 }
  0x41   :  { %376 = vadd.xlane.f32.xlu2 %v375_v52  ;;  %373 = vadd.xlane.f32.xlu1 %v372_v53  ;;  %v787_v52 = vsel %vm73_vm0, %v773_v45, 0.0  ;;  %v784_v53 = vsel %vm73_vm0, %v772_v47, 0.0  ;;  %v932_v45 = vsel %vm73_vm0, %v912_v34, 0.0 }
  0x42   :  { %370 = vadd.xlane.f32.xlu0 %v369_v59  ;;  %v766_v59 = vsub.f32 %v2893_v56, %v758_v51  ;;  %v769_v56 = vsub.f32 %v2907_v11, %v761_v63  ;;  %v910_v11 = vmul.f32 %v902_v15, %v902_v15  ;;  %v1167_v51 = vperm.slane %v2808_v6, 2 }
  0x44   :  { %v774_v62 = vmul.f32 %v766_v59, %v766_v59  ;;  %v777_v12 = vmul.f32 %v769_v56, %v769_v56  ;;  %v926_v23 = vsel %vm73_vm0, %v910_v11, 0.0  ;;  %v1173_v11 = vsub.f32 %v2814_v8, %v1165_v60 }
  0x46   :  { %v790_v5 = vsel %vm73_vm0, %v774_v62, 0.0  ;;  %v799_v17 = vsel %vm73_vm0, %v777_v12, 0.0  ;;  %v1181_v31 = vmul.f32 %v1173_v11, %v1173_v11 }
  0x49   :  { %641 = vadd.xlane.f32.xlu2 %v640_v7  ;;  %638 = vadd.xlane.f32.xlu1 %v637_v10  ;;  %v907_v7 = vmul.f32 %v899_v54, %v899_v54  ;;  %v906_v10 = vmul.f32 %v898_v55, %v898_v55  ;;  %v36_v54 = vld [vmem:[%s4877_s2 + $0xc] sm:$0xf] }
  0x4a   :  { %635 = vadd.xlane.f32.xlu0 %v634_v14  ;;  %v3053_v18 = vsub.f32 0.0, %v36_v54 }
  0x4b   :  { %v917_v13 = vsel %vm73_vm0, %v907_v7, 0.0  ;;  %v914_v14 = vsel %vm73_vm0, %v906_v10, 0.0 }
  0x51   :  { %650 = vadd.xlane.f32.xlu2 %v649_v24  ;;  %647 = vadd.xlane.f32.xlu1 %v646_v25  ;;  %v923_v24 = vsel %vm73_vm0, %v909_v19, 0.0  ;;  %v905_v25 = vsub.f32 %v2837_v22, %v761_v63 }
  0x52   :  { %644 = vadd.xlane.f32.xlu0 %v643_v30  ;;  %v903_v30 = vsub.f32 %v2808_v6, %v759_v49  ;;  %v35_v49 = vld [vmem:[%s4877_s2 + $0x8] sm:$0xf] }
  0x53   :  { %v913_v33 = vmul.f32 %v905_v25, %v905_v25  ;;  %v3030_v63 = vsub.f32 0.0, %v35_v49 }
  0x54   :  { %v911_v35 = vmul.f32 %v903_v30, %v903_v30 }
  0x55   :  { %v935_v46 = vsel %vm73_vm0, %v913_v33, 0.0 }
  0x56   :  { %v929_v1 = vsel %vm73_vm0, %v911_v35, 0.0 }
  0x59   :  { %779 = vadd.xlane.f32.xlu2 %v778_v37  ;;  %656 = vadd.xlane.f32.xlu1 %v655_v38  ;;  %v1171_v37 = vsub.f32 %v2819_v9, %v1163_v32  ;;  %v1180_v9 = vmul.f32 %v1172_v36, %v1172_v36 }
  0x5a   :  { %653 = vadd.xlane.f32.xlu0 %v652_v44 }
  0x5b   :  { %v1179_v47 = vmul.f32 %v1171_v37, %v1171_v37 }
  0x5d   :  { %v1189_v59 = vsel %vm73_vm0, %v1179_v47, 0.0 }
  0x61   :  { %788 = vadd.xlane.f32.xlu2 %v787_v52  ;;  %785 = vadd.xlane.f32.xlu1 %v784_v53  ;;  %v38_v52 = vld [vmem:[%s4877_s2 + $0x14] sm:$0xf]  ;;  %v1166_v53 = vperm.slane %v2790_v0, 2 }
  0x62   :  { %782 = vadd.xlane.f32.xlu0 %v781_v58  ;;  %v1192_v58 = vsel %vm73_vm0, %v1180_v9, 0.0  ;;  %v3043_v10 = vsub.f32 0.0, %v38_v52 }
  0x63   :  { %v1174_v16 = vsub.f32 %v2790_v0, %v1166_v53 }
  0x65   :  { %v1182_v8 = vmul.f32 %v1174_v16, %v1174_v16 }
  0x67   :  { %v1198_v2 = vsel %vm73_vm0, %v1182_v8, 0.0 }
  0x69   :  { %797 = vadd.xlane.f32.xlu2 %v796_v3  ;;  %794 = vadd.xlane.f32.xlu1 %v793_v4  ;;  %v3032_v3 = vsub.f32 0.0, %v33_v50 }
  0x6a   :  { %791 = vadd.xlane.f32.xlu0 %v790_v5  ;;  %v1186_v5 = vsel %vm73_vm0, %v1178_v48, 0.0 }
  0x71   :  { %918 = vadd.xlane.f32.xlu2 %v917_v13  ;;  %915 = vadd.xlane.f32.xlu1 %v914_v14  ;;  %v1175_v13 = vsub.f32 %v2808_v6, %v1167_v51  ;;  %v1195_v51 = vsel %vm73_vm0, %v1181_v31, 0.0 }
  0x72   :  { %800 = vadd.xlane.f32.xlu0 %v799_v17 }
  0x73   :  { %v1183_v0 = vmul.f32 %v1175_v13, %v1175_v13 }
  0x79   :  { %927 = vadd.xlane.f32.xlu2 %v926_v23  ;;  %924 = vadd.xlane.f32.xlu1 %v923_v24 }
  0x7a   :  { %921 = vadd.xlane.f32.xlu0 %v920_v28 }
  0x7c   :  { %v2997_v38 = vpop.xlane.xlu2 %87  ;;  %v2999_v42 = vpop.xlane.xlu1 %81 }
  0x7d   :  { %2360 = vrsqrt.f32 %v2997_v38  ;;  %v3003_v44 = vpop.xlane.xlu0 %75  ;;  %vm153_vm1 = vcmp.eq.f32.partialorder %v2997_v38, inf  ;;  %vm155_vm2 = vcmp.eq.f32.partialorder %v2997_v38, 0.0  ;;  %v156_v6 = vand.u32 2147483648, %v2997_v38 }
  0x7e   :  { %2362 = vrsqrt.f32 %v2999_v42  ;;  %vm129_vm3 = vcmp.eq.f32.partialorder %v2999_v42, inf  ;;  %vm131_vm4 = vcmp.eq.f32.partialorder %v2999_v42, 0.0  ;;  %v132_v30 = vand.u32 2147483648, %v2999_v42 }
  0x7f   :  { %2364 = vrsqrt.f32 %v3003_v44  ;;  %vm105_vm5 = vcmp.eq.f32.partialorder %v3003_v44, inf  ;;  %vm107_vm6 = vcmp.eq.f32.partialorder %v3003_v44, 0.0 }
  0x81   :  { %936 = vadd.xlane.f32.xlu2 %v935_v46  ;;  %933 = vadd.xlane.f32.xlu1 %v932_v45  ;;  %v1201_v46 = vsel %vm73_vm0, %v1183_v0, 0.0 }
  0x82   :  { %930 = vadd.xlane.f32.xlu0 %v929_v1 }
  0x83   :  { %v2361_v57 = vpop.eup %2360 }
  0x84   :  { %v2363_v61 = vpop.eup %2362  ;;  %v147_v62 = vmul.f32 %v2361_v57, %v2997_v38  ;;  %v3034_v4 = vpop.xlane.xlu2 %90 }
  0x85   :  { %v3039_v55 = vpop.xlane.xlu1 %84  ;;  %v2365_v56 = vpop.eup %2364  ;;  %v123_v7 = vmul.f32 %v2363_v61, %v2999_v42  ;;  %2366 = vrsqrt.f32 %v3034_v4  ;;  %vm165_vm7 = vcmp.eq.f32.partialorder %v3034_v4, inf  ;;  %vm167_vm8 = vcmp.eq.f32.partialorder %v3034_v4, 0.0 }
  0x86   :  { %v3046_v12 = vpop.xlane.xlu0 %78  ;;  %v148_v14 = vmul.f32 %v2361_v57, %v147_v62  ;;  %v99_v15 = vmul.f32 %v2365_v56, %v3003_v44  ;;  %2368 = vrsqrt.f32 %v3039_v55  ;;  %v168_v11 = vand.u32 2147483648, %v3034_v4 }
  0x87   :  { %v124_v17 = vmul.f32 %v2363_v61, %v123_v7  ;;  %2370 = vrsqrt.f32 %v3046_v12  ;;  %vm141_vm9 = vcmp.eq.f32.partialorder %v3039_v55, inf  ;;  %vm143_vm10 = vcmp.eq.f32.partialorder %v3039_v55, 0.0 }
  0x88   :  { %v149_v19 = vmul.f32 0.5, %v148_v14  ;;  %v100_v20 = vmul.f32 %v2365_v56, %v99_v15  ;;  %vm117_vm11 = vcmp.eq.f32.partialorder %v3046_v12, inf  ;;  %vm119_vm12 = vcmp.eq.f32.partialorder %v3046_v12, 0.0 }
  0x89   :  { %v125_v23 = vmul.f32 0.5, %v124_v17  ;;  %1193 = vadd.xlane.f32.xlu2 %v1192_v58  ;;  %1190 = vadd.xlane.f32.xlu1 %v1189_v59 }
  0x8a   :  { %v150_v24 = vsub.f32 1.5, %v149_v19  ;;  %v101_v25 = vmul.f32 0.5, %v100_v20  ;;  %1187 = vadd.xlane.f32.xlu0 %v1186_v5  ;;  %v108_v5 = vand.u32 2147483648, %v3003_v44 }
  0x8b   :  { %v2367_v27 = vpop.eup %2366  ;;  %v126_v28 = vsub.f32 1.5, %v125_v23 }
  0x8c   :  { %v2369_v32 = vpop.eup %2368  ;;  %v151_v29 = vmul.f32 %v2361_v57, %v150_v24  ;;  %v102_v33 = vsub.f32 1.5, %v101_v25  ;;  %v159_v34 = vmul.f32 %v2367_v27, %v3034_v4  ;;  %v3065_v35 = vpop.xlane.xlu2 %219 }
  0x8d   :  { %v127_v36 = vmul.f32 %v2363_v61, %v126_v28  ;;  %v135_v37 = vmul.f32 %v2369_v32, %v3039_v55  ;;  %2372 = vrsqrt.f32 %v3065_v35  ;;  %v3069_v43 = vpop.xlane.xlu1 %96  ;;  %v2371_v45 = vpop.eup %2370  ;;  %vm249_vm13 = vcmp.eq.f32.partialorder %v3065_v35, inf }
  0x8e   :  { %v152_v1 = vmul.f32 %v151_v29, %v2997_v38  ;;  %v103_v9 = vmul.f32 %v2365_v56, %v102_v33  ;;  %v160_v47 = vmul.f32 %v2367_v27, %v159_v34  ;;  %v111_v50 = vmul.f32 %v2371_v45, %v3046_v12 }
  0x8f   :  { %v128_v48 = vmul.f32 %v127_v36, %v2999_v42  ;;  %v136_v49 = vmul.f32 %v2369_v32, %v135_v37  ;;  %2374 = vrsqrt.f32 %v3069_v43  ;;  %vm251_vm14 = vcmp.eq.f32.partialorder %v3065_v35, 0.0 }
  0x90   :  { %v154_v52 = vsel %vm153_vm1, %v2997_v38, %v152_v1  ;;  %v104_v53 = vmul.f32 %v103_v9, %v3003_v44  ;;  %v161_v57 = vmul.f32 0.5, %v160_v47  ;;  %v112_v61 = vmul.f32 %v2371_v45, %v111_v50  ;;  %v34_v9 = vld [vmem:[%s4877_s2 + $0x4] sm:$0xf] }
  0x91   :  { %v157_v58 = vsel %vm155_vm2, %v156_v6, %v154_v52  ;;  %v130_v59 = vsel %vm129_vm3, %v2999_v42, %v128_v48  ;;  %v137_v60 = vmul.f32 0.5, %v136_v49  ;;  %1202 = vadd.xlane.f32.xlu2 %v1201_v46  ;;  %1199 = vadd.xlane.f32.xlu1 %v1198_v2  ;;  %v120_v47 = vand.u32 2147483648, %v3046_v12  ;;  %v40_v2 = vld [vmem:[%s4877_s2 + $0x1c] sm:$0xf] }
  0x92   :  { %v133_v62 = vsel %vm131_vm4, %v132_v30, %v130_v59  ;;  %v106_v54 = vsel %vm105_vm5, %v3003_v44, %v104_v53  ;;  %v162_v56 = vsub.f32 1.5, %v161_v57  ;;  %1196 = vadd.xlane.f32.xlu0 %v1195_v51  ;;  %v113_v13 = vmul.f32 0.5, %v112_v61 }
  0x93   :  { %v2373_v38 = vpop.eup %2372  ;;  %v138_v7 = vsub.f32 1.5, %v137_v60  ;;  %v486_v14 = vmax.f32 %v157_v58, 0.006  ;;  %v109_v42 = vsel %vm107_vm6, %v108_v5, %v106_v54  ;;  %v484_v17 = vmax.f32 %v133_v62, 0.006 }
  0x94   :  { %v163_v15 = vmul.f32 %v2367_v27, %v162_v56  ;;  %v243_v16 = vmul.f32 %v2373_v38, %v3065_v35  ;;  %v114_v20 = vsub.f32 1.5, %v113_v13  ;;  %v482_v24 = vmax.f32 %v109_v42, 0.006  ;;  %v3129_v57 = vpop.xlane.xlu2 %228 }
  0x95   :  { %v139_v19 = vmul.f32 %v2369_v32, %v138_v7  ;;  %v2375_v6 = vpop.eup %2374  ;;  %v494_v27 = vmul.f32 %v486_v14, %v3024_v41  ;;  %v144_v30 = vand.u32 2147483648, %v3039_v55  ;;  %v3109_v32 = vpop.xlane.xlu0 %93  ;;  %v492_v29 = vmul.f32 %v484_v17, %v3030_v63 }
  0x96   :  { %v164_v23 = vmul.f32 %v163_v15, %v3034_v4  ;;  %v244_v0 = vmul.f32 %v2373_v38, %v243_v16  ;;  %v115_v25 = vmul.f32 %v2371_v45, %v114_v20  ;;  %v183_v8 = vmul.f32 %v2375_v6, %v3069_v43  ;;  %v3139_v54 = vpop.xlane.xlu1 %225 }
  0x97   :  { %v140_v44 = vmul.f32 %v139_v19, %v3039_v55  ;;  %v490_v1 = vmul.f32 %v482_v24, %v3032_v3  ;;  %v502_v51 = vmul.f32 1.442695, %v492_v29  ;;  %v3132_v59 = vsub.f32 0.0, %v34_v9 }
  0x98   :  { %v166_v28 = vsel %vm165_vm7, %v3034_v4, %v164_v23  ;;  %v245_v31 = vmul.f32 0.5, %v244_v0  ;;  %v116_v36 = vmul.f32 %v115_v25, %v3046_v12  ;;  %v184_v48 = vmul.f32 %v2375_v6, %v183_v8 }
  0x99   :  { %v169_v33 = vsel %vm167_vm8, %v168_v11, %v166_v28  ;;  %v142_v34 = vsel %vm141_vm9, %v3039_v55, %v140_v44  ;;  %v506_v55 = vmul.f32 1.442695, %v494_v27  ;;  %2376 = vrsqrt.f32 %v3109_v32  ;;  %v39_v11 = vld [vmem:[%s4877_s2 + $0x18] sm:$0xf] }
  0x9a   :  { %v487_v37 = vmax.f32 %v169_v33, 0.006  ;;  %v145_v46 = vsel %vm143_vm10, %v144_v30, %v142_v34  ;;  %v246_v45 = vsub.f32 1.5, %v245_v31  ;;  %v118_v4 = vsel %vm117_vm11, %v3046_v12, %v116_v36 }
  0x9b   :  { %v485_v49 = vmax.f32 %v145_v46, 0.006  ;;  %v121_v52 = vsel %vm119_vm12, %v120_v47, %v118_v4  ;;  %v185_v53 = vmul.f32 0.5, %v184_v48  ;;  %v498_v61 = vmul.f32 1.442695, %v490_v1 }
  0x9c   :  { %v247_v50 = vmul.f32 %v2373_v38, %v246_v45  ;;  %v495_v58 = vmul.f32 %v487_v37, %v3043_v10  ;;  %v3137_v62 = vsub.f32 0.0, %v40_v2  ;;  %2378 = vpow2.f32 %v506_v55  ;;  %v3174_v34 = vpop.xlane.xlu2 %237 }
  0x9d   :  { %v186_v12 = vsub.f32 1.5, %v185_v53  ;;  %v493_v5 = vmul.f32 %v485_v49, %v3053_v18  ;;  %v483_v56 = vmax.f32 %v121_v52, 0.006  ;;  %2380 = vpow2.f32 %v502_v51  ;;  %v3147_v15 = vpop.xlane.xlu0 %222 }
  0x9e   :  { %v248_v60 = vmul.f32 %v247_v50, %v3065_v35  ;;  %v252_v7 = vand.u32 2147483648, %v3065_v35  ;;  %v1306_v14 = vperm.slane %v2832_v21, 2  ;;  %v508_v42 = vmul.f32 1.442695, %v495_v58  ;;  %v3184_v47 = vpop.xlane.xlu1 %234 }
  0x9f   :  { %v187_v13 = vmul.f32 %v2375_v6, %v186_v12  ;;  %2382 = vrsqrt.f32 %v3129_v57  ;;  %v1169_v16 = vperm.slane %v2837_v22, 2  ;;  %vm189_vm15 = vcmp.eq.f32.partialorder %v3069_v43, inf  ;;  %v2377_v20 = vpop.eup %2376 }
  0xa0   :  { %v250_v38 = vsel %vm249_vm13, %v3065_v35, %v248_v60  ;;  %2384 = vpow2.f32 %v498_v61  ;;  %v1168_v19 = vperm.slane %v2845_v26, 2  ;;  %v504_v6 = vmul.f32 1.442695, %v493_v5 }
  0xa1   :  { %v253_v17 = vsel %vm251_vm14, %v252_v7, %v250_v38  ;;  %v491_v35 = vmul.f32 %v483_v56, %v3132_v59  ;;  %v188_v23 = vmul.f32 %v187_v13, %v3069_v43  ;;  %2386 = vrsqrt.f32 %v3139_v54 }
  0xa2   :  { %vm191_vm1 = vcmp.eq.f32.partialorder %v3069_v43, 0.0  ;;  %v192_v0 = vand.u32 2147483648, %v3069_v43  ;;  %v171_v24 = vmul.f32 %v2377_v20, %v3109_v32  ;;  %2388 = vrsqrt.f32 %v3147_v15  ;;  %v3162_v44 = vpop.eup %2378 }
  0xa3   :  { %2390 = vpow2.f32 %v508_v42  ;;  %v514_v25 = vmax.f32 %v253_v17, 0.006  ;;  %v3164_v8 = vsub.f32 0.0, %v39_v11  ;;  %v1314_v27 = vsub.f32 %v2832_v21, %v1306_v14  ;;  %v3169_v28 = vpop.eup %2380  ;;  %v3339_v21 = vld [vmem:[%s4876_s1 + $0x10] sm:$0xf] }
  0xa4   :  { %v172_v30 = vmul.f32 %v2377_v20, %v171_v24  ;;  %v180_v31 = vand.u32 2147483648, %v3109_v32  ;;  %v1177_v29 = vsub.f32 %v2837_v22, %v1169_v16  ;;  %v1176_v33 = vsub.f32 %v2845_v26, %v1168_v19 }
  0xa5   :  { %v2383_v36 = vpop.eup %2382  ;;  %2392 = vpow2.f32 %v504_v6  ;;  %v500_v37 = vmul.f32 1.442695, %v491_v35  ;;  %v190_v46 = vsel %vm189_vm15, %v3069_v43, %v188_v23  ;;  %vm177_vm2 = vcmp.eq.f32.partialorder %v3109_v32, inf  ;;  %v3200_v43 = vpop.xlane.xlu0 %231 }
  0xa6   :  { %v1322_v45 = vmul.f32 %v1314_v27, %v1314_v27  ;;  %v3180_v1 = vpop.eup %2384  ;;  %v173_v9 = vmul.f32 0.5, %v172_v30  ;;  %v279_v4 = vmul.f32 %v2383_v36, %v3129_v57  ;;  %v288_v22 = vand.u32 2147483648, %v3129_v57 }
  0xa7   :  { %v1185_v26 = vmul.f32 %v1177_v29, %v1177_v29  ;;  %v2387_v2 = vpop.eup %2386  ;;  %v522_v48 = vmul.f32 %v514_v25, %v3032_v3  ;;  %v1184_v49 = vmul.f32 %v1176_v33, %v1176_v33  ;;  %2394 = vrsqrt.f32 %v3174_v34 }
  0xa8   :  { %v1330_v55 = vsel %vm73_vm0, %v1322_v45, 0.0  ;;  %v2389_v50 = vpop.eup %2388  ;;  %v193_v51 = vsel %vm191_vm1, %v192_v0, %v190_v46  ;;  %v174_v52 = vsub.f32 1.5, %v173_v9  ;;  %vm179_vm3 = vcmp.eq.f32.partialorder %v3109_v32, 0.0 }
  0xa9   :  { %v280_v53 = vmul.f32 %v2383_v36, %v279_v4  ;;  %v267_v58 = vmul.f32 %v2387_v2, %v3139_v54  ;;  %1331 = vadd.xlane.f32.xlu2 %v1330_v55  ;;  %v3193_v60 = vpop.eup %2390  ;;  %vm285_vm4 = vcmp.eq.f32.partialorder %v3129_v57, inf  ;;  %v255_v61 = vmul.f32 %v2389_v50, %v3147_v15 }
  0xaa   :  { %v1207_v12 = vsel %vm73_vm0, %v1185_v26, 0.0  ;;  %v1204_v5 = vsel %vm73_vm0, %v1184_v49, 0.0  ;;  %2396 = vrsqrt.f32 %v3184_v47  ;;  %v175_v56 = vmul.f32 %v2377_v20, %v174_v52 }
  0xab   :  { %2398 = vpow2.f32 %v500_v37  ;;  %v281_v38 = vmul.f32 0.5, %v280_v53  ;;  %vm287_vm5 = vcmp.eq.f32.partialorder %v3129_v57, 0.0  ;;  %v268_v7 = vmul.f32 %v2387_v2, %v267_v58  ;;  %1208 = vadd.xlane.f32.xlu1 %v1207_v12  ;;  %1205 = vadd.xlane.f32.xlu0 %v1204_v5  ;;  %v3203_v13 = vpop.eup %2392 }
  0xac   :  { %v530_v42 = vmul.f32 1.442695, %v522_v48  ;;  %v489_v16 = vmax.f32 %v193_v51, 0.006  ;;  %vm273_vm6 = vcmp.eq.f32.partialorder %v3139_v54, inf  ;;  %v276_v17 = vand.u32 2147483648, %v3139_v54 }
  0xad   :  { %v256_v11 = vmul.f32 %v2389_v50, %v255_v61  ;;  %v176_v19 = vmul.f32 %v175_v56, %v3109_v32  ;;  %v282_v6 = vsub.f32 1.5, %v281_v38  ;;  %v269_v35 = vmul.f32 0.5, %v268_v7  ;;  %v2395_v20 = vpop.eup %2394 }
  0xae   :  { %vm275_vm7 = vcmp.eq.f32.partialorder %v3139_v54, 0.0  ;;  %2400 = vrsqrt.f32 %v3200_v43  ;;  %vm261_vm8 = vcmp.eq.f32.partialorder %v3147_v15, inf  ;;  %vm263_vm9 = vcmp.eq.f32.partialorder %v3147_v15, 0.0 }
  0xaf   :  { %v257_v23 = vmul.f32 0.5, %v256_v11  ;;  %v264_v0 = vand.u32 2147483648, %v3147_v15  ;;  %v178_v24 = vsel %vm177_vm2, %v3109_v32, %v176_v19  ;;  %v283_v25 = vmul.f32 %v2383_v36, %v282_v6 }
  0xb0   :  { %v270_v27 = vsub.f32 1.5, %v269_v35  ;;  %v315_v30 = vmul.f32 %v2395_v20, %v3174_v34  ;;  %v2397_v29 = vpop.eup %2396  ;;  %2402 = vpow2.f32 %v530_v42  ;;  %v3218_v33 = vmul.f32 %v489_v16, %v3137_v62 }
  0xb1   :  { %v258_v37 = vsub.f32 1.5, %v257_v23  ;;  %v1309_v46 = vperm.slane %v2859_v39, 2  ;;  %v3221_v45 = vpop.eup %2398  ;;  %v284_v9 = vmul.f32 %v283_v25, %v3129_v57  ;;  %v1308_v48 = vperm.slane %v2864_v40, 2 }
  0xb2   :  { %v271_v4 = vmul.f32 %v2387_v2, %v270_v27  ;;  %v316_v26 = vmul.f32 %v2395_v20, %v315_v30  ;;  %v181_v36 = vsel %vm179_vm3, %v180_v31, %v178_v24  ;;  %v324_v49 = vand.u32 2147483648, %v3174_v34 }
  0xb3   :  { %v259_v55 = vmul.f32 %v2389_v50, %v258_v37  ;;  %v303_v51 = vmul.f32 %v2397_v29, %v3184_v47  ;;  %v286_v53 = vsel %vm285_vm4, %v3129_v57, %v284_v9  ;;  %vm321_vm10 = vcmp.eq.f32.partialorder %v3174_v34, inf }
  0xb4   :  { %v2401_v52 = vpop.eup %2400  ;;  %v272_v2 = vmul.f32 %v271_v4, %v3139_v54  ;;  %v317_v58 = vmul.f32 0.5, %v316_v26  ;;  %v1317_v32 = vsub.f32 %v2859_v39, %v1309_v46  ;;  %v289_v31 = vsel %vm287_vm5, %v288_v22, %v286_v53 }
  0xb5   :  { %v260_v50 = vmul.f32 %v259_v55, %v3147_v15  ;;  %vm323_vm11 = vcmp.eq.f32.partialorder %v3174_v34, 0.0  ;;  %v304_v61 = vmul.f32 %v2397_v29, %v303_v51  ;;  %v291_v12 = vmul.f32 %v2401_v52, %v3200_v43 }
  0xb6   :  { %v517_v5 = vmax.f32 %v289_v31, 0.006  ;;  %v274_v56 = vsel %vm273_vm6, %v3139_v54, %v272_v2  ;;  %v318_v38 = vsub.f32 1.5, %v317_v58  ;;  %vm309_vm12 = vcmp.eq.f32.partialorder %v3184_v47, inf  ;;  %v2403_v22 = vpop.eup %2402 }
  0xb7   :  { %v1316_v57 = vsub.f32 %v2864_v40, %v1308_v48  ;;  %v277_v7 = vsel %vm275_vm7, %v276_v17, %v274_v56  ;;  %v262_v42 = vsel %vm261_vm8, %v3147_v15, %v260_v50  ;;  %v305_v16 = vmul.f32 0.5, %v304_v61  ;;  %v3281_v50 = vld [vmem:[%s4876_s1 + $0x4] sm:$0xf]  ;;  %v3288_v56 = vpop.xlane.xlu1 %355 }
  0xb8   :  { %v292_v11 = vmul.f32 %v2401_v52, %v291_v12  ;;  %v516_v19 = vmax.f32 %v277_v7, 0.006  ;;  %v265_v6 = vsel %vm263_vm9, %v264_v0, %v262_v42  ;;  %vm311_vm13 = vcmp.eq.f32.partialorder %v3184_v47, 0.0  ;;  %v3265_v0 = vpop.xlane.xlu2 %358 }
  0xb9   :  { %v312_v35 = vand.u32 2147483648, %v3184_v47  ;;  %v515_v23 = vmax.f32 %v265_v6, 0.006  ;;  %v319_v24 = vmul.f32 %v2395_v20, %v318_v38  ;;  %v306_v25 = vsub.f32 1.5, %v305_v16  ;;  %v3302_v16 = vpop.xlane.xlu0 %240 }
  0xba   :  { %v293_v27 = vmul.f32 0.5, %v292_v11  ;;  %v488_v54 = vmax.f32 %v181_v36, 0.006  ;;  %v525_v17 = vmul.f32 %v517_v5, %v3053_v18  ;;  %v1325_v30 = vmul.f32 %v1317_v32, %v1317_v32 }
  0xbb   :  { %v1324_v37 = vmul.f32 %v1316_v57, %v1316_v57  ;;  %v523_v9 = vmul.f32 %v515_v23, %v3132_v59  ;;  %v320_v4 = vmul.f32 %v319_v24, %v3174_v34  ;;  %v307_v26 = vmul.f32 %v2397_v29, %v306_v25 }
  0xbc   :  { %v294_v15 = vsub.f32 1.5, %v293_v27  ;;  %v524_v55 = vmul.f32 %v516_v19, %v3030_v63  ;;  %vm297_vm14 = vcmp.eq.f32.partialorder %v3200_v43, inf  ;;  %v1339_v20 = vsel %vm73_vm0, %v1325_v30, 0.0 }
  0xbd   :  { %v1336_v36 = vsel %vm73_vm0, %v1324_v37, 0.0  ;;  %v532_v51 = vmul.f32 1.442695, %v523_v9  ;;  %v322_v53 = vsel %vm321_vm10, %v3174_v34, %v320_v4  ;;  %v308_v2 = vmul.f32 %v307_v26, %v3184_v47  ;;  %1340 = vadd.xlane.f32.xlu2 %v1339_v20  ;;  %v3332_v26 = vld [vmem:[%s4876_s1 + $0x14] sm:$0xf] }
  0xbe   :  { %v295_v58 = vmul.f32 %v2401_v52, %v294_v15  ;;  %1337 = vadd.xlane.f32.xlu1 %v1336_v36  ;;  %v496_v29 = vmul.f32 %v488_v54, %v3164_v8  ;;  %v536_v32 = vmul.f32 1.442695, %v525_v17  ;;  %v325_v31 = vsel %vm323_vm11, %v324_v49, %v322_v53 }
  0xbf   :  { %v1307_v61 = vperm.slane %v3281_v50, 2  ;;  %2404 = vpow2.f32 %v532_v51  ;;  %v520_v12 = vmax.f32 %v325_v31, 0.006  ;;  %v310_v52 = vsel %vm309_vm12, %v3184_v47, %v308_v2 }
  0xc0   :  { %v296_v5 = vmul.f32 %v295_v58, %v3200_v43  ;;  %v313_v34 = vsel %vm311_vm13, %v312_v35, %v310_v52  ;;  %v300_v49 = vand.u32 2147483648, %v3200_v43  ;;  %2406 = vrsqrt.f32 %v3265_v0  ;;  %v3314_v54 = vpop.xlane.xlu2 %367  ;;  %v3347_v58 = vpop.xlane.xlu1 %364 }
  0xc1   :  { %v1315_v38 = vsub.f32 %v3281_v50, %v1307_v61  ;;  %v534_v57 = vmul.f32 1.442695, %v524_v55  ;;  %v528_v7 = vmul.f32 %v520_v12, %v3164_v8  ;;  %vm299_vm15 = vcmp.eq.f32.partialorder %v3200_v43, 0.0 }
  0xc2   :  { %v298_v42 = vsel %vm297_vm14, %v3200_v43, %v296_v5  ;;  %v519_v47 = vmax.f32 %v313_v34, 0.006  ;;  %2408 = vrsqrt.f32 %v3288_v56  ;;  %v510_v6 = vmul.f32 1.442695, %v496_v29 }
  0xc3   :  { %v301_v11 = vsel %vm299_vm15, %v300_v49, %v298_v42  ;;  %v1323_v19 = vmul.f32 %v1315_v38, %v1315_v38  ;;  %2410 = vpow2.f32 %v536_v32  ;;  %v3307_v24 = vadd.f32 %v2403_v22, %v3180_v1  ;;  %v3323_v1 = vld [vmem:[%s4875_s0] sm:$0xf] }
  0xc4   :  { %v518_v35 = vmax.f32 %v301_v11, 0.006  ;;  %2412 = vrsqrt.f32 %v3302_v16  ;;  %v3311_v43 = vmul.f32 1.442695, %v3218_v33  ;;  %v542_v30 = vmul.f32 1.442695, %v528_v7 }
  0xc5   :  { %v1333_v23 = vsel %vm73_vm0, %v1323_v19, 0.0  ;;  %v2405_v25 = vpop.eup %2404  ;;  %2414 = vpow2.f32 %v534_v57  ;;  %v527_v37 = vmul.f32 %v519_v47, %v3043_v10  ;;  %v1450_v33 = vsub.f32 %v3323_v1, %v1306_v14 }
  0xc6   :  { %v526_v27 = vmul.f32 %v518_v35, %v3024_v41  ;;  %1334 = vadd.xlane.f32.xlu0 %v1333_v23  ;;  %v2407_v17 = vpop.eup %2406  ;;  %v3318_v9 = vadd.f32 %v2405_v25, %v3221_v45  ;;  %2416 = vpow2.f32 %v510_v6  ;;  %v1311_v45 = vperm.slane %v3332_v26, 2  ;;  %v3366_v23 = vpop.xlane.xlu0 %361 }
  0xc7   :  { %v391_v4 = vmul.f32 %v2407_v17, %v3265_v0  ;;  %v400_v55 = vand.u32 2147483648, %v3265_v0  ;;  %v1458_v20 = vmul.f32 %v1450_v33, %v1450_v33  ;;  %v1310_v14 = vperm.slane %v3339_v21, 2 }
  0xc8   :  { %v538_v22 = vmul.f32 1.442695, %v526_v27  ;;  %v2409_v15 = vpop.eup %2408  ;;  %2418 = vrsqrt.f32 %v3314_v54  ;;  %v1319_v2 = vsub.f32 %v3332_v26, %v1311_v45  ;;  %v540_v32 = vmul.f32 1.442695, %v527_v37 }
  0xc9   :  { %v2411_v36 = vpop.eup %2410  ;;  %v392_v51 = vmul.f32 %v2407_v17, %v391_v4  ;;  %v379_v53 = vmul.f32 %v2409_v15, %v3288_v56  ;;  %vm397_vm1 = vcmp.eq.f32.partialorder %v3265_v0, inf  ;;  %v1466_v31 = vsel %vm73_vm0, %v1458_v20, 0.0 }
  0xca   :  { %2420 = vpow2.f32 %v538_v22  ;;  %v2413_v29 = vpop.eup %2412  ;;  %v1318_v12 = vsub.f32 %v3339_v21, %v1310_v14  ;;  %vm399_vm2 = vcmp.eq.f32.partialorder %v3265_v0, 0.0  ;;  %1467 = vadd.xlane.f32.xlu2 %v1466_v31  ;;  %v1327_v38 = vmul.f32 %v1319_v2, %v1319_v2 }
  0xcb   :  { %2422 = vpow2.f32 %v542_v30  ;;  %v2415_v52 = vpop.eup %2414  ;;  %v393_v5 = vmul.f32 0.5, %v392_v51  ;;  %v380_v34 = vmul.f32 %v2409_v15, %v379_v53  ;;  %v327_v49 = vmul.f32 %v2413_v29, %v3302_v16 }
  0xcc   :  { %vm385_vm3 = vcmp.eq.f32.partialorder %v3288_v56, inf  ;;  %v388_v57 = vand.u32 2147483648, %v3288_v56  ;;  %v1326_v7 = vmul.f32 %v1318_v12, %v1318_v12  ;;  %v3359_v42 = vadd.f32 %v2411_v36, %v3203_v13  ;;  %v3362_v47 = vpop.eup %2416  ;;  %v3388_v12 = vld [vmem:[%s4875_s0 + $0xc] sm:$0xf] }
  0xcd   :  { %2424 = vrsqrt.f32 %v3347_v58  ;;  %v394_v11 = vsub.f32 1.5, %v393_v5  ;;  %v381_v19 = vmul.f32 0.5, %v380_v34  ;;  %vm387_vm4 = vcmp.eq.f32.partialorder %v3288_v56, 0.0  ;;  %v3404_v5 = vld [vmem:[%s4875_s0 + $0x4] sm:$0xf] }
  0xce   :  { %v328_v6 = vmul.f32 %v2413_v29, %v327_v49  ;;  %v1345_v35 = vsel %vm73_vm0, %v1327_v38, 0.0  ;;  %v2419_v25 = vpop.eup %2418  ;;  %2426 = vpow2.f32 %v540_v32  ;;  %vm333_vm5 = vcmp.eq.f32.partialorder %v3302_v16, inf }
  0xcf   :  { %1346 = vadd.xlane.f32.xlu1 %v1345_v35  ;;  %v1342_v13 = vsel %vm73_vm0, %v1326_v7, 0.0  ;;  %v3371_v27 = vadd.f32 %v2415_v52, %v3169_v28  ;;  %v395_v37 = vmul.f32 %v2407_v17, %v394_v11  ;;  %v382_v33 = vsub.f32 1.5, %v381_v19 }
  0xd0   :  { %v2421_v30 = vpop.eup %2420  ;;  %v329_v22 = vmul.f32 0.5, %v328_v6  ;;  %1343 = vadd.xlane.f32.xlu0 %v1342_v13  ;;  %v427_v4 = vmul.f32 %v2419_v25, %v3314_v54  ;;  %vm335_vm6 = vcmp.eq.f32.partialorder %v3302_v16, 0.0  ;;  %v336_v36 = vand.u32 2147483648, %v3302_v16 }
  0xd1   :  { %v3374_v20 = vpop.eup %2422  ;;  %v3379_v51 = vadd.f32 %v2421_v30, %v3162_v44  ;;  %2428 = vrsqrt.f32 %v3366_v23  ;;  %v396_v28 = vmul.f32 %v395_v37, %v3265_v0  ;;  %v383_v53 = vmul.f32 %v2409_v15, %v382_v33  ;;  %v3396_v15 = vld [vmem:[%s4875_s0 + $0x8] sm:$0xf] }
  0xd2   :  { %v330_v17 = vsub.f32 1.5, %v329_v22  ;;  %v428_v2 = vmul.f32 %v2419_v25, %v427_v4  ;;  %vm433_vm7 = vcmp.eq.f32.partialorder %v3314_v54, inf  ;;  %v436_v31 = vand.u32 2147483648, %v3314_v54 }
  0xd3   :  { %v2425_v32 = vpop.eup %2424  ;;  %v1453_v44 = vsub.f32 %v3388_v12, %v1309_v46  ;;  %v1452_v52 = vsub.f32 %v3396_v15, %v1308_v48  ;;  %v1451_v39 = vsub.f32 %v3404_v5, %v1307_v61  ;;  %v398_v46 = vsel %vm397_vm1, %v3265_v0, %v396_v28 }
  0xd4   :  { %v384_v34 = vmul.f32 %v383_v53, %v3288_v56  ;;  %v331_v49 = vmul.f32 %v2413_v29, %v330_v17  ;;  %v429_v38 = vmul.f32 0.5, %v428_v2  ;;  %vm435_vm8 = vcmp.eq.f32.partialorder %v3314_v54, 0.0  ;;  %v3414_v40 = vpop.eup %2426  ;;  %v3433_v53 = vpop.xlane.xlu2 %376 }
  0xd5   :  { %v401_v48 = vsel %vm399_vm2, %v400_v55, %v398_v46  ;;  %v415_v7 = vmul.f32 %v2425_v32, %v3347_v58  ;;  %v1461_v61 = vmul.f32 %v1453_v44, %v1453_v44  ;;  %v1460_v11 = vmul.f32 %v1452_v52, %v1452_v52 }
  0xd6   :  { %v547_v19 = vmax.f32 %v401_v48, 0.006  ;;  %v386_v6 = vsel %vm385_vm3, %v3288_v56, %v384_v34  ;;  %v332_v29 = vmul.f32 %v331_v49, %v3302_v16  ;;  %v430_v35 = vsub.f32 1.5, %v429_v38 }
  0xd7   :  { %v2429_v13 = vpop.eup %2428  ;;  %v389_v30 = vsel %vm387_vm4, %v388_v57, %v386_v6  ;;  %v416_v37 = vmul.f32 %v2425_v32, %v415_v7  ;;  %v1475_v0 = vsel %vm73_vm0, %v1461_v61, 0.0  ;;  %v1472_v55 = vsel %vm73_vm0, %v1460_v11, 0.0 }
  0xd8   :  { %v555_v33 = vmul.f32 %v547_v19, %v3132_v59  ;;  %v546_v22 = vmax.f32 %v389_v30, 0.006  ;;  %v334_v4 = vsel %vm333_vm5, %v3302_v16, %v332_v29  ;;  %v431_v28 = vmul.f32 %v2419_v25, %v430_v35  ;;  %1476 = vadd.xlane.f32.xlu2 %v1475_v0  ;;  %1473 = vadd.xlane.f32.xlu1 %v1472_v55 }
  0xd9   :  { %v337_v56 = vsel %vm335_vm6, %v336_v36, %v334_v4  ;;  %v417_v57 = vmul.f32 0.5, %v416_v37  ;;  %v403_v17 = vmul.f32 %v2429_v13, %v3366_v23  ;;  %v1459_v2 = vmul.f32 %v1451_v39, %v1451_v39  ;;  %v3446_v39 = vpop.xlane.xlu1 %373 }
  0xda   :  { %v564_v44 = vmul.f32 1.442695, %v555_v33  ;;  %v554_v52 = vmul.f32 %v546_v22, %v3032_v3  ;;  %v521_v46 = vmax.f32 %v337_v56, 0.006  ;;  %v432_v34 = vmul.f32 %v431_v28, %v3314_v54 }
  0xdb   :  { %v418_v49 = vsub.f32 1.5, %v417_v57  ;;  %v404_v38 = vmul.f32 %v2429_v13, %v403_v17  ;;  %v1469_v25 = vsel %vm73_vm0, %v1459_v2, 0.0  ;;  %2430 = vrsqrt.f32 %v3433_v53 }
  0xdc   :  { %2432 = vpow2.f32 %v564_v44  ;;  %v562_v48 = vmul.f32 1.442695, %v554_v52  ;;  %v529_v16 = vmul.f32 %v521_v46, %v3137_v62  ;;  %v434_v36 = vsel %vm433_vm7, %v3314_v54, %v432_v34  ;;  %1470 = vadd.xlane.f32.xlu0 %v1469_v25  ;;  %v3457_v54 = vpop.xlane.xlu0 %370 }
  0xdd   :  { %2434 = vpow2.f32 %v3311_v43  ;;  %v437_v7 = vsel %vm435_vm8, %v436_v31, %v434_v36  ;;  %v419_v61 = vmul.f32 %v2425_v32, %v418_v49  ;;  %v405_v11 = vmul.f32 0.5, %v404_v38 }
  0xde   :  { %2436 = vpow2.f32 %v562_v48  ;;  %v544_v19 = vmul.f32 1.442695, %v529_v16  ;;  %v550_v6 = vmax.f32 %v437_v7, 0.006  ;;  %vm421_vm9 = vcmp.eq.f32.partialorder %v3347_v58, inf }
  0xdf   :  { %v420_v29 = vmul.f32 %v419_v61, %v3347_v58  ;;  %v406_v35 = vsub.f32 1.5, %v405_v11  ;;  %2438 = vrsqrt.f32 %v3446_v39  ;;  %vm423_vm10 = vcmp.eq.f32.partialorder %v3347_v58, 0.0 }
  0xe0   :  { %2440 = vpow2.f32 %v544_v19  ;;  %v558_v30 = vmul.f32 %v550_v6, %v3024_v41  ;;  %v424_v43 = vand.u32 2147483648, %v3347_v58  ;;  %vm409_vm11 = vcmp.eq.f32.partialorder %v3366_v23, inf }
  0xe1   :  { %v2431_v32 = vpop.eup %2430  ;;  %v422_v31 = vsel %vm421_vm9, %v3347_v58, %v420_v29  ;;  %v407_v37 = vmul.f32 %v2429_v13, %v406_v35  ;;  %v3463_v0 = vadd.f32 %v3374_v20, %v3362_v47  ;;  %v3468_v28 = vadd.f32 %v3414_v40, %v3193_v60 }
  0xe2   :  { %v2433_v55 = vpop.eup %2432  ;;  %v570_v33 = vmul.f32 1.442695, %v558_v30  ;;  %v425_v22 = vsel %vm423_vm10, %v424_v43, %v422_v31  ;;  %v463_v4 = vmul.f32 %v2431_v32, %v3433_v53  ;;  %2442 = vrsqrt.f32 %v3457_v54 }
  0xe3   :  { %4885 = vst [vmem:[#allocation2_spill] sm:$0xff] %v3463_v0  ;;  %v2435_v56 = vpop.eup %2434  ;;  %v3470_v57 = vmul.f32 2.0, %v2433_v55  ;;  %v549_v58 = vmax.f32 %v425_v22, 0.006  ;;  %v408_v13 = vmul.f32 %v407_v37, %v3366_v23  ;;  %vm411_vm12 = vcmp.eq.f32.partialorder %v3366_v23, 0.0 }
  0xe4   :  { %4886 = vst [vmem:[#allocation3_spill] sm:$0xff] %v3468_v28  ;;  %v2437_v17 = vpop.eup %2436  ;;  %2444 = vpow2.f32 %v570_v33  ;;  %v412_v47 = vand.u32 2147483648, %v3366_v23  ;;  %v464_v20 = vmul.f32 %v2431_v32, %v463_v4  ;;  %vm469_vm13 = vcmp.eq.f32.partialorder %v3433_v53, inf }
  0xe5   :  { %v2439_v2 = vpop.eup %2438  ;;  %v3478_v40 = vmul.f32 2.0, %v2437_v17  ;;  %v557_v44 = vmul.f32 %v549_v58, %v3053_v18  ;;  %v410_v52 = vsel %vm409_vm11, %v3366_v23, %v408_v13  ;;  %vm471_vm14 = vcmp.eq.f32.partialorder %v3433_v53, 0.0  ;;  %v3494_v23 = vld [vmem:[%s4876_s1] sm:$0xf] }
  0xe6   :  { %v2441_v46 = vpop.eup %2440  ;;  %v413_v34 = vsel %vm411_vm12, %v412_v47, %v410_v52  ;;  %v465_v49 = vmul.f32 0.5, %v464_v20  ;;  %v451_v38 = vmul.f32 %v2439_v2, %v3446_v39  ;;  %v1858_v11 = vperm.slane %v3494_v23, 3 }
  0xe7   :  { %v568_v48 = vmul.f32 1.442695, %v557_v44  ;;  %v548_v16 = vmax.f32 %v413_v34, 0.006  ;;  %v3489_v36 = vadd.f32 %v2441_v46, %v2435_v56  ;;  %v1715_v19 = vperm.slane %v3404_v5, 3 }
  0xe8   :  { %v466_v7 = vsub.f32 1.5, %v465_v49  ;;  %v452_v61 = vmul.f32 %v2439_v2, %v451_v38  ;;  %v2443_v6 = vpop.eup %2442  ;;  %v472_v35 = vand.u32 2147483648, %v3433_v53  ;;  %v1714_v30 = vperm.slane %v3323_v1, 3 }
  0xe9   :  { %2446 = vpow2.f32 %v568_v48  ;;  %v556_v29 = vmul.f32 %v548_v16, %v3030_v63  ;;  %v439_v55 = vmul.f32 %v2443_v6, %v3457_v54  ;;  %v1866_v33 = vsub.f32 %v3494_v23, %v1858_v11  ;;  %v3518_v16 = vpop.xlane.xlu1 %638 }
  0xea   :  { %v2445_v43 = vpop.eup %2444  ;;  %v467_v31 = vmul.f32 %v2431_v32, %v466_v7  ;;  %v453_v37 = vmul.f32 0.5, %v452_v61  ;;  %v1723_v56 = vsub.f32 %v3404_v5, %v1715_v19  ;;  %v1722_v58 = vsub.f32 %v3323_v1, %v1714_v30  ;;  %v3510_v32 = vpop.xlane.xlu2 %641 }
  0xeb   :  { %v3505_v22 = vmul.f32 2.0, %v2445_v43  ;;  %v566_v4 = vmul.f32 1.442695, %v556_v29  ;;  %v440_v47 = vmul.f32 %v2443_v6, %v439_v55  ;;  %v1874_v20 = vmul.f32 %v1866_v33, %v1866_v33 }
  0xec   :  { %v468_v13 = vmul.f32 %v467_v31, %v3433_v53  ;;  %v454_v17 = vsub.f32 1.5, %v453_v37  ;;  %v1731_v52 = vmul.f32 %v1723_v56, %v1723_v56  ;;  %v1730_v46 = vmul.f32 %v1722_v58, %v1722_v58  ;;  %v3528_v37 = vpop.xlane.xlu0 %635 }
  0xed   :  { %2448 = vpow2.f32 %v566_v4  ;;  %v441_v38 = vmul.f32 0.5, %v440_v47  ;;  %v1882_v48 = vsel %vm73_vm0, %v1874_v20, 0.0  ;;  %vm457_vm15 = vcmp.eq.f32.partialorder %v3446_v39, inf }
  0xee   :  { %v470_v34 = vsel %vm469_vm13, %v3433_v53, %v468_v13  ;;  %v455_v49 = vmul.f32 %v2439_v2, %v454_v17  ;;  %1883 = vadd.xlane.f32.xlu2 %v1882_v48  ;;  %v1741_v19 = vsel %vm73_vm0, %v1731_v52, 0.0  ;;  %v1738_v29 = vsel %vm73_vm0, %v1730_v46, 0.0 }
  0xef   :  { %v2447_v7 = vpop.eup %2446  ;;  %v473_v61 = vsel %vm471_vm14, %v472_v35, %v470_v34  ;;  %2450 = vrsqrt.f32 %v3510_v32  ;;  %v442_v31 = vsub.f32 1.5, %v441_v38  ;;  %1742 = vadd.xlane.f32.xlu1 %v1741_v19  ;;  %1739 = vadd.xlane.f32.xlu0 %v1738_v29  ;;  %vm459_vm1 = vcmp.eq.f32.partialorder %v3446_v39, 0.0 }
  0xf0   :  { %v3525_v30 = vmul.f32 2.0, %v2447_v7  ;;  %v553_v43 = vmax.f32 %v473_v61, 0.006  ;;  %v456_v2 = vmul.f32 %v455_v49, %v3446_v39  ;;  %v460_v53 = vand.u32 2147483648, %v3446_v39 }
  0xf1   :  { %2452 = vrsqrt.f32 %v3518_v16  ;;  %v443_v4 = vmul.f32 %v2443_v6, %v442_v31  ;;  %vm445_vm2 = vcmp.eq.f32.partialorder %v3457_v54, inf  ;;  %vm447_vm3 = vcmp.eq.f32.partialorder %v3457_v54, 0.0 }
  0xf2   :  { %v561_v55 = vmul.f32 %v553_v43, %v3137_v62  ;;  %v458_v33 = vsel %vm457_vm15, %v3446_v39, %v456_v2  ;;  %2454 = vrsqrt.f32 %v3528_v37  ;;  %v448_v46 = vand.u32 2147483648, %v3457_v54  ;;  %v3550_v38 = vpop.xlane.xlu2 %650 }
  0xf3   :  { %v2449_v56 = vpop.eup %2448  ;;  %v461_v58 = vsel %vm459_vm1, %v460_v53, %v458_v33  ;;  %v444_v20 = vmul.f32 %v443_v4, %v3457_v54  ;;  %v1859_v39 = vperm.slane %v3281_v50, 3  ;;  %v2002_v29 = vsub.f32 %v3323_v1, %v1858_v11 }
  0xf4   :  { %v3539_v13 = vmul.f32 2.0, %v2449_v56  ;;  %v576_v17 = vmul.f32 1.442695, %v561_v55  ;;  %v552_v47 = vmax.f32 %v461_v58, 0.006  ;;  %vm689_vm4 = vcmp.eq.f32.partialorder %v3510_v32, inf }
  0xf5   :  { %v2451_v52 = vpop.eup %2450  ;;  %v446_v49 = vsel %vm445_vm2, %v3457_v54, %v444_v20  ;;  %v2003_v19 = vsub.f32 %v3404_v5, %v1859_v39  ;;  %v1867_v53 = vsub.f32 %v3281_v50, %v1859_v39  ;;  %v2010_v4 = vmul.f32 %v2002_v29, %v2002_v29  ;;  %v3564_v39 = vpop.xlane.xlu1 %647 }
  0xf6   :  { %2456 = vpow2.f32 %v576_v17  ;;  %v560_v34 = vmul.f32 %v552_v47, %v3164_v8  ;;  %v449_v7 = vsel %vm447_vm3, %v448_v46, %v446_v49  ;;  %v683_v61 = vmul.f32 %v2451_v52, %v3510_v32  ;;  %v3569_v29 = vpop.xlane.xlu0 %644 }
  0xf7   :  { %v2453_v48 = vpop.eup %2452  ;;  %v551_v2 = vmax.f32 %v449_v7, 0.006  ;;  %v2011_v33 = vmul.f32 %v2003_v19, %v2003_v19  ;;  %2458 = vrsqrt.f32 %v3550_v38  ;;  %v2018_v11 = vsel %vm73_vm0, %v2010_v4, 0.0 }
  0xf8   :  { %v574_v43 = vmul.f32 1.442695, %v560_v34  ;;  %v671_v31 = vmul.f32 %v2453_v48, %v3518_v16  ;;  %v2455_v55 = vpop.eup %2454  ;;  %v684_v54 = vmul.f32 %v2451_v52, %v683_v61  ;;  %v1875_v17 = vmul.f32 %v1867_v53, %v1867_v53  ;;  %2019 = vadd.xlane.f32.xlu1 %v2018_v11 }
  0xf9   :  { %v559_v56 = vmul.f32 %v551_v2, %v3043_v10  ;;  %v659_v23 = vmul.f32 %v2455_v55, %v3528_v37  ;;  %v2021_v1 = vsel %vm73_vm0, %v2011_v33, 0.0  ;;  %vm691_vm5 = vcmp.eq.f32.partialorder %v3510_v32, 0.0 }
  0xfa   :  { %2460 = vpow2.f32 %v574_v43  ;;  %v672_v5 = vmul.f32 %v2453_v48, %v671_v31  ;;  %v685_v58 = vmul.f32 0.5, %v684_v54  ;;  %2022 = vadd.xlane.f32.xlu2 %v2021_v1  ;;  %v1885_v7 = vsel %vm73_vm0, %v1875_v17, 0.0 }
  0xfb   :  { %v572_v50 = vmul.f32 1.442695, %v559_v56  ;;  %v660_v46 = vmul.f32 %v2455_v55, %v659_v23  ;;  %1886 = vadd.xlane.f32.xlu0 %v1885_v7  ;;  %v692_v23 = vand.u32 2147483648, %v3510_v32  ;;  %vm677_vm6 = vcmp.eq.f32.partialorder %v3518_v16, inf }
  0xfc   :  { %v2457_v47 = vpop.eup %2456  ;;  %v673_v20 = vmul.f32 0.5, %v672_v5  ;;  %v686_v49 = vsub.f32 1.5, %v685_v58  ;;  %vm679_vm7 = vcmp.eq.f32.partialorder %v3518_v16, 0.0  ;;  %v680_v17 = vand.u32 2147483648, %v3518_v16 }
  0xfd   :  { %v3566_v34 = vmul.f32 2.0, %v2457_v47  ;;  %2462 = vpow2.f32 %v572_v50  ;;  %v661_v19 = vmul.f32 0.5, %v660_v46  ;;  %v2459_v43 = vpop.eup %2458  ;;  %vm665_vm8 = vcmp.eq.f32.partialorder %v3528_v37, inf }
  0xfe   :  { %v674_v61 = vsub.f32 1.5, %v673_v20  ;;  %v687_v31 = vmul.f32 %v2451_v52, %v686_v49  ;;  %2464 = vrsqrt.f32 %v3564_v39  ;;  %v719_v4 = vmul.f32 %v2459_v43, %v3550_v38 }
  0xff   :  { %v662_v33 = vsub.f32 1.5, %v661_v19  ;;  %2466 = vrsqrt.f32 %v3569_v29  ;;  %v3601_v19 = vld [vmem:[%s4876_s1 + $0x8] sm:$0xf]  ;;  %vm667_vm9 = vcmp.eq.f32.partialorder %v3528_v37, 0.0  ;;  %vm725_vm10 = vcmp.eq.f32.partialorder %v3550_v38, inf }
 0x100   :  { %v2461_v53 = vpop.eup %2460  ;;  %v675_v54 = vmul.f32 %v2453_v48, %v674_v61  ;;  %v688_v5 = vmul.f32 %v687_v31, %v3510_v32  ;;  %v720_v1 = vmul.f32 %v2459_v43, %v719_v4  ;;  %v1860_v31 = vperm.slane %v3601_v19, 3 }
 0x101   :  { %v3577_v56 = vmul.f32 2.0, %v2461_v53  ;;  %v663_v58 = vmul.f32 %v2455_v55, %v662_v33  ;;  %vm727_vm11 = vcmp.eq.f32.partialorder %v3550_v38, 0.0  ;;  %vm713_vm12 = vcmp.eq.f32.partialorder %v3564_v39, inf }
 0x102   :  { %v676_v52 = vmul.f32 %v675_v54, %v3518_v16  ;;  %v690_v11 = vsel %vm689_vm4, %v3510_v32, %v688_v5  ;;  %v721_v46 = vmul.f32 0.5, %v720_v1  ;;  %v668_v5 = vand.u32 2147483648, %v3528_v37 }
 0x103   :  { %4887 = vst [vmem:[#allocation4_spill] sm:$0xff] %v3577_v56  ;;  %v2463_v47 = vpop.eup %2462  ;;  %v693_v50 = vsel %vm691_vm5, %v692_v23, %v690_v11  ;;  %v664_v55 = vmul.f32 %v663_v58, %v3528_v37  ;;  %v1868_v23 = vsub.f32 %v3601_v19, %v1860_v31  ;;  %vm715_vm13 = vcmp.eq.f32.partialorder %v3564_v39, 0.0 }
 0x104   :  { %v678_v20 = vsel %vm677_vm6, %v3518_v16, %v676_v52  ;;  %v2465_v49 = vpop.eup %2464  ;;  %v3595_v7 = vmul.f32 2.0, %v2463_v47  ;;  %v1036_v32 = vmax.f32 %v693_v50, 0.006  ;;  %v722_v16 = vsub.f32 1.5, %v721_v46 }
 0x105   :  { %v681_v61 = vsel %vm679_vm7, %v680_v17, %v678_v20  ;;  %v666_v53 = vsel %vm665_vm8, %v3528_v37, %v664_v55  ;;  %v707_v54 = vmul.f32 %v2465_v49, %v3564_v39  ;;  %v2467_v33 = vpop.eup %2466  ;;  %v1876_v47 = vmul.f32 %v1868_v23, %v1868_v23  ;;  %v3616_v20 = vpop.xlane.xlu2 %779 }
 0x106   :  { %4888 = vst [vmem:[#allocation5_spill] sm:$0xff] %v3595_v7  ;;  %v1035_v52 = vmax.f32 %v681_v61, 0.006  ;;  %v723_v58 = vmul.f32 %v2459_v43, %v722_v16  ;;  %v669_v11 = vsel %vm667_vm9, %v668_v5, %v666_v53  ;;  %v695_v17 = vmul.f32 %v2467_v33, %v3569_v29 }
 0x107   :  { %v708_v1 = vmul.f32 %v2465_v49, %v707_v54  ;;  %v1716_v50 = vperm.slane %v3396_v15, 3  ;;  %v1044_v55 = vmul.f32 %v1036_v32, %v3030_v63  ;;  %v728_v43 = vand.u32 2147483648, %v3550_v38 }
 0x108   :  { %v724_v37 = vmul.f32 %v723_v58, %v3550_v38  ;;  %v696_v61 = vmul.f32 %v2467_v33, %v695_v17  ;;  %v1888_v16 = vsel %vm73_vm0, %v1876_v47, 0.0  ;;  %v1043_v54 = vmul.f32 %v1035_v52, %v3132_v59 }
 0x109   :  { %v709_v46 = vmul.f32 0.5, %v708_v1  ;;  %v1724_v53 = vsub.f32 %v3396_v15, %v1716_v50  ;;  %v1034_v5 = vmax.f32 %v669_v11, 0.006  ;;  %1889 = vadd.xlane.f32.xlu2 %v1888_v16  ;;  %v3631_v1 = vld [vmem:[%s4875_s0 + $0x10] sm:$0xf]  ;;  %2468 = vrsqrt.f32 %v3616_v20 }
 0x10a   :  { %v726_v23 = vsel %vm725_vm10, %v3550_v38, %v724_v37  ;;  %v697_v4 = vmul.f32 0.5, %v696_v61  ;;  %v1454_v17 = vsub.f32 %v3631_v1, %v1310_v14  ;;  %v1054_v52 = vmul.f32 1.442695, %v1044_v55  ;;  %v3638_v38 = vpop.xlane.xlu1 %656 }
 0x10b   :  { %v710_v32 = vsub.f32 1.5, %v709_v46  ;;  %v729_v58 = vsel %vm727_vm11, %v728_v43, %v726_v23  ;;  %v1732_v48 = vmul.f32 %v1724_v53, %v1724_v53  ;;  %v1052_v46 = vmul.f32 1.442695, %v1043_v54 }
 0x10c   :  { %v698_v47 = vsub.f32 1.5, %v697_v4  ;;  %v1462_v37 = vmul.f32 %v1454_v17, %v1454_v17  ;;  %v1042_v43 = vmul.f32 %v1034_v5, %v3032_v3  ;;  %v1039_v21 = vmax.f32 %v729_v58, 0.006 }
 0x10d   :  { %v711_v11 = vmul.f32 %v2465_v49, %v710_v32  ;;  %v1744_v50 = vsel %vm73_vm0, %v1732_v48, 0.0  ;;  %v3644_v49 = vpop.xlane.xlu0 %653  ;;  %v716_v55 = vand.u32 2147483648, %v3564_v39  ;;  %2470 = vrsqrt.f32 %v3638_v38  ;;  %v3659_v54 = vpop.xlane.xlu2 %788 }
 0x10e   :  { %1745 = vadd.xlane.f32.xlu1 %v1744_v50  ;;  %v699_v61 = vmul.f32 %v2467_v33, %v698_v47  ;;  %v1478_v16 = vsel %vm73_vm0, %v1462_v37, 0.0  ;;  %2472 = vpow2.f32 %v1054_v52  ;;  %vm701_vm14 = vcmp.eq.f32.partialorder %v3569_v29, inf }
 0x10f   :  { %v712_v14 = vmul.f32 %v711_v11, %v3564_v39  ;;  %vm703_vm15 = vcmp.eq.f32.partialorder %v3569_v29, 0.0  ;;  %1479 = vadd.xlane.f32.xlu0 %v1478_v16  ;;  %v704_v33 = vand.u32 2147483648, %v3569_v29  ;;  %2474 = vrsqrt.f32 %v3644_v49  ;;  %v2469_v58 = vpop.eup %2468 }
 0x110   :  { %v700_v53 = vmul.f32 %v699_v61, %v3569_v29  ;;  %2476 = vpow2.f32 %v1052_v46  ;;  %v1050_v5 = vmul.f32 1.442695, %v1042_v43  ;;  %v1047_v23 = vmul.f32 %v1039_v21, %v3043_v10 }
 0x111   :  { %v714_v48 = vsel %vm713_vm12, %v3564_v39, %v712_v14  ;;  %v1717_v52 = vperm.slane %v3388_v12, 3  ;;  %v3667_v39 = vld [vmem:[%s4875_s0 + $0x14] sm:$0xf]  ;;  %v2004_v47 = vsub.f32 %v3396_v15, %v1860_v31  ;;  %v803_v46 = vmul.f32 %v2469_v58, %v3616_v20 }
 0x112   :  { %v717_v4 = vsel %vm715_vm13, %v716_v55, %v714_v48  ;;  %v702_v17 = vsel %vm701_vm14, %v3569_v29, %v700_v53  ;;  %v1455_v11 = vsub.f32 %v3667_v39, %v1311_v45  ;;  %2478 = vrsqrt.f32 %v3659_v54 }
 0x113   :  { %v1038_v32 = vmax.f32 %v717_v4, 0.006  ;;  %v705_v37 = vsel %vm703_vm15, %v704_v33, %v702_v17  ;;  %v2471_v43 = vpop.eup %2470  ;;  %v1725_v14 = vsub.f32 %v3388_v12, %v1717_v52  ;;  %v2012_v55 = vmul.f32 %v2004_v47, %v2004_v47  ;;  %v3687_v4 = vpop.xlane.xlu1 %785 }
 0x114   :  { %v1037_v21 = vmax.f32 %v705_v37, 0.006  ;;  %v1463_v26 = vmul.f32 %v1455_v11, %v1455_v11  ;;  %v3681_v45 = vpop.eup %2472  ;;  %2480 = vpow2.f32 %v1050_v5  ;;  %v804_v19 = vmul.f32 %v2469_v58, %v803_v46 }
 0x115   :  { %v1046_v50 = vmul.f32 %v1038_v32, %v3024_v41  ;;  %v743_v15 = vmul.f32 %v2471_v43, %v3638_v38  ;;  %v2475_v31 = vpop.eup %2474  ;;  %v1060_v61 = vmul.f32 1.442695, %v1047_v23  ;;  %vm809_vm1 = vcmp.eq.f32.partialorder %v3616_v20, inf }
 0x116   :  { %v1733_v29 = vmul.f32 %v1725_v14, %v1725_v14  ;;  %v1481_v16 = vsel %vm73_vm0, %v1463_v26, 0.0  ;;  %v2024_v48 = vsel %vm73_vm0, %v2012_v55, 0.0  ;;  %v3689_v53 = vpop.eup %2476  ;;  %v805_v32 = vmul.f32 0.5, %v804_v19  ;;  %v3699_v14 = vpop.xlane.xlu0 %782 }
 0x117   :  { %v1058_v33 = vmul.f32 1.442695, %v1046_v50  ;;  %vm811_vm2 = vcmp.eq.f32.partialorder %v3616_v20, 0.0  ;;  %v744_v5 = vmul.f32 %v2471_v43, %v743_v15  ;;  %v731_v17 = vmul.f32 %v2475_v31, %v3644_v49  ;;  %1482 = vadd.xlane.f32.xlu1 %v1481_v16  ;;  %2025 = vadd.xlane.f32.xlu0 %v2024_v48 }
 0x118   :  { %v1045_v23 = vmul.f32 %v1037_v21, %v3053_v18  ;;  %v812_v52 = vand.u32 2147483648, %v3616_v20  ;;  %vm749_vm3 = vcmp.eq.f32.partialorder %v3638_v38, inf  ;;  %v1747_v11 = vsel %vm73_vm0, %v1733_v29, 0.0  ;;  %v2479_v47 = vpop.eup %2478 }
 0x119   :  { %v806_v37 = vsub.f32 1.5, %v805_v32  ;;  %v745_v46 = vmul.f32 0.5, %v744_v5  ;;  %vm751_vm4 = vcmp.eq.f32.partialorder %v3638_v38, 0.0  ;;  %v732_v50 = vmul.f32 %v2475_v31, %v731_v17  ;;  %1748 = vadd.xlane.f32.xlu2 %v1747_v11 }
 0x11a   :  { %2482 = vrsqrt.f32 %v3687_v4  ;;  %v752_v21 = vand.u32 2147483648, %v3638_v38  ;;  %vm737_vm5 = vcmp.eq.f32.partialorder %v3644_v49, inf  ;;  %v839_v26 = vmul.f32 %v2479_v47, %v3659_v54  ;;  %v3704_v55 = vpop.eup %2480 }
 0x11b   :  { %2484 = vpow2.f32 %v1060_v61  ;;  %v807_v19 = vmul.f32 %v2469_v58, %v806_v37  ;;  %v746_v15 = vsub.f32 1.5, %v745_v46  ;;  %v733_v29 = vmul.f32 0.5, %v732_v50  ;;  %v3709_v61 = vpop.xlane.xlu2 %797  ;;  %v3717_v58 = vld [vmem:[%s4876_s1 + $0x18] sm:$0xf] }
 0x11c   :  { %2486 = vpow2.f32 %v1058_v33  ;;  %vm739_vm6 = vcmp.eq.f32.partialorder %v3644_v49, 0.0  ;;  %v740_v16 = vand.u32 2147483648, %v3644_v49  ;;  %v840_v48 = vmul.f32 %v2479_v47, %v839_v26 }
 0x11d   :  { %2488 = vrsqrt.f32 %v3699_v14  ;;  %v1056_v32 = vmul.f32 1.442695, %v1045_v23  ;;  %v808_v5 = vmul.f32 %v807_v19, %v3616_v20  ;;  %v747_v17 = vmul.f32 %v2471_v43, %v746_v15  ;;  %v2756_v23 = vld [vmem:[%s4876_s1 + $0xc] sm:$0xf] }
 0x11e   :  { %v734_v11 = vsub.f32 1.5, %v733_v29  ;;  %vm845_vm7 = vcmp.eq.f32.partialorder %v3659_v54, inf  ;;  %v841_v33 = vmul.f32 0.5, %v840_v48  ;;  %vm847_vm8 = vcmp.eq.f32.partialorder %v3659_v54, 0.0 }
 0x11f   :  { %v4880_v37 = vperm.slane %v3717_v58, 2  ;;  %v1861_v46 = vperm.slane %v2756_v23, 3  ;;  %v810_v43 = vsel %vm809_vm1, %v3616_v20, %v808_v5  ;;  %v748_v26 = vmul.f32 %v747_v17, %v3638_v38 }
 0x120   :  { %v2483_v50 = vpop.eup %2482  ;;  %v735_v19 = vmul.f32 %v2475_v31, %v734_v11  ;;  %2490 = vrsqrt.f32 %v3709_v61  ;;  %v813_v29 = vsel %vm811_vm2, %v812_v52, %v810_v43  ;;  %v842_v48 = vsub.f32 1.5, %v841_v33 }
 0x121   :  { %v3728_v15 = vpop.eup %2484  ;;  %v827_v2 = vmul.f32 %v2483_v50, %v3687_v4  ;;  %v1320_v6 = vsub.f32 %v3717_v58, %v4880_v37  ;;  %v1066_v5 = vmax.f32 %v813_v29, 0.006  ;;  %v750_v31 = vsel %vm749_vm3, %v3638_v38, %v748_v26 }
 0x122   :  { %v3736_v35 = vpop.eup %2486  ;;  %v736_v17 = vmul.f32 %v735_v19, %v3644_v49  ;;  %v2005_v11 = vsub.f32 %v3388_v12, %v1861_v46  ;;  %v753_v52 = vsel %vm751_vm4, %v752_v21, %v750_v31  ;;  %v843_v33 = vmul.f32 %v2479_v47, %v842_v48 }
 0x123   :  { %v2489_v20 = vpop.eup %2488  ;;  %v828_v43 = vmul.f32 %v2483_v50, %v827_v2  ;;  %v1328_v44 = vmul.f32 %v1320_v6, %v1320_v6  ;;  %v1041_v25 = vmax.f32 %v753_v52, 0.006  ;;  %v848_v60 = vand.u32 2147483648, %v3659_v54 }
 0x124   :  { %v738_v29 = vsel %vm737_vm5, %v3644_v49, %v736_v17  ;;  %v815_v26 = vmul.f32 %v2489_v20, %v3699_v14  ;;  %v844_v12 = vmul.f32 %v843_v33, %v3659_v54  ;;  %v1074_v6 = vmul.f32 %v1066_v5, %v3032_v3 }
 0x125   :  { %v741_v19 = vsel %vm739_vm6, %v740_v16, %v738_v29  ;;  %v829_v37 = vmul.f32 0.5, %v828_v43  ;;  %v1348_v38 = vsel %vm73_vm0, %v1328_v44, 0.0  ;;  %v1049_v2 = vmul.f32 %v1041_v25, %v3137_v62 }
 0x126   :  { %v2491_v47 = vpop.eup %2490  ;;  %v1040_v21 = vmax.f32 %v741_v19, 0.006  ;;  %v816_v48 = vmul.f32 %v2489_v20, %v815_v26  ;;  %1349 = vadd.xlane.f32.xlu2 %v1348_v38  ;;  %v846_v31 = vsel %vm845_vm7, %v3659_v54, %v844_v12  ;;  %v2013_v49 = vmul.f32 %v2005_v11, %v2005_v11 }
 0x127   :  { %v830_v17 = vsub.f32 1.5, %v829_v37  ;;  %v1869_v16 = vsub.f32 %v2756_v23, %v1861_v46  ;;  %2492 = vpow2.f32 %v1056_v32  ;;  %v849_v52 = vsel %vm847_vm8, %v848_v60, %v846_v31  ;;  %v3766_v23 = vpop.xlane.xlu1 %794 }
 0x128   :  { %vm833_vm9 = vcmp.eq.f32.partialorder %v3687_v4, inf  ;;  %v1048_v44 = vmul.f32 %v1040_v21, %v3164_v8  ;;  %v817_v25 = vmul.f32 0.5, %v816_v48  ;;  %v2027_v33 = vsel %vm73_vm0, %v2013_v49, 0.0 }
 0x129   :  { %v831_v5 = vmul.f32 %v2483_v50, %v830_v17  ;;  %v1082_v43 = vmul.f32 1.442695, %v1074_v6  ;;  %vm835_vm10 = vcmp.eq.f32.partialorder %v3687_v4, 0.0  ;;  %2028 = vadd.xlane.f32.xlu1 %v2027_v33  ;;  %v1877_v29 = vmul.f32 %v1869_v16, %v1869_v16  ;;  %v3776_v6 = vpop.xlane.xlu0 %791  ;;  %v3789_v16 = vpop.xlane.xlu2 %918 }
 0x12a   :  { %v875_v37 = vmul.f32 %v2491_v47, %v3709_v61  ;;  %v1064_v32 = vmul.f32 1.442695, %v1049_v2  ;;  %v1069_v54 = vmax.f32 %v849_v52, 0.006  ;;  %v818_v46 = vsub.f32 1.5, %v817_v25 }
 0x12b   :  { %v832_v60 = vmul.f32 %v831_v5, %v3687_v4  ;;  %v836_v11 = vand.u32 2147483648, %v3687_v4  ;;  %vm821_vm11 = vcmp.eq.f32.partialorder %v3699_v14, inf  ;;  %v1891_v50 = vsel %vm73_vm0, %v1877_v29, 0.0  ;;  %v3806_v29 = vld [vmem:[%s4875_s0 + $0x18] sm:$0xf] }
 0x12c   :  { %v876_v26 = vmul.f32 %v2491_v47, %v875_v37  ;;  %v1062_v19 = vmul.f32 1.442695, %v1048_v44  ;;  %v819_v38 = vmul.f32 %v2489_v20, %v818_v46  ;;  %1892 = vadd.xlane.f32.xlu0 %v1891_v50  ;;  %2494 = vrsqrt.f32 %v3766_v23  ;;  %v3797_v44 = vld [vmem:[%s4876_s1 + $0x10] sm:$0xf] }
 0x12d   :  { %v834_v12 = vsel %vm833_vm9, %v3687_v4, %v832_v60  ;;  %v3778_v2 = vpop.eup %2492  ;;  %2496 = vpow2.f32 %v1082_v43  ;;  %vm823_vm12 = vcmp.eq.f32.partialorder %v3699_v14, 0.0  ;;  %v1077_v31 = vmul.f32 %v1069_v54, %v3053_v18 }
 0x12e   :  { %v837_v21 = vsel %vm835_vm10, %v836_v11, %v834_v12  ;;  %v877_v48 = vmul.f32 0.5, %v876_v26  ;;  %2498 = vpow2.f32 %v1064_v32  ;;  %v820_v17 = vmul.f32 %v819_v38, %v3699_v14 }
 0x12f   :  { %v824_v20 = vand.u32 2147483648, %v3699_v14  ;;  %vm881_vm13 = vcmp.eq.f32.partialorder %v3709_v61, inf  ;;  %vm883_vm14 = vcmp.eq.f32.partialorder %v3709_v61, 0.0  ;;  %2500 = vrsqrt.f32 %v3776_v6 }
 0x130   :  { %v878_v49 = vsub.f32 1.5, %v877_v48  ;;  %2502 = vpow2.f32 %v1062_v19  ;;  %v1068_v4 = vmax.f32 %v837_v21, 0.006  ;;  %v822_v52 = vsel %vm821_vm11, %v3699_v14, %v820_v17 }
 0x131   :  { %v1862_v5 = vperm.slane %v3797_v44, 3  ;;  %v825_v25 = vsel %vm823_vm12, %v824_v20, %v822_v52  ;;  %v1718_v43 = vperm.slane %v3631_v1, 3  ;;  %v4889_v37 = vperm.slane %v3717_v58, 2 }
 0x132   :  { %v879_v33 = vmul.f32 %v2491_v47, %v878_v49  ;;  %v2495_v54 = vpop.eup %2494  ;;  %v1088_v60 = vmul.f32 1.442695, %v1077_v31  ;;  %v1067_v46 = vmax.f32 %v825_v25, 0.006  ;;  %2504 = vrsqrt.f32 %v3789_v16 }
 0x133   :  { %v1456_v32 = vsub.f32 %v3806_v29, %v4889_v37  ;;  %v1870_v14 = vsub.f32 %v3797_v44, %v1862_v5  ;;  %v2497_v47 = vpop.eup %2496  ;;  %v863_v50 = vmul.f32 %v2495_v54, %v3766_v23  ;;  %v1726_v26 = vsub.f32 %v3631_v1, %v1718_v43 }
 0x134   :  { %v880_v11 = vmul.f32 %v879_v33, %v3709_v61  ;;  %v3818_v12 = vpop.eup %2498  ;;  %v1076_v38 = vmul.f32 %v1068_v4, %v3030_v63  ;;  %v1075_v21 = vmul.f32 %v1067_v46, %v3132_v59  ;;  %v884_v48 = vand.u32 2147483648, %v3709_v61  ;;  %v3834_v46 = vpop.xlane.xlu1 %915 }
 0x135   :  { %v1464_v19 = vmul.f32 %v1456_v32, %v1456_v32  ;;  %v1878_v31 = vmul.f32 %v1870_v14, %v1870_v14  ;;  %v2501_v17 = vpop.eup %2500  ;;  %v864_v49 = vmul.f32 %v2495_v54, %v863_v50  ;;  %v1734_v52 = vmul.f32 %v1726_v26, %v1726_v26 }
 0x136   :  { %v882_v20 = vsel %vm881_vm13, %v3709_v61, %v880_v11  ;;  %v3827_v33 = vpop.eup %2502  ;;  %v1084_v43 = vmul.f32 1.442695, %v1075_v21  ;;  %vm869_vm15 = vcmp.eq.f32.partialorder %v3766_v23, inf  ;;  %v851_v37 = vmul.f32 %v2501_v17, %v3776_v6  ;;  %v3838_v21 = vpop.xlane.xlu0 %800 }
 0x137   :  { %v1484_v25 = vsel %vm73_vm0, %v1464_v19, 0.0  ;;  %v885_v4 = vsel %vm883_vm14, %v884_v48, %v882_v20  ;;  %v1894_v32 = vsel %vm73_vm0, %v1878_v31, 0.0  ;;  %2506 = vpow2.f32 %v1088_v60 }
 0x138   :  { %1485 = vadd.xlane.f32.xlu0 %v1484_v25  ;;  %v1072_v14 = vmax.f32 %v885_v4, 0.006  ;;  %v865_v11 = vmul.f32 0.5, %v864_v49  ;;  %1895 = vadd.xlane.f32.xlu2 %v1894_v32  ;;  %v1750_v50 = vsel %vm73_vm0, %v1734_v52, 0.0  ;;  %v2505_v26 = vpop.eup %2504  ;;  %v1086_v19 = vmul.f32 1.442695, %v1076_v38 }
 0x139   :  { %2508 = vpow2.f32 %v1084_v43  ;;  %vm871_vm1 = vcmp.eq.f32.partialorder %v3766_v23, 0.0  ;;  %v852_v61 = vmul.f32 %v2501_v17, %v851_v37  ;;  %1751 = vadd.xlane.f32.xlu1 %v1750_v50  ;;  %v872_v31 = vand.u32 2147483648, %v3766_v23  ;;  %v3850_v43 = vpop.xlane.xlu2 %927 }
 0x13a   :  { %v866_v48 = vsub.f32 1.5, %v865_v11  ;;  %v951_v20 = vmul.f32 %v2505_v26, %v3789_v16  ;;  %2510 = vrsqrt.f32 %v3834_v46  ;;  %v1080_v60 = vmul.f32 %v1072_v14, %v3164_v8 }
 0x13b   :  { %v853_v49 = vmul.f32 0.5, %v852_v61  ;;  %vm857_vm2 = vcmp.eq.f32.partialorder %v3776_v6, inf  ;;  %v3846_v38 = vadd.f32 %v2497_v47, %v3704_v55  ;;  %vm859_vm3 = vcmp.eq.f32.partialorder %v3776_v6, 0.0  ;;  %v3862_v47 = vld [vmem:[%s4876_s1 + $0x1c] sm:$0xf] }
 0x13c   :  { %v867_v52 = vmul.f32 %v2495_v54, %v866_v48  ;;  %v952_v25 = vmul.f32 %v2505_v26, %v951_v20  ;;  %2512 = vrsqrt.f32 %v3838_v21  ;;  %v860_v37 = vand.u32 2147483648, %v3776_v6 }
 0x13d   :  { %2514 = vpow2.f32 %v1086_v19  ;;  %v854_v4 = vsub.f32 1.5, %v853_v49  ;;  %vm957_vm4 = vcmp.eq.f32.partialorder %v3789_v16, inf  ;;  %v3854_v32 = vpop.eup %2506  ;;  %vm959_vm5 = vcmp.eq.f32.partialorder %v3789_v16, 0.0 }
 0x13e   :  { %v868_v14 = vmul.f32 %v867_v52, %v3766_v23  ;;  %v953_v55 = vmul.f32 0.5, %v952_v25  ;;  %v960_v54 = vand.u32 2147483648, %v3789_v16  ;;  %v1313_v11 = vperm.slane %v3862_v47, 2 }
 0x13f   :  { %v2509_v50 = vpop.eup %2508  ;;  %v1094_v19 = vmul.f32 1.442695, %v1080_v60  ;;  %v855_v61 = vmul.f32 %v2501_v17, %v854_v4  ;;  %v2006_v48 = vsub.f32 %v3631_v1, %v1862_v5  ;;  %2516 = vrsqrt.f32 %v3850_v43  ;;  %v3878_v60 = vld [vmem:[%s4875_s0 + $0x1c] sm:$0xf] }
 0x140   :  { %v2511_v20 = vpop.eup %2510  ;;  %v870_v49 = vsel %vm869_vm15, %v3766_v23, %v868_v14  ;;  %v954_v52 = vsub.f32 1.5, %v953_v55  ;;  %v3873_v25 = vadd.f32 %v2509_v50, %v3689_v53  ;;  %v1457_v44 = vsub.f32 %v3878_v60, %v1313_v11 }
 0x141   :  { %v873_v1 = vsel %vm871_vm1, %v872_v31, %v870_v49  ;;  %v856_v5 = vmul.f32 %v855_v61, %v3776_v6  ;;  %v939_v17 = vmul.f32 %v2511_v20, %v3834_v46  ;;  %v1321_v4 = vsub.f32 %v3862_v47, %v1313_v11 }
 0x142   :  { %v2513_v14 = vpop.eup %2512  ;;  %v1071_v55 = vmax.f32 %v873_v1, 0.006  ;;  %v955_v53 = vmul.f32 %v2505_v26, %v954_v52  ;;  %v1465_v50 = vmul.f32 %v1457_v44, %v1457_v44  ;;  %v2014_v7 = vmul.f32 %v2006_v48, %v2006_v48 }
 0x143   :  { %v2515_v28 = vpop.eup %2514  ;;  %v858_v56 = vsel %vm857_vm2, %v3776_v6, %v856_v5  ;;  %v940_v0 = vmul.f32 %v2511_v20, %v939_v17  ;;  %v887_v23 = vmul.f32 %v2513_v14, %v3838_v21  ;;  %v1329_v31 = vmul.f32 %v1321_v4, %v1321_v4 }
 0x144   :  { %v1079_v61 = vmul.f32 %v1071_v55, %v3043_v10  ;;  %v861_v49 = vsel %vm859_vm3, %v860_v37, %v858_v56  ;;  %v956_v11 = vmul.f32 %v955_v53, %v3789_v16  ;;  %vm945_vm6 = vcmp.eq.f32.partialorder %v3834_v46, inf }
 0x145   :  { %v1487_v26 = vsel %vm73_vm0, %v1465_v50, 0.0  ;;  %v2517_v48 = vpop.eup %2516  ;;  %v1070_v52 = vmax.f32 %v861_v49, 0.006  ;;  %v941_v44 = vmul.f32 0.5, %v940_v0  ;;  %vm947_vm7 = vcmp.eq.f32.partialorder %v3834_v46, 0.0  ;;  %v3907_v50 = vpop.xlane.xlu1 %924 }
 0x146   :  { %v888_v1 = vmul.f32 %v2513_v14, %v887_v23  ;;  %1488 = vadd.xlane.f32.xlu2 %v1487_v26  ;;  %v1351_v5 = vsel %vm73_vm0, %v1329_v31, 0.0  ;;  %v958_v6 = vsel %vm957_vm4, %v3789_v16, %v956_v11  ;;  %v948_v56 = vand.u32 2147483648, %v3834_v46 }
 0x147   :  { %1352 = vadd.xlane.f32.xlu1 %v1351_v5  ;;  %v2030_v37 = vsel %vm73_vm0, %v2014_v7, 0.0  ;;  %v987_v17 = vmul.f32 %v2517_v48, %v3850_v43  ;;  %v1078_v4 = vmul.f32 %v1070_v52, %v3024_v41  ;;  %v961_v0 = vsel %vm959_vm5, %v960_v54, %v958_v6  ;;  %v3913_v54 = vpop.xlane.xlu0 %921 }
 0x148   :  { %v942_v55 = vsub.f32 1.5, %v941_v44  ;;  %v889_v53 = vmul.f32 0.5, %v888_v1  ;;  %2031 = vadd.xlane.f32.xlu0 %v2030_v37  ;;  %v1092_v23 = vmul.f32 1.442695, %v1079_v61  ;;  %v1099_v31 = vmax.f32 %v961_v0, 0.006 }
 0x149   :  { %vm893_vm8 = vcmp.eq.f32.partialorder %v3838_v21, inf  ;;  %v988_v49 = vmul.f32 %v2517_v48, %v987_v17  ;;  %2518 = vpow2.f32 %v1094_v19  ;;  %v1090_v11 = vmul.f32 1.442695, %v1078_v4 }
 0x14a   :  { %v943_v7 = vmul.f32 %v2511_v20, %v942_v55  ;;  %v890_v26 = vsub.f32 1.5, %v889_v53  ;;  %v1107_v5 = vmul.f32 %v1099_v31, %v3132_v59  ;;  %vm895_vm9 = vcmp.eq.f32.partialorder %v3838_v21, 0.0 }
 0x14b   :  { %v989_v16 = vmul.f32 0.5, %v988_v49  ;;  %2520 = vrsqrt.f32 %v3907_v50  ;;  %v896_v44 = vand.u32 2147483648, %v3838_v21  ;;  %v3919_v20 = vadd.f32 %v3854_v32, %v3778_v2  ;;  %v3932_v2 = vpop.xlane.xlu2 %936 }
 0x14c   :  { %2522 = vpow2.f32 %v1090_v11  ;;  %v944_v61 = vmul.f32 %v943_v7, %v3834_v46  ;;  %v891_v52 = vmul.f32 %v2513_v14, %v890_v26  ;;  %v1116_v19 = vmul.f32 1.442695, %v1107_v5 }
 0x14d   :  { %2524 = vpow2.f32 %v1092_v23  ;;  %v990_v1 = vsub.f32 1.5, %v989_v16  ;;  %v3926_v17 = vadd.f32 %v2515_v28, %v3681_v45  ;;  %vm993_vm10 = vcmp.eq.f32.partialorder %v3850_v43, inf }
 0x14e   :  { %v946_v6 = vsel %vm945_vm6, %v3834_v46, %v944_v61  ;;  %v892_v37 = vmul.f32 %v891_v52, %v3838_v21  ;;  %2526 = vrsqrt.f32 %v3913_v54  ;;  %vm995_vm11 = vcmp.eq.f32.partialorder %v3850_v43, 0.0 }
 0x14f   :  { %2528 = vpow2.f32 %v1116_v19  ;;  %v949_v14 = vsel %vm947_vm7, %v948_v56, %v946_v6  ;;  %v991_v4 = vmul.f32 %v2517_v48, %v990_v1  ;;  %v3934_v32 = vpop.eup %2518  ;;  %v996_v28 = vand.u32 2147483648, %v3850_v43  ;;  %v2761_v56 = vld [vmem:[%s4876_s1 + $0x14] sm:$0xf] }
 0x150   :  { %v1098_v0 = vmax.f32 %v949_v14, 0.006  ;;  %v894_v55 = vsel %vm893_vm8, %v3838_v21, %v892_v37  ;;  %v1863_v53 = vperm.slane %v2761_v56, 3  ;;  %v1719_v23 = vperm.slane %v3667_v39, 3 }
 0x151   :  { %v2521_v45 = vpop.eup %2520  ;;  %v897_v46 = vsel %vm895_vm9, %v896_v44, %v894_v55  ;;  %v992_v48 = vmul.f32 %v991_v4, %v3850_v43  ;;  %2530 = vrsqrt.f32 %v3932_v2  ;;  %vm981_vm12 = vcmp.eq.f32.partialorder %v3907_v50, inf }
 0x152   :  { %v2523_v31 = vpop.eup %2522  ;;  %v1106_v49 = vmul.f32 %v1098_v0, %v3032_v3  ;;  %v1073_v11 = vmax.f32 %v897_v46, 0.006  ;;  %v975_v7 = vmul.f32 %v2521_v45, %v3907_v50  ;;  %v2007_v16 = vsub.f32 %v3667_v39, %v1863_v53 }
 0x153   :  { %v2525_v26 = vpop.eup %2524  ;;  %v994_v21 = vsel %vm993_vm10, %v3850_v43, %v992_v48  ;;  %v3955_v5 = vadd.f32 %v2523_v31, %v3736_v35  ;;  %v1871_v61 = vsub.f32 %v2761_v56, %v1863_v53  ;;  %vm983_vm13 = vcmp.eq.f32.partialorder %v3907_v50, 0.0 }
 0x154   :  { %v2527_v52 = vpop.eup %2526  ;;  %v1114_v44 = vmul.f32 1.442695, %v1106_v49  ;;  %v1081_v19 = vmul.f32 %v1073_v11, %v3137_v62  ;;  %v997_v1 = vsel %vm995_vm11, %v996_v28, %v994_v21  ;;  %v976_v6 = vmul.f32 %v2521_v45, %v975_v7 }
 0x155   :  { %v2529_v37 = vpop.eup %2528  ;;  %v1102_v14 = vmax.f32 %v997_v1, 0.006  ;;  %v963_v4 = vmul.f32 %v2527_v52, %v3913_v54  ;;  %v2015_v0 = vmul.f32 %v2007_v16, %v2007_v16  ;;  %v1879_v55 = vmul.f32 %v1871_v61, %v1871_v61 }
 0x156   :  { %v1139_v46 = vmul.f32 2.0, %v2529_v37  ;;  %2532 = vpow2.f32 %v1114_v44  ;;  %v1096_v35 = vmul.f32 1.442695, %v1081_v19  ;;  %v977_v48 = vmul.f32 0.5, %v976_v6  ;;  %v3969_v44 = vpop.xlane.xlu1 %933 }
 0x157   :  { %v1110_v56 = vmul.f32 %v1102_v14, %v3024_v41  ;;  %v964_v53 = vmul.f32 %v2527_v52, %v963_v4  ;;  %v2033_v31 = vsel %vm73_vm0, %v2015_v0, 0.0  ;;  %v1897_v49 = vsel %vm73_vm0, %v1879_v55, 0.0  ;;  %v2531_v43 = vpop.eup %2530  ;;  %v3983_v55 = vpop.xlane.xlu0 %930 }
 0x158   :  { %v1147_v28 = vsub.f32 %v3873_v25, %v1139_v46  ;;  %2534 = vpow2.f32 %v1096_v35  ;;  %v978_v11 = vsub.f32 1.5, %v977_v48  ;;  %2034 = vadd.xlane.f32.xlu2 %v2033_v31  ;;  %1898 = vadd.xlane.f32.xlu1 %v1897_v49  ;;  %v1727_v7 = vsub.f32 %v3667_v39, %v1719_v23 }
 0x159   :  { %v1122_v21 = vmul.f32 1.442695, %v1110_v56  ;;  %v965_v16 = vmul.f32 0.5, %v964_v53  ;;  %v1023_v61 = vmul.f32 %v2531_v43, %v3932_v2  ;;  %v4890_v19 = vsub.f32 %v3318_v9, %v3470_v57 }
 0x15a   :  { %v979_v25 = vmul.f32 %v2521_v45, %v978_v11  ;;  %v1735_v6 = vmul.f32 %v1727_v7, %v1727_v7  ;;  %v984_v39 = vand.u32 2147483648, %v3907_v50  ;;  %vm969_vm14 = vcmp.eq.f32.partialorder %v3913_v54, inf }
 0x15b   :  { %v3974_v1 = vadd.f32 %v1147_v28, %v4890_v19  ;;  %2536 = vpow2.f32 %v1122_v21  ;;  %v966_v23 = vsub.f32 1.5, %v965_v16  ;;  %v1024_v37 = vmul.f32 %v2531_v43, %v1023_v61 }
 0x15c   :  { %v2533_v14 = vpop.eup %2532  ;;  %v980_v4 = vmul.f32 %v979_v25, %v3907_v50  ;;  %v1753_v0 = vsel %vm73_vm0, %v1735_v6, 0.0  ;;  %2538 = vrsqrt.f32 %v3969_v44  ;;  %vm971_vm15 = vcmp.eq.f32.partialorder %v3913_v54, 0.0 }
 0x15d   :  { %v1138_v9 = vmul.f32 2.0, %v2533_v14  ;;  %v967_v57 = vmul.f32 %v2527_v52, %v966_v23  ;;  %1754 = vadd.xlane.f32.xlu0 %v1753_v0  ;;  %v1025_v45 = vmul.f32 0.5, %v1024_v37  ;;  %v972_v48 = vand.u32 2147483648, %v3913_v54 }
 0x15e   :  { %v2535_v46 = vpop.eup %2534  ;;  %v982_v35 = vsel %vm981_vm12, %v3907_v50, %v980_v4  ;;  %v3991_v56 = vadd.f32 %v3934_v32, %v3827_v33  ;;  %v3994_v53 = vadd.f32 %v2525_v26, %v3728_v15  ;;  %vm1029_vm1 = vcmp.eq.f32.partialorder %v3932_v2, inf  ;;  %v4014_v26 = vpop.xlane.xlu2 %1193 }
 0x15f   :  { %v1146_v52 = vsub.f32 %v3846_v38, %v1138_v9  ;;  %v985_v31 = vsel %vm983_vm13, %v984_v39, %v982_v35  ;;  %v968_v49 = vmul.f32 %v967_v57, %v3913_v54  ;;  %v1026_v28 = vsub.f32 1.5, %v1025_v45 }
 0x160   :  { %v1101_v11 = vmax.f32 %v985_v31, 0.006  ;;  %v4002_v7 = vadd.f32 %v2535_v46, %v3818_v12  ;;  %2540 = vrsqrt.f32 %v3983_v55  ;;  %v4891_v15 = vsub.f32 %v3307_v24, %v3478_v40 }
 0x161   :  { %v2537_v33 = vpop.eup %2536  ;;  %v970_v38 = vsel %vm969_vm14, %v3913_v54, %v968_v49  ;;  %v1027_v50 = vmul.f32 %v2531_v43, %v1026_v28  ;;  %vm1031_vm2 = vcmp.eq.f32.partialorder %v3932_v2, 0.0  ;;  %v1032_v24 = vand.u32 2147483648, %v3932_v2 }
 0x162   :  { %v4008_v32 = vadd.f32 %v1146_v52, %v4891_v15  ;;  %v2539_v21 = vpop.eup %2538  ;;  %v1142_v12 = vmul.f32 2.0, %v2537_v33  ;;  %v1109_v16 = vmul.f32 %v1101_v11, %v3053_v18  ;;  %v973_v61 = vsel %vm971_vm15, %v972_v48, %v970_v38  ;;  %v4042_v33 = vpop.xlane.xlu1 %1190 }
 0x163   :  { %v1100_v40 = vmax.f32 %v973_v61, 0.006  ;;  %v1028_v19 = vmul.f32 %v1027_v50, %v3932_v2  ;;  %v1011_v25 = vmul.f32 %v2539_v21, %v3969_v44  ;;  %v1864_v43 = vperm.slane %v3717_v58, 3  ;;  %v4047_v61 = vpop.xlane.xlu0 %1187 }
 0x164   :  { %v1150_v6 = vsub.f32 %v3955_v5, %v1142_v12  ;;  %v1120_v39 = vmul.f32 1.442695, %v1109_v16  ;;  %v1720_v23 = vperm.slane %v3806_v29, 3  ;;  %2542 = vrsqrt.f32 %v4014_v26 }
 0x165   :  { %v1108_v37 = vmul.f32 %v1100_v40, %v3030_v63  ;;  %v1030_v54 = vsel %vm1029_vm1, %v3932_v2, %v1028_v19  ;;  %v1012_v14 = vmul.f32 %v2539_v21, %v1011_v25  ;;  %v2008_v4 = vsub.f32 %v3806_v29, %v1864_v43 }
 0x166   :  { %v2541_v0 = vpop.eup %2540  ;;  %v4892_v9 = vsub.f32 %v3379_v51, %v3505_v22  ;;  %2544 = vpow2.f32 %v1120_v39  ;;  %v1033_v5 = vsel %vm1031_vm2, %v1032_v24, %v1030_v54  ;;  %v1872_v45 = vsub.f32 %v3717_v58, %v1864_v43 }
 0x167   :  { %v1118_v46 = vmul.f32 1.442695, %v1108_v37  ;;  %v1105_v35 = vmax.f32 %v1033_v5, 0.006  ;;  %v1013_v48 = vmul.f32 0.5, %v1012_v14  ;;  %v999_v52 = vmul.f32 %v2541_v0, %v3983_v55  ;;  %v4060_v5 = vpop.xlane.xlu2 %1202 }
 0x168   :  { %v4034_v57 = vadd.f32 %v1150_v6, %v4892_v9  ;;  %v2016_v31 = vmul.f32 %v2008_v4, %v2008_v4  ;;  %v1880_v49 = vmul.f32 %v1872_v45, %v1872_v45  ;;  %v1728_v28 = vsub.f32 %v3806_v29, %v1720_v23 }
 0x169   :  { %2546 = vpow2.f32 %v1118_v46  ;;  %v1113_v51 = vmul.f32 %v1105_v35, %v3137_v62  ;;  %v1014_v22 = vsub.f32 1.5, %v1013_v48  ;;  %v1000_v11 = vmul.f32 %v2541_v0, %v999_v52 }
 0x16a   :  { %v2543_v2 = vpop.eup %2542  ;;  %v2036_v15 = vsel %vm73_vm0, %v2016_v31, 0.0  ;;  %v1900_v58 = vsel %vm73_vm0, %v1880_v49, 0.0  ;;  %v1736_v38 = vmul.f32 %v1728_v28, %v1728_v28  ;;  %vm1017_vm3 = vcmp.eq.f32.partialorder %v3969_v44, inf }
 0x16b   :  { %v1128_v50 = vmul.f32 1.442695, %v1113_v51  ;;  %v1015_v12 = vmul.f32 %v2539_v21, %v1014_v22  ;;  %v1001_v16 = vmul.f32 0.5, %v1000_v11  ;;  %2037 = vadd.xlane.f32.xlu2 %v2036_v15  ;;  %1901 = vadd.xlane.f32.xlu1 %v1900_v58  ;;  %v1235_v29 = vmul.f32 %v2543_v2, %v4014_v26 }
 0x16c   :  { %v2545_v24 = vpop.eup %2544  ;;  %v1756_v40 = vsel %vm73_vm0, %v1736_v38, 0.0  ;;  %2548 = vrsqrt.f32 %v4042_v33  ;;  %vm1019_vm4 = vcmp.eq.f32.partialorder %v3969_v44, 0.0  ;;  %v1020_v21 = vand.u32 2147483648, %v3969_v44 }
 0x16d   :  { %v1141_v19 = vmul.f32 2.0, %v2545_v24  ;;  %2550 = vpow2.f32 %v1128_v50  ;;  %v1016_v25 = vmul.f32 %v1015_v12, %v3969_v44  ;;  %v1002_v43 = vsub.f32 1.5, %v1001_v16  ;;  %1757 = vadd.xlane.f32.xlu0 %v1756_v40 }
 0x16e   :  { %v1236_v6 = vmul.f32 %v2543_v2, %v1235_v29  ;;  %2552 = vrsqrt.f32 %v4047_v61  ;;  %vm1005_vm5 = vcmp.eq.f32.partialorder %v3983_v55, inf  ;;  %vm1007_vm6 = vcmp.eq.f32.partialorder %v3983_v55, 0.0 }
 0x16f   :  { %v2547_v39 = vpop.eup %2546  ;;  %v1149_v23 = vsub.f32 %v3919_v20, %v1141_v19  ;;  %v1018_v37 = vsel %vm1017_vm3, %v3969_v44, %v1016_v25  ;;  %v1003_v54 = vmul.f32 %v2541_v0, %v1002_v43  ;;  %v4893_v45 = vsub.f32 %v3359_v42, %v3525_v30  ;;  %v4091_v43 = vpop.xlane.xlu1 %1199 }
 0x170   :  { %v1140_v14 = vmul.f32 2.0, %v2547_v39  ;;  %v1021_v4 = vsel %vm1019_vm4, %v1020_v21, %v1018_v37  ;;  %v1237_v9 = vmul.f32 0.5, %v1236_v6  ;;  %v1008_v44 = vand.u32 2147483648, %v3983_v55 }
 0x171   :  { %v4065_v46 = vadd.f32 %v1149_v23, %v4893_v45  ;;  %v1104_v35 = vmax.f32 %v1021_v4, 0.006  ;;  %v1004_v20 = vmul.f32 %v1003_v54, %v3983_v55  ;;  %v1865_v31 = vperm.slane %v3862_v47, 3  ;;  %v4103_v45 = vpop.xlane.xlu0 %1196 }
 0x172   :  { %v2549_v0 = vpop.eup %2548  ;;  %v1148_v48 = vsub.f32 %v3926_v17, %v1140_v14  ;;  %v1238_v52 = vsub.f32 1.5, %v1237_v9  ;;  %v1721_v49 = vperm.slane %v3878_v60, 3  ;;  %2554 = vrsqrt.f32 %v4060_v5 }
 0x173   :  { %v2551_v28 = vpop.eup %2550  ;;  %v1112_v51 = vmul.f32 %v1104_v35, %v3164_v8  ;;  %v1006_v42 = vsel %vm1005_vm5, %v3983_v55, %v1004_v20  ;;  %v1223_v30 = vmul.f32 %v2549_v0, %v4042_v33  ;;  %v4894_v17 = vsub.f32 %v3371_v27, %v3539_v13 }
 0x174   :  { %v2553_v22 = vpop.eup %2552  ;;  %v1145_v15 = vmul.f32 2.0, %v2551_v28  ;;  %v1009_v58 = vsel %vm1007_vm6, %v1008_v44, %v1006_v42  ;;  %v1239_v38 = vmul.f32 %v2543_v2, %v1238_v52  ;;  %v2009_v19 = vsub.f32 %v3878_v60, %v1865_v31 }
 0x175   :  { %v4081_v11 = vadd.f32 %v1148_v48, %v4894_v17  ;;  %v1126_v50 = vmul.f32 1.442695, %v1112_v51  ;;  %v1103_v12 = vmax.f32 %v1009_v58, 0.006  ;;  %v1224_v16 = vmul.f32 %v2549_v0, %v1223_v30 }
 0x176   :  { %v1211_v29 = vmul.f32 %v2553_v22, %v4047_v61  ;;  %v1153_v24 = vsub.f32 %v4002_v7, %v1145_v15  ;;  %v1240_v40 = vmul.f32 %v1239_v38, %v4014_v26  ;;  %v1873_v27 = vsub.f32 %v3862_v47, %v1865_v31 }
 0x177   :  { %2556 = vpow2.f32 %v1126_v50  ;;  %v1111_v13 = vmul.f32 %v1103_v12, %v3043_v10  ;;  %v1225_v25 = vmul.f32 0.5, %v1224_v16  ;;  %v4895_v2 = vsub.f32 %v3489_v36, %v3566_v34  ;;  %v4120_v50 = vpop.xlane.xlu1 %1208  ;;  %v4896_v12 = vld [vmem:[#allocation2_spill] sm:$0xff]  ;;  %v4897_v16 = vld [vmem:[#allocation4_spill] sm:$0xff] }
 0x178   :  { %v1212_v55 = vmul.f32 %v2553_v22, %v1211_v29  ;;  %v2017_v6 = vmul.f32 %v2009_v19, %v2009_v19  ;;  %v1881_v7 = vmul.f32 %v1873_v27, %v1873_v27  ;;  %v2555_v39 = vpop.eup %2554  ;;  %vm1241_vm7 = vcmp.eq.f32.partialorder %v4014_v26, inf }
 0x179   :  { %v4096_v21 = vadd.f32 %v1153_v24, %v4895_v2  ;;  %v1124_v23 = vmul.f32 1.442695, %v1111_v13  ;;  %v1226_v37 = vsub.f32 1.5, %v1225_v25  ;;  %v1242_v54 = vsel %vm1241_vm7, %v4014_v26, %v1240_v40 }
 0x17a   :  { %v1213_v47 = vmul.f32 0.5, %v1212_v55  ;;  %v2039_v14 = vsel %vm73_vm0, %v2017_v6, 0.0  ;;  %v1903_v4 = vsel %vm73_vm0, %v1881_v7, 0.0  ;;  %v1729_v9 = vsub.f32 %v3878_v60, %v1721_v49  ;;  %v4109_v60 = vpop.xlane.xlu2 %1331  ;;  %v4133_v55 = vpop.xlane.xlu0 %1205 }
 0x17b   :  { %2558 = vpow2.f32 %v1124_v23  ;;  %v1227_v36 = vmul.f32 %v2549_v0, %v1226_v37  ;;  %2040 = vadd.xlane.f32.xlu2 %v2039_v14  ;;  %1904 = vadd.xlane.f32.xlu1 %v1903_v4  ;;  %v1271_v35 = vmul.f32 %v2555_v39, %v4060_v5  ;;  %v1244_v20 = vand.u32 2147483648, %v4014_v26  ;;  %v4899_v37 = vld [vmem:[#allocation3_spill] sm:$0xff] }
 0x17c   :  { %v1214_v34 = vsub.f32 1.5, %v1213_v47  ;;  %v1737_v44 = vmul.f32 %v1729_v9, %v1729_v9  ;;  %vm1243_vm8 = vcmp.eq.f32.partialorder %v4014_v26, 0.0  ;;  %2560 = vrsqrt.f32 %v4091_v43  ;;  %v4900_v47 = vld [vmem:[#allocation5_spill] sm:$0xff] }
 0x17d   :  { %v2557_v48 = vpop.eup %2556  ;;  %v1228_v52 = vmul.f32 %v1227_v36, %v4042_v33  ;;  %v1272_v28 = vmul.f32 %v2555_v39, %v1271_v35  ;;  %v1245_v51 = vsel %vm1243_vm8, %v1244_v20, %v1242_v54  ;;  %vm1229_vm9 = vcmp.eq.f32.partialorder %v4042_v33, inf }
 0x17e   :  { %v1215_v31 = vmul.f32 %v2553_v22, %v1214_v34  ;;  %v1144_v49 = vmul.f32 2.0, %v2557_v48  ;;  %v1759_v0 = vsel %vm73_vm0, %v1737_v44, 0.0  ;;  %vm1231_vm10 = vcmp.eq.f32.partialorder %v4042_v33, 0.0 }
 0x17f   :  { %1760 = vadd.xlane.f32.xlu0 %v1759_v0  ;;  %v1273_v30 = vmul.f32 0.5, %v1272_v28  ;;  %v1230_v17 = vsel %vm1229_vm9, %v4042_v33, %v1228_v52  ;;  %v1588_v15 = vmax.f32 %v1245_v51, 0.006  ;;  %v1232_v58 = vand.u32 2147483648, %v4042_v33 }
 0x180   :  { %v1216_v42 = vmul.f32 %v1215_v31, %v4047_v61  ;;  %v1152_v26 = vsub.f32 %v3991_v56, %v1144_v49  ;;  %vm1217_vm0 = vcmp.eq.f32.partialorder %v4047_v61, inf  ;;  %v4898_v29 = vsub.f32 %v4896_v12, %v4897_v16  ;;  %v4154_v49 = vpop.xlane.xlu1 %1337 }
 0x181   :  { %v2559_v22 = vpop.eup %2558  ;;  %v1274_v38 = vsub.f32 1.5, %v1273_v30  ;;  %2562 = vrsqrt.f32 %v4103_v45  ;;  %v1233_v19 = vsel %vm1231_vm10, %v1232_v58, %v1230_v17  ;;  %v1220_v27 = vand.u32 2147483648, %v4047_v61 }
 0x182   :  { %v4125_v24 = vadd.f32 %v1152_v26, %v4898_v29  ;;  %v1143_v40 = vmul.f32 2.0, %v2559_v22  ;;  %v1218_v56 = vsel %vm1217_vm0, %v4047_v61, %v1216_v42  ;;  %v2561_v33 = vpop.eup %2560  ;;  %vm1219_vm11 = vcmp.eq.f32.partialorder %v4047_v61, 0.0  ;;  %v4143_v4 = vpop.xlane.xlu2 %1340 }
 0x183   :  { %v1275_v13 = vmul.f32 %v2555_v39, %v1274_v38  ;;  %2564 = vrsqrt.f32 %v4109_v60  ;;  %v1596_v2 = vmul.f32 %v1588_v15, %v3030_v63  ;;  %v1221_v6 = vsel %vm1219_vm11, %v1220_v27, %v1218_v56 }
 0x184   :  { %v1151_v25 = vsub.f32 %v3994_v53, %v1143_v40  ;;  %v1259_v23 = vmul.f32 %v2561_v33, %v4091_v43  ;;  %v4901_v54 = vsub.f32 %v4899_v37, %v4900_v47  ;;  %v1587_v14 = vmax.f32 %v1233_v19, 0.006 }
 0x185   :  { %v1276_v7 = vmul.f32 %v1275_v13, %v4060_v5  ;;  %v1586_v9 = vmax.f32 %v1221_v6, 0.006  ;;  %vm1277_vm12 = vcmp.eq.f32.partialorder %v4060_v5, inf  ;;  %2566 = vrsqrt.f32 %v4120_v50 }
 0x186   :  { %v4141_v39 = vadd.f32 %v1151_v25, %v4901_v54  ;;  %v1260_v53 = vmul.f32 %v2561_v33, %v1259_v23  ;;  %v1606_v36 = vmul.f32 1.442695, %v1596_v2  ;;  %v1595_v44 = vmul.f32 %v1587_v14, %v3132_v59 }
 0x187   :  { %v2563_v61 = vpop.eup %2562  ;;  %v1278_v34 = vsel %vm1277_vm12, %v4060_v5, %v1276_v7  ;;  %v1280_v48 = vand.u32 2147483648, %v4060_v5  ;;  %2568 = vrsqrt.f32 %v4133_v55  ;;  %vm1279_vm13 = vcmp.eq.f32.partialorder %v4060_v5, 0.0  ;;  %v4162_v5 = vpop.xlane.xlu0 %1334 }
 0x188   :  { %v1247_v35 = vmul.f32 %v2563_v61, %v4103_v45  ;;  %v1261_v52 = vmul.f32 0.5, %v1260_v53  ;;  %v1594_v51 = vmul.f32 %v1586_v9, %v3032_v3  ;;  %2570 = vrsqrt.f32 %v4143_v4 }
 0x189   :  { %v2565_v20 = vpop.eup %2564  ;;  %v1281_v0 = vsel %vm1279_vm13, %v1280_v48, %v1278_v34  ;;  %2572 = vpow2.f32 %v1606_v36  ;;  %v1604_v17 = vmul.f32 1.442695, %v1595_v44  ;;  %v1268_v15 = vand.u32 2147483648, %v4091_v43 }
 0x18a   :  { %v1248_v31 = vmul.f32 %v2563_v61, %v1247_v35  ;;  %v1355_v28 = vmul.f32 %v2565_v20, %v4109_v60  ;;  %v1262_v22 = vsub.f32 1.5, %v1261_v52  ;;  %2574 = vrsqrt.f32 %v4154_v49  ;;  %v4175_v25 = vpop.xlane.xlu2 %1467 }
 0x18b   :  { %v4158_v26 = vpop.eup %2566  ;;  %v1591_v58 = vmax.f32 %v1281_v0, 0.006  ;;  %vm1253_vm14 = vcmp.eq.f32.partialorder %v4103_v45, inf  ;;  %v1602_v29 = vmul.f32 1.442695, %v1594_v51  ;;  %vm1255_vm15 = vcmp.eq.f32.partialorder %v4103_v45, 0.0 }
 0x18c   :  { %v1249_v42 = vmul.f32 0.5, %v1248_v31  ;;  %v1356_v30 = vmul.f32 %v2565_v20, %v1355_v28  ;;  %v1256_v40 = vand.u32 2147483648, %v4103_v45  ;;  %v1295_v56 = vmul.f32 %v4158_v26, %v4120_v50 }
 0x18d   :  { %v4165_v16 = vpop.eup %2568  ;;  %vm1265_vm1 = vcmp.eq.f32.partialorder %v4091_v43, inf  ;;  %2576 = vrsqrt.f32 %v4162_v5  ;;  %v1263_v6 = vmul.f32 %v2561_v33, %v1262_v22  ;;  %vm1361_vm2 = vcmp.eq.f32.partialorder %v4109_v60, inf }
 0x18e   :  { %v1250_v38 = vsub.f32 1.5, %v1249_v42  ;;  %v1357_v12 = vmul.f32 0.5, %v1356_v30  ;;  %v1283_v13 = vmul.f32 %v4165_v16, %v4133_v55  ;;  %v2571_v2 = vpop.eup %2570  ;;  %2578 = vpow2.f32 %v1604_v17 }
 0x18f   :  { %vm1363_vm3 = vcmp.eq.f32.partialorder %v4109_v60, 0.0  ;;  %v4179_v7 = vpop.eup %2572  ;;  %v1599_v23 = vmul.f32 %v1591_v58, %v3043_v10  ;;  %v1296_v54 = vmul.f32 %v4158_v26, %v1295_v56  ;;  %vm1267_vm4 = vcmp.eq.f32.partialorder %v4091_v43, 0.0 }
 0x190   :  { %v1251_v19 = vmul.f32 %v2563_v61, %v1250_v38  ;;  %v1358_v27 = vsub.f32 1.5, %v1357_v12  ;;  %v2575_v14 = vpop.eup %2574  ;;  %v1364_v53 = vand.u32 2147483648, %v4109_v60  ;;  %v1284_v33 = vmul.f32 %v4165_v16, %v1283_v13 }
 0x191   :  { %v1391_v61 = vmul.f32 %v2571_v2, %v4143_v4  ;;  %2580 = vrsqrt.f32 %v4175_v25  ;;  %v1304_v34 = vand.u32 2147483648, %v4120_v50  ;;  %v1264_v35 = vmul.f32 %v1263_v6, %v4091_v43 }
 0x192   :  { %v1252_v37 = vmul.f32 %v1251_v19, %v4103_v45  ;;  %v1359_v47 = vmul.f32 %v2565_v20, %v1358_v27  ;;  %2582 = vpow2.f32 %v1602_v29  ;;  %v1379_v48 = vmul.f32 %v2575_v14, %v4154_v49 }
 0x193   :  { %v1392_v44 = vmul.f32 %v2571_v2, %v1391_v61  ;;  %v2577_v52 = vpop.eup %2576  ;;  %v1612_v31 = vmul.f32 1.442695, %v1599_v23  ;;  %v1297_v51 = vmul.f32 0.5, %v1296_v54  ;;  %vm1397_vm5 = vcmp.eq.f32.partialorder %v4143_v4, inf  ;;  %v4216_v23 = vpop.xlane.xlu1 %1346 }
 0x194   :  { %v1254_v9 = vsel %vm1253_vm14, %v4103_v45, %v1252_v37  ;;  %v1360_v36 = vmul.f32 %v1359_v47, %v4109_v60  ;;  %v4202_v0 = vpop.eup %2578  ;;  %v1285_v30 = vmul.f32 0.5, %v1284_v33  ;;  %vm1399_vm6 = vcmp.eq.f32.partialorder %v4143_v4, 0.0 }
 0x195   :  { %v1257_v20 = vsel %vm1255_vm15, %v1256_v40, %v1254_v9  ;;  %v1393_v45 = vmul.f32 0.5, %v1392_v44  ;;  %v1380_v17 = vmul.f32 %v2575_v14, %v1379_v48  ;;  %v1400_v38 = vand.u32 2147483648, %v4143_v4 }
 0x196   :  { %v1362_v28 = vsel %vm1361_vm2, %v4109_v60, %v1360_v36  ;;  %v1589_v22 = vmax.f32 %v1257_v20, 0.006  ;;  %vm1385_vm7 = vcmp.eq.f32.partialorder %v4154_v49, inf  ;;  %v1266_v29 = vsel %vm1265_vm1, %v4091_v43, %v1264_v35 }
 0x197   :  { %v1365_v42 = vsel %vm1363_vm3, %v1364_v53, %v1362_v28  ;;  %v2581_v12 = vpop.eup %2580  ;;  %v1394_v40 = vsub.f32 1.5, %v1393_v45  ;;  %v1381_v56 = vmul.f32 0.5, %v1380_v17  ;;  %v1367_v60 = vmul.f32 %v2577_v52, %v4162_v5 }
 0x198   :  { %v1618_v58 = vmax.f32 %v1365_v42, 0.006  ;;  %v2583_v19 = vpop.eup %2582  ;;  %v1298_v13 = vsub.f32 1.5, %v1297_v51  ;;  %vm1387_vm8 = vcmp.eq.f32.partialorder %v4154_v49, 0.0  ;;  %v1491_v6 = vmul.f32 %v2581_v12, %v4175_v25 }
 0x199   :  { %v1286_v37 = vsub.f32 1.5, %v1285_v30  ;;  %v1395_v47 = vmul.f32 %v2571_v2, %v1394_v40  ;;  %v1382_v54 = vsub.f32 1.5, %v1381_v56  ;;  %v1368_v53 = vmul.f32 %v2577_v52, %v1367_v60  ;;  %v4227_v2 = vpop.xlane.xlu0 %1343  ;;  %v4249_v40 = vpop.xlane.xlu2 %1476 }
 0x19a   :  { %v1626_v27 = vmul.f32 %v1618_v58, %v3032_v3  ;;  %2584 = vpow2.f32 %v1612_v31  ;;  %v1269_v33 = vsel %vm1267_vm4, %v1268_v15, %v1266_v29  ;;  %v1597_v61 = vmul.f32 %v1589_v22, %v3053_v18 }
 0x19b   :  { %vm1301_vm9 = vcmp.eq.f32.partialorder %v4120_v50, inf  ;;  %v1396_v36 = vmul.f32 %v1395_v47, %v4143_v4  ;;  %v1383_v35 = vmul.f32 %v2575_v14, %v1382_v54  ;;  %v1388_v20 = vand.u32 2147483648, %v4154_v49 }
 0x19c   :  { %v1634_v9 = vmul.f32 1.442695, %v1626_v27  ;;  %vm1373_vm10 = vcmp.eq.f32.partialorder %v4162_v5, inf  ;;  %v1299_v44 = vmul.f32 %v4158_v26, %v1298_v13  ;;  %v1369_v48 = vmul.f32 0.5, %v1368_v53 }
 0x19d   :  { %v1492_v43 = vmul.f32 %v2581_v12, %v1491_v6  ;;  %v1590_v15 = vmax.f32 %v1269_v33, 0.006  ;;  %v1287_v31 = vmul.f32 %v4165_v16, %v1286_v37  ;;  %vm1289_vm0 = vcmp.eq.f32.partialorder %v4133_v55, inf }
 0x19e   :  { %2586 = vpow2.f32 %v1634_v9  ;;  %v1398_v14 = vsel %vm1397_vm5, %v4143_v4, %v1396_v36  ;;  %v1384_v28 = vmul.f32 %v1383_v35, %v4154_v49  ;;  %v1608_v51 = vmul.f32 1.442695, %v1597_v61 }
 0x19f   :  { %v1401_v42 = vsel %vm1399_vm6, %v1400_v38, %v1398_v14  ;;  %v1370_v30 = vsub.f32 1.5, %v1369_v48  ;;  %v1493_v45 = vmul.f32 0.5, %v1492_v43  ;;  %vm1375_vm11 = vcmp.eq.f32.partialorder %v4162_v5, 0.0 }
 0x1a0   :  { %v1621_v26 = vmax.f32 %v1401_v42, 0.006  ;;  %v1386_v17 = vsel %vm1385_vm7, %v4154_v49, %v1384_v28  ;;  %v1376_v16 = vand.u32 2147483648, %v4162_v5  ;;  %v4243_v22 = vpop.eup %2584  ;;  %v1300_v58 = vmul.f32 %v1299_v44, %v4120_v50  ;;  %v4256_v49 = vpop.xlane.xlu1 %1473 }
 0x1a1   :  { %vm1303_vm12 = vcmp.eq.f32.partialorder %v4120_v50, 0.0  ;;  %v1389_v4 = vsel %vm1387_vm8, %v1388_v20, %v1386_v17  ;;  %v1371_v38 = vmul.f32 %v2577_v52, %v1370_v30  ;;  %v1494_v29 = vsub.f32 1.5, %v1493_v45  ;;  %v4273_v35 = vpop.xlane.xlu0 %1470  ;;  %v4298_v17 = vpop.xlane.xlu2 %1883 }
 0x1a2   :  { %v1598_v56 = vmul.f32 %v1590_v15, %v3024_v41  ;;  %v1629_v60 = vmul.f32 %v1621_v26, %v3053_v18  ;;  %v1620_v27 = vmax.f32 %v1389_v4, 0.006  ;;  %vm1497_vm13 = vcmp.eq.f32.partialorder %v4175_v25, inf }
 0x1a3   :  { %2588 = vpow2.f32 %v1608_v51  ;;  %v1288_v6 = vmul.f32 %v1287_v31, %v4133_v55  ;;  %v1372_v37 = vmul.f32 %v1371_v38, %v4162_v5  ;;  %v1495_v47 = vmul.f32 %v2581_v12, %v1494_v29 }
 0x1a4   :  { %v2587_v13 = vpop.eup %2586  ;;  %v1640_v52 = vmul.f32 1.442695, %v1629_v60  ;;  %v1628_v54 = vmul.f32 %v1620_v27, %v3030_v63  ;;  %2590 = vrsqrt.f32 %v4216_v23  ;;  %v1302_v33 = vsel %vm1301_vm9, %v4120_v50, %v1300_v58 }
 0x1a5   :  { %v4259_v53 = vadd.f32 %v2587_v13, %v2583_v19  ;;  %v1374_v61 = vsel %vm1373_vm10, %v4162_v5, %v1372_v37  ;;  %v1496_v9 = vmul.f32 %v1495_v47, %v4175_v25  ;;  %2592 = vrsqrt.f32 %v4227_v2 }
 0x1a6   :  { %2594 = vpow2.f32 %v1640_v52  ;;  %v1638_v12 = vmul.f32 1.442695, %v1628_v54  ;;  %v1377_v19 = vsel %vm1375_vm11, %v1376_v16, %v1374_v61  ;;  %v1500_v36 = vand.u32 2147483648, %v4175_v25 }
 0x1a7   :  { %v1290_v20 = vsel %vm1289_vm0, %v4133_v55, %v1288_v6  ;;  %v1619_v44 = vmax.f32 %v1377_v19, 0.006  ;;  %v1498_v48 = vsel %vm1497_vm13, %v4175_v25, %v1496_v9  ;;  %vm1499_vm14 = vcmp.eq.f32.partialorder %v4175_v25, 0.0 }
 0x1a8   :  { %v1610_v43 = vmul.f32 1.442695, %v1598_v56  ;;  %v1292_v15 = vand.u32 2147483648, %v4133_v55  ;;  %2596 = vpow2.f32 %v1638_v12  ;;  %v1501_v5 = vsel %vm1499_vm14, %v1500_v36, %v1498_v48  ;;  %v4303_v38 = vpop.xlane.xlu1 %1742 }
 0x1a9   :  { %v2589_v31 = vpop.eup %2588  ;;  %vm1291_vm15 = vcmp.eq.f32.partialorder %v4133_v55, 0.0  ;;  %v1627_v14 = vmul.f32 %v1619_v44, %v3132_v59  ;;  %v1650_v28 = vmax.f32 %v1501_v5, 0.006  ;;  %2598 = vrsqrt.f32 %v4249_v40 }
 0x1aa   :  { %v2591_v51 = vpop.eup %2590  ;;  %v4290_v42 = vsel %vm1303_vm12, %v1304_v34, %v1302_v33  ;;  %v4292_v25 = vsel %vm1291_vm15, %v1292_v15, %v1290_v20  ;;  %2600 = vrsqrt.f32 %v4256_v49  ;;  %vm1421_vm1 = vcmp.eq.f32.partialorder %v4216_v23, inf  ;;  %v4315_v33 = vpop.xlane.xlu0 %1739 }
 0x1ab   :  { %v2593_v30 = vpop.eup %2592  ;;  %v1636_v45 = vmul.f32 1.442695, %v1627_v14  ;;  %v1658_v55 = vmul.f32 %v1650_v28, %v3032_v3  ;;  %v1415_v26 = vmul.f32 %v2591_v51, %v4216_v23  ;;  %2602 = vrsqrt.f32 %v4273_v35 }
 0x1ac   :  { %v2595_v16 = vpop.eup %2594  ;;  %2604 = vpow2.f32 %v1610_v43  ;;  %v1403_v50 = vmul.f32 %v2593_v30, %v4227_v2  ;;  %v1593_v56 = vmax.f32 %v4290_v42, 0.006  ;;  %v1592_v60 = vmax.f32 %v4292_v25, 0.006 }
 0x1ad   :  { %2606 = vpow2.f32 %v1636_v45  ;;  %v1666_v34 = vmul.f32 1.442695, %v1658_v55  ;;  %v1416_v58 = vmul.f32 %v2591_v51, %v1415_v26  ;;  %v4301_v4 = vadd.f32 %v2595_v16, %v2589_v31 }
 0x1ae   :  { %v2597_v29 = vpop.eup %2596  ;;  %v1404_v27 = vmul.f32 %v2593_v30, %v1403_v50  ;;  %2608 = vrsqrt.f32 %v4298_v17  ;;  %vm1423_vm2 = vcmp.eq.f32.partialorder %v4216_v23, 0.0  ;;  %v1424_v12 = vand.u32 2147483648, %v4216_v23 }
 0x1af   :  { %v2599_v13 = vpop.eup %2598  ;;  %2610 = vpow2.f32 %v1666_v34  ;;  %v1417_v6 = vmul.f32 0.5, %v1416_v58  ;;  %v4310_v37 = vadd.f32 %v2597_v29, %v4179_v7  ;;  %vm1409_vm3 = vcmp.eq.f32.partialorder %v4227_v2, inf }
 0x1b0   :  { %v2601_v47 = vpop.eup %2600  ;;  %v1405_v52 = vmul.f32 0.5, %v1404_v27  ;;  %v1527_v54 = vmul.f32 %v2599_v13, %v4249_v40  ;;  %2612 = vrsqrt.f32 %v4303_v38  ;;  %vm1411_vm4 = vcmp.eq.f32.partialorder %v4227_v2, 0.0 }
 0x1b1   :  { %v2603_v61 = vpop.eup %2602  ;;  %v1418_v9 = vsub.f32 1.5, %v1417_v6  ;;  %v1515_v19 = vmul.f32 %v2601_v47, %v4256_v49  ;;  %v1412_v20 = vand.u32 2147483648, %v4227_v2  ;;  %vm1533_vm5 = vcmp.eq.f32.partialorder %v4249_v40, inf }
 0x1b2   :  { %v4320_v7 = vpop.eup %2604  ;;  %v1406_v36 = vsub.f32 1.5, %v1405_v52  ;;  %v1528_v44 = vmul.f32 %v2599_v13, %v1527_v54  ;;  %v1503_v48 = vmul.f32 %v2603_v61, %v4273_v35  ;;  %v1536_v5 = vand.u32 2147483648, %v4249_v40 }
 0x1b3   :  { %v2607_v43 = vpop.eup %2606  ;;  %v1419_v15 = vmul.f32 %v2591_v51, %v1418_v9  ;;  %v1516_v31 = vmul.f32 %v2601_v47, %v1515_v19  ;;  %2614 = vrsqrt.f32 %v4315_v33  ;;  %vm1535_vm6 = vcmp.eq.f32.partialorder %v4249_v40, 0.0 }
 0x1b4   :  { %v2609_v14 = vpop.eup %2608  ;;  %v1407_v28 = vmul.f32 %v2593_v30, %v1406_v36  ;;  %v1529_v45 = vmul.f32 0.5, %v1528_v44  ;;  %vm1521_vm7 = vcmp.eq.f32.partialorder %v4256_v49, inf  ;;  %v4331_v55 = vadd.f32 %v2607_v43, %v4202_v0 }
 0x1b5   :  { %v1504_v26 = vmul.f32 %v2603_v61, %v1503_v48  ;;  %v2611_v16 = vpop.eup %2610  ;;  %v1420_v51 = vmul.f32 %v1419_v15, %v4216_v23  ;;  %v1517_v50 = vmul.f32 0.5, %v1516_v31  ;;  %vm1523_vm8 = vcmp.eq.f32.partialorder %v4256_v49, 0.0 }
 0x1b6   :  { %v1524_v34 = vand.u32 2147483648, %v4256_v49  ;;  %v1907_v58 = vmul.f32 %v2609_v14, %v4298_v17  ;;  %v4337_v30 = vpop.eup %2612  ;;  %v1690_v29 = vmul.f32 2.0, %v2611_v16  ;;  %v1408_v27 = vmul.f32 %v1407_v28, %v4227_v2 }
 0x1b7   :  { %v1530_v6 = vsub.f32 1.5, %v1529_v45  ;;  %v1505_v52 = vmul.f32 0.5, %v1504_v26  ;;  %vm1509_vm9 = vcmp.eq.f32.partialorder %v4273_v35, inf  ;;  %v1422_v0 = vsel %vm1421_vm1, %v4216_v23, %v1420_v51 }
 0x1b8   :  { %v1518_v54 = vsub.f32 1.5, %v1517_v50  ;;  %v1908_v9 = vmul.f32 %v2609_v14, %v1907_v58  ;;  %v1775_v19 = vmul.f32 %v4337_v30, %v4303_v38  ;;  %v1698_v36 = vsub.f32 %v4259_v53, %v1690_v29 }
 0x1b9   :  { %v1425_v44 = vsel %vm1423_vm2, %v1424_v12, %v1422_v0  ;;  %v1410_v48 = vsel %vm1409_vm3, %v4227_v2, %v1408_v27  ;;  %v1531_v43 = vmul.f32 %v2599_v13, %v1530_v6  ;;  %v4352_v15 = vpop.eup %2614  ;;  %v1506_v28 = vsub.f32 1.5, %v1505_v52  ;;  %v4379_v0 = vpop.xlane.xlu2 %2022 }
 0x1ba   :  { %v1519_v31 = vmul.f32 %v2601_v47, %v1518_v54  ;;  %vm1511_vm10 = vcmp.eq.f32.partialorder %v4273_v35, 0.0  ;;  %v1512_v45 = vand.u32 2147483648, %v4273_v35  ;;  %v4357_v26 = vadd.f32 %v1698_v36, %v4008_v32 }
 0x1bb   :  { %v1623_v53 = vmax.f32 %v1425_v44, 0.006  ;;  %v1532_v23 = vmul.f32 %v1531_v43, %v4249_v40  ;;  %v1909_v12 = vmul.f32 0.5, %v1908_v9  ;;  %v1413_v16 = vsel %vm1411_vm4, %v1412_v20, %v1410_v48 }
 0x1bc   :  { %v1520_v13 = vmul.f32 %v1519_v31, %v4256_v49  ;;  %v1507_v51 = vmul.f32 %v2603_v61, %v1506_v28  ;;  %v1776_v47 = vmul.f32 %v4337_v30, %v1775_v19  ;;  %vm1913_vm0 = vcmp.eq.f32.partialorder %v4298_v17, inf }
 0x1bd   :  { %v1534_v50 = vsel %vm1533_vm5, %v4249_v40, %v1532_v23  ;;  %v1910_v58 = vsub.f32 1.5, %v1909_v12  ;;  %vm1915_vm11 = vcmp.eq.f32.partialorder %v4298_v17, 0.0  ;;  %v1763_v20 = vmul.f32 %v4352_v15, %v4315_v33 }
 0x1be   :  { %v1537_v32 = vsel %vm1535_vm6, %v1536_v5, %v1534_v50  ;;  %v1522_v2 = vsel %vm1521_vm7, %v4256_v49, %v1520_v13  ;;  %v1508_v61 = vmul.f32 %v1507_v51, %v4273_v35  ;;  %v1622_v29 = vmax.f32 %v1413_v16, 0.006  ;;  %v4400_v16 = vpop.xlane.xlu1 %2019 }
 0x1bf   :  { %v1653_v27 = vmax.f32 %v1537_v32, 0.006  ;;  %v1525_v6 = vsel %vm1523_vm8, %v1524_v34, %v1522_v2  ;;  %v1911_v52 = vmul.f32 %v2609_v14, %v1910_v58  ;;  %v1631_v40 = vmul.f32 %v1623_v53, %v3043_v10 }
 0x1c0   :  { %v1652_v5 = vmax.f32 %v1525_v6, 0.006  ;;  %v1510_v54 = vsel %vm1509_vm9, %v4273_v35, %v1508_v61  ;;  %v1777_v9 = vmul.f32 0.5, %v1776_v47  ;;  %v1916_v49 = vand.u32 2147483648, %v4298_v17 }
 0x1c1   :  { %v1661_v19 = vmul.f32 %v1653_v27, %v3053_v18  ;;  %v1513_v36 = vsel %vm1511_vm10, %v1512_v45, %v1510_v54  ;;  %v1912_v44 = vmul.f32 %v1911_v52, %v4298_v17  ;;  %v1764_v43 = vmul.f32 %v4352_v15, %v1763_v20 }
 0x1c2   :  { %v1660_v14 = vmul.f32 %v1652_v5, %v3030_v63  ;;  %v1651_v34 = vmax.f32 %v1513_v36, 0.006  ;;  %v1778_v48 = vsub.f32 1.5, %v1777_v9  ;;  %v1630_v31 = vmul.f32 %v1622_v29, %v3024_v41  ;;  %v4421_v29 = vpop.xlane.xlu2 %1889 }
 0x1c3   :  { %v1672_v28 = vmul.f32 1.442695, %v1661_v19  ;;  %v1914_v53 = vsel %vm1913_vm0, %v4298_v17, %v1912_v44  ;;  %2616 = vrsqrt.f32 %v4379_v0  ;;  %v1644_v35 = vmul.f32 1.442695, %v1631_v40  ;;  %v4409_v17 = vpop.xlane.xlu0 %1886 }
 0x1c4   :  { %v1670_v45 = vmul.f32 1.442695, %v1660_v14  ;;  %v1659_v23 = vmul.f32 %v1651_v34, %v3132_v59  ;;  %v1917_v12 = vsel %vm1915_vm11, %v1916_v49, %v1914_v53  ;;  %v1779_v51 = vmul.f32 %v4337_v30, %v1778_v48 }
 0x1c5   :  { %2618 = vpow2.f32 %v1672_v28  ;;  %v2170_v13 = vmax.f32 %v1917_v12, 0.006  ;;  %v1765_v47 = vmul.f32 0.5, %v1764_v43  ;;  %v4406_v58 = vmul.f32 %v1593_v56, %v3137_v62 }
 0x1c6   :  { %2620 = vpow2.f32 %v1670_v45  ;;  %v1668_v50 = vmul.f32 1.442695, %v1659_v23  ;;  %v1642_v32 = vmul.f32 1.442695, %v1630_v31  ;;  %v4414_v61 = vmul.f32 %v1592_v60, %v3164_v8  ;;  %v4443_v23 = vpop.xlane.xlu1 %1745 }
 0x1c7   :  { %v1766_v2 = vsub.f32 1.5, %v1765_v47  ;;  %2622 = vrsqrt.f32 %v4400_v16  ;;  %v2178_v30 = vmul.f32 %v2170_v13, %v3032_v3  ;;  %vm1781_vm12 = vcmp.eq.f32.partialorder %v4303_v38, inf }
 0x1c8   :  { %2624 = vpow2.f32 %v1668_v50  ;;  %v1780_v42 = vmul.f32 %v1779_v51, %v4303_v38  ;;  %vm1783_vm13 = vcmp.eq.f32.partialorder %v4303_v38, 0.0  ;;  %v1784_v27 = vand.u32 2147483648, %v4303_v38 }
 0x1c9   :  { %v2617_v20 = vpop.eup %2616  ;;  %2626 = vpow2.f32 %v1644_v35  ;;  %v1767_v56 = vmul.f32 %v4352_v15, %v1766_v2  ;;  %vm1769_vm14 = vcmp.eq.f32.partialorder %v4315_v33, inf  ;;  %vm1771_vm15 = vcmp.eq.f32.partialorder %v4315_v33, 0.0 }
 0x1ca   :  { %v2055_v25 = vmul.f32 %v2617_v20, %v4379_v0  ;;  %2628 = vrsqrt.f32 %v4409_v17  ;;  %v1772_v52 = vand.u32 2147483648, %v4315_v33  ;;  %v2186_v5 = vmul.f32 1.442695, %v2178_v30 }
 0x1cb   :  { %v2619_v60 = vpop.eup %2618  ;;  %2630 = vpow2.f32 %v1642_v32  ;;  %v1768_v6 = vmul.f32 %v1767_v56, %v4315_v33  ;;  %v1782_v36 = vsel %vm1781_vm12, %v4303_v38, %v1780_v42  ;;  %vm2061_vm1 = vcmp.eq.f32.partialorder %v4379_v0, inf }
 0x1cc   :  { %v2621_v40 = vpop.eup %2620  ;;  %v1693_v15 = vmul.f32 2.0, %v2619_v60  ;;  %v2056_v54 = vmul.f32 %v2617_v20, %v2055_v25  ;;  %2632 = vrsqrt.f32 %v4421_v29  ;;  %vm2063_vm2 = vcmp.eq.f32.partialorder %v4379_v0, 0.0 }
 0x1cd   :  { %v2623_v9 = vpop.eup %2622  ;;  %v1692_v19 = vmul.f32 2.0, %v2621_v40  ;;  %v1770_v44 = vsel %vm1769_vm14, %v4315_v33, %v1768_v6  ;;  %v2064_v43 = vand.u32 2147483648, %v4379_v0  ;;  %2634 = vpow2.f32 %v2186_v5  ;;  %v4470_v40 = vpop.xlane.xlu2 %1748 }
 0x1ce   :  { %v2625_v49 = vpop.eup %2624  ;;  %v1701_v14 = vsub.f32 %v4301_v4, %v1693_v15  ;;  %v1773_v34 = vsel %vm1771_vm15, %v1772_v52, %v1770_v44  ;;  %v2057_v48 = vmul.f32 0.5, %v2056_v54  ;;  %v2043_v45 = vmul.f32 %v2623_v9, %v4400_v16 }
 0x1cf   :  { %v2627_v31 = vpop.eup %2626  ;;  %v1700_v28 = vsub.f32 %v4310_v37, %v1692_v19  ;;  %v1691_v53 = vmul.f32 2.0, %v2625_v49  ;;  %v2138_v35 = vmax.f32 %v1773_v34, 0.006  ;;  %v1785_v4 = vsel %vm1783_vm13, %v1784_v27, %v1782_v36 }
 0x1d0   :  { %v2629_v33 = vpop.eup %2628  ;;  %v4446_v12 = vadd.f32 %v1701_v14, %v4065_v46  ;;  %v2058_v13 = vsub.f32 1.5, %v2057_v48  ;;  %v2044_v32 = vmul.f32 %v2623_v9, %v2043_v45  ;;  %vm2049_vm3 = vcmp.eq.f32.partialorder %v4400_v16, inf }
 0x1d1   :  { %v2631_v51 = vpop.eup %2630  ;;  %v4451_v47 = vadd.f32 %v1700_v28, %v4081_v11  ;;  %v1699_v37 = vsub.f32 %v4331_v55, %v1691_v53  ;;  %v2146_v50 = vmul.f32 %v2138_v35, %v3032_v3  ;;  %v1919_v46 = vmul.f32 %v2629_v33, %v4409_v17  ;;  %v4463_v55 = vpop.xlane.xlu0 %1479 }
 0x1d2   :  { %v2633_v2 = vpop.eup %2632  ;;  %v2059_v30 = vmul.f32 %v2617_v20, %v2058_v13  ;;  %2636 = vrsqrt.f32 %v4443_v23  ;;  %v2045_v56 = vmul.f32 0.5, %v2044_v32  ;;  %vm2051_vm4 = vcmp.eq.f32.partialorder %v4400_v16, 0.0 }
 0x1d3   :  { %v4459_v38 = vadd.f32 %v1699_v37, %v3974_v1  ;;  %v2154_v42 = vmul.f32 1.442695, %v2146_v50  ;;  %v1931_v11 = vmul.f32 %v2633_v2, %v4421_v29  ;;  %v2139_v27 = vmax.f32 %v1785_v4, 0.006  ;;  %v2635_v15 = vpop.eup %2634 }
 0x1d4   :  { %v2060_v20 = vmul.f32 %v2059_v30, %v4379_v0  ;;  %v2052_v25 = vand.u32 2147483648, %v4400_v16  ;;  %v1920_v60 = vmul.f32 %v2629_v33, %v1919_v46  ;;  %v2046_v6 = vsub.f32 1.5, %v2045_v56 }
 0x1d5   :  { %2638 = vpow2.f32 %v2154_v42  ;;  %v1932_v52 = vmul.f32 %v2633_v2, %v1931_v11  ;;  %v4468_v1 = vadd.f32 %v2631_v51, %v4320_v7  ;;  %vm1925_vm5 = vcmp.eq.f32.partialorder %v4409_v17, inf }
 0x1d6   :  { %v2062_v5 = vsel %vm2061_vm1, %v4379_v0, %v2060_v20  ;;  %v1921_v54 = vmul.f32 0.5, %v1920_v60  ;;  %2640 = vrsqrt.f32 %v4463_v55  ;;  %v2047_v36 = vmul.f32 %v2623_v9, %v2046_v6 }
 0x1d7   :  { %v2065_v19 = vsel %vm2063_vm2, %v2064_v43, %v2062_v5  ;;  %vm1927_vm6 = vcmp.eq.f32.partialorder %v4409_v17, 0.0  ;;  %v1933_v7 = vmul.f32 0.5, %v1932_v52  ;;  %v1928_v34 = vand.u32 2147483648, %v4409_v17 }
 0x1d8   :  { %v2637_v44 = vpop.eup %2636  ;;  %v2203_v49 = vmax.f32 %v2065_v19, 0.006  ;;  %v1922_v14 = vsub.f32 1.5, %v1921_v54  ;;  %2642 = vrsqrt.f32 %v4470_v40  ;;  %v2147_v48 = vmul.f32 %v2139_v27, %v3132_v59 }
 0x1d9   :  { %v2048_v28 = vmul.f32 %v2047_v36, %v4400_v16  ;;  %v1934_v53 = vsub.f32 1.5, %v1933_v7  ;;  %v1787_v35 = vmul.f32 %v2637_v44, %v4443_v23  ;;  %vm1937_vm7 = vcmp.eq.f32.partialorder %v4421_v29, inf }
 0x1da   :  { %v2211_v0 = vmul.f32 %v2203_v49, %v3132_v59  ;;  %v1923_v9 = vmul.f32 %v2629_v33, %v1922_v14  ;;  %vm1939_vm8 = vcmp.eq.f32.partialorder %v4421_v29, 0.0  ;;  %v4492_v51 = vadd.f32 %v2627_v31, %v4243_v22  ;;  %v4505_v31 = vpop.xlane.xlu1 %1482 }
 0x1db   :  { %v2639_v43 = vpop.eup %2638  ;;  %v2050_v45 = vsel %vm2049_vm3, %v4400_v16, %v2048_v28  ;;  %v1935_v4 = vmul.f32 %v2633_v2, %v1934_v53  ;;  %v1788_v13 = vmul.f32 %v2637_v44, %v1787_v35  ;;  %v2156_v27 = vmul.f32 1.442695, %v2147_v48 }
 0x1dc   :  { %v2641_v37 = vpop.eup %2640  ;;  %v2220_v50 = vmul.f32 1.442695, %v2211_v0  ;;  %v2053_v32 = vsel %vm2051_vm4, %v2052_v25, %v2050_v45  ;;  %v4496_v33 = vadd.f32 %v2639_v43, %v2635_v15  ;;  %v1924_v30 = vmul.f32 %v1923_v9, %v4409_v17 }
 0x1dd   :  { %v2202_v46 = vmax.f32 %v2053_v32, 0.006  ;;  %v1936_v42 = vmul.f32 %v1935_v4, %v4421_v29  ;;  %v1789_v56 = vmul.f32 0.5, %v1788_v13  ;;  %v1539_v11 = vmul.f32 %v2641_v37, %v4463_v55  ;;  %v4530_v4 = vpop.xlane.xlu2 %1349 }
 0x1de   :  { %v2643_v2 = vpop.eup %2642  ;;  %2644 = vpow2.f32 %v2220_v50  ;;  %v1926_v22 = vsel %vm1925_vm5, %v4409_v17, %v1924_v30  ;;  %v1940_v16 = vand.u32 2147483648, %v4421_v29  ;;  %vm1793_vm9 = vcmp.eq.f32.partialorder %v4443_v23, inf }
 0x1df   :  { %v2210_v20 = vmul.f32 %v2202_v46, %v3032_v3  ;;  %v1929_v25 = vsel %vm1927_vm6, %v1928_v34, %v1926_v22  ;;  %v1938_v60 = vsel %vm1937_vm7, %v4421_v29, %v1936_v42  ;;  %v1790_v6 = vsub.f32 1.5, %v1789_v56  ;;  %v4517_v3 = vpop.xlane.xlu0 %2025 }
 0x1e0   :  { %v2171_v52 = vmax.f32 %v1929_v25, 0.006  ;;  %v1941_v15 = vsel %vm1939_vm8, %v1940_v16, %v1938_v60  ;;  %v1540_v5 = vmul.f32 %v2641_v37, %v1539_v11  ;;  %v1799_v54 = vmul.f32 %v2643_v2, %v4470_v40 }
 0x1e1   :  { %v2218_v19 = vmul.f32 1.442695, %v2210_v20  ;;  %v2172_v36 = vmax.f32 %v1941_v15, 0.006  ;;  %v1791_v7 = vmul.f32 %v2637_v44, %v1790_v6  ;;  %2646 = vrsqrt.f32 %v4505_v31 }
 0x1e2   :  { %v2179_v17 = vmul.f32 %v2171_v52, %v3132_v59  ;;  %v1541_v49 = vmul.f32 0.5, %v1540_v5  ;;  %v1800_v14 = vmul.f32 %v2643_v2, %v1799_v54  ;;  %v1796_v48 = vand.u32 2147483648, %v4443_v23 }
 0x1e3   :  { %2648 = vpow2.f32 %v2218_v19  ;;  %v2180_v29 = vmul.f32 %v2172_v36, %v3030_v63  ;;  %v1792_v34 = vmul.f32 %v1791_v7, %v4443_v23  ;;  %v4526_v0 = vmul.f32 1.442695, %v4414_v61  ;;  %v4548_v19 = vpop.xlane.xlu1 %2028  ;;  %v41_v36 = vld [vmem:[%s4878_s3] sm:$0xf] }
 0x1e4   :  { %v2645_v28 = vpop.eup %2644  ;;  %v2188_v53 = vmul.f32 1.442695, %v2179_v17  ;;  %v1542_v44 = vsub.f32 1.5, %v1541_v49  ;;  %v1801_v35 = vmul.f32 0.5, %v1800_v14  ;;  %2650 = vrsqrt.f32 %v4517_v3 }
 0x1e5   :  { %2652 = vpow2.f32 %v2156_v27  ;;  %v1794_v59 = vsel %vm1793_vm9, %v4443_v23, %v1792_v34  ;;  %vm1795_vm10 = vcmp.eq.f32.partialorder %v4443_v23, 0.0  ;;  %vm2274_vm0 = vcmask 3072  }
 0x1e6   :  { %2654 = vpow2.f32 %v2188_v53  ;;  %v1797_v9 = vsel %vm1795_vm10, %v1796_v48, %v1794_v59  ;;  %v1543_v43 = vmul.f32 %v2641_v37, %v1542_v44  ;;  %v1802_v45 = vsub.f32 1.5, %v1801_v35  ;;  %v42_v44 = vld [vmem:[%s4878_s3 + $0x4] sm:$0xf] }
 0x1e7   :  { %v2647_v13 = vpop.eup %2646  ;;  %v2190_v50 = vmul.f32 1.442695, %v2180_v29  ;;  %v2140_v32 = vmax.f32 %v1797_v9, 0.006  ;;  %vm1545_vm11 = vcmp.eq.f32.partialorder %v4463_v55, inf  ;;  %vm1547_vm12 = vcmp.eq.f32.partialorder %v4463_v55, 0.0 }
 0x1e8   :  { %v1544_v61 = vmul.f32 %v1543_v43, %v4463_v55  ;;  %v1548_v30 = vand.u32 2147483648, %v4463_v55  ;;  %vm1805_vm13 = vcmp.eq.f32.partialorder %v4470_v40, inf  ;;  %v1551_v23 = vmul.f32 %v2647_v13, %v4505_v31 }
 0x1e9   :  { %v2649_v37 = vpop.eup %2648  ;;  %v2148_v46 = vmul.f32 %v2140_v32, %v3030_v63  ;;  %v1803_v42 = vmul.f32 %v2643_v2, %v1802_v45  ;;  %v1808_v56 = vand.u32 2147483648, %v4470_v40  ;;  %2656 = vrsqrt.f32 %v4530_v4 }
 0x1ea   :  { %v2651_v11 = vpop.eup %2650  ;;  %v2243_v27 = vmul.f32 2.0, %v2645_v28  ;;  %v2242_v22 = vmul.f32 2.0, %v2649_v37  ;;  %v1546_v16 = vsel %vm1545_vm11, %v4463_v55, %v1544_v61  ;;  %v1552_v20 = vmul.f32 %v2647_v13, %v1551_v23 }
 0x1eb   :  { %v2653_v25 = vpop.eup %2652  ;;  %2658 = vpow2.f32 %v2190_v50  ;;  %v2158_v60 = vmul.f32 1.442695, %v2148_v46  ;;  %v1549_v6 = vsel %vm1547_vm12, %v1548_v30, %v1546_v16  ;;  %vm1807_vm14 = vcmp.eq.f32.partialorder %v4470_v40, 0.0  ;;  %v4579_v16 = vpop.xlane.xlu0 %1892 }
 0x1ec   :  { %v2067_v2 = vmul.f32 %v2651_v11, %v4517_v3  ;;  %v2655_v52 = vpop.eup %2654  ;;  %v2250_v15 = vsub.f32 %v4496_v33, %v2242_v22  ;;  %v1654_v5 = vmax.f32 %v1549_v6, 0.006  ;;  %v1553_v54 = vmul.f32 0.5, %v1552_v20 }
 0x1ed   :  { %vm1557_vm15 = vcmp.eq.f32.partialorder %v4505_v31, inf  ;;  %v2235_v7 = vadd.f32 %v2655_v52, %v2653_v25  ;;  %2660 = vpow2.f32 %v2158_v60  ;;  %v1804_v55 = vmul.f32 %v1803_v42, %v4470_v40 }
 0x1ee   :  { %v2068_v17 = vmul.f32 %v2651_v11, %v2067_v2  ;;  %v2258_v49 = vadd.f32 %v2250_v15, %v4357_v26  ;;  %v1662_v14 = vmul.f32 %v1654_v5, %v3024_v41  ;;  %v1554_v33 = vsub.f32 1.5, %v1553_v54 }
 0x1ef   :  { %vm1559_vm1 = vcmp.eq.f32.partialorder %v4505_v31, 0.0  ;;  %v2657_v29 = vpop.eup %2656  ;;  %v2251_v34 = vsub.f32 %v2235_v7, %v2243_v27  ;;  %v1560_v48 = vand.u32 2147483648, %v4505_v31  ;;  %2662 = vrsqrt.f32 %v4548_v19 }
 0x1f0   :  { %v2069_v28 = vmul.f32 0.5, %v2068_v17  ;;  %v2266_v53 = vmul.f32 %v2258_v49, %v41_v36  ;;  %v1674_v35 = vmul.f32 1.442695, %v1662_v14  ;;  %v1555_v59 = vmul.f32 %v2647_v13, %v1554_v33 }
 0x1f1   :  { %vm2073_vm2 = vcmp.eq.f32.partialorder %v4517_v3, inf  ;;  %v2659_v26 = vpop.eup %2658  ;;  %v2259_v9 = vadd.f32 %v2251_v34, %v4459_v38  ;;  %v1806_v43 = vsel %vm1805_vm13, %v4470_v40, %v1804_v55  ;;  %v1427_v50 = vmul.f32 %v2657_v29, %v4530_v4 }
 0x1f2   :  { %v2070_v45 = vsub.f32 1.5, %v2069_v28  ;;  %v2275_v32 = vsel %vm2274_vm0, %v2266_v53, 0.0  ;;  %2664 = vpow2.f32 %v1674_v35  ;;  %v1556_v61 = vmul.f32 %v1555_v59, %v4505_v31 }
 0x1f3   :  { %vm2075_vm3 = vcmp.eq.f32.partialorder %v4517_v3, 0.0  ;;  %v2661_v13 = vpop.eup %2660  ;;  %v2276_v30 = vrot.slane %v2275_v32, 4  ;;  %v2267_v23 = vmul.f32 %v2259_v9, %v42_v44  ;;  %v1428_v46 = vmul.f32 %v2657_v29, %v1427_v50  ;;  %v4594_v44 = vpop.xlane.xlu2 %1895 }
 0x1f4   :  { %v2071_v37 = vmul.f32 %v2651_v11, %v2070_v45  ;;  %v1809_v38 = vsel %vm1807_vm14, %v1808_v56, %v1806_v43  ;;  %v1558_v42 = vsel %vm1557_vm15, %v4505_v31, %v1556_v61  ;;  %v4576_v27 = vadd.f32 %v2661_v13, %v2659_v26 }
 0x1f5   :  { %v2076_v22 = vand.u32 2147483648, %v4517_v3  ;;  %v2663_v20 = vpop.eup %2662  ;;  %v2277_v25 = vadd.f32 %v2276_v30, %v2275_v32  ;;  %v2282_v60 = vsel %vm2274_vm0, %v2267_v23, 0.0  ;;  %v1561_v11 = vsel %vm1559_vm1, %v1560_v48, %v1558_v42  ;;  %v4612_v42 = vpop.xlane.xlu0 %1485 }
 0x1f6   :  { %v2072_v40 = vmul.f32 %v2071_v37, %v4517_v3  ;;  %v2283_v56 = vrot.slane %v2282_v60, 4  ;;  %v1655_v6 = vmax.f32 %v1561_v11, 0.006  ;;  %v1429_v2 = vmul.f32 0.5, %v1428_v46 }
 0x1f7   :  { %v2079_v52 = vmul.f32 %v2663_v20, %v4548_v19  ;;  %v2278_v15 = vrot.slane %v2277_v25, 2  ;;  %v2141_v5 = vmax.f32 %v1809_v38, 0.006  ;;  %2666 = vrsqrt.f32 %v4579_v16 }
 0x1f8   :  { %v2074_v54 = vsel %vm2073_vm2, %v4517_v3, %v2072_v40  ;;  %v2665_v36 = vpop.eup %2664  ;;  %v2284_v7 = vadd.f32 %v2283_v56, %v2282_v60  ;;  %v1663_v31 = vmul.f32 %v1655_v6, %v3043_v10  ;;  %v1430_v17 = vsub.f32 1.5, %v1429_v2 }
 0x1f9   :  { %v2077_v55 = vsel %vm2075_vm3, %v2076_v22, %v2074_v54  ;;  %v2279_v49 = vadd.f32 %v2278_v15, %v2277_v25  ;;  %v1694_v14 = vmul.f32 2.0, %v2665_v36  ;;  %v2080_v34 = vmul.f32 %v2663_v20, %v2079_v52 }
 0x1fa   :  { %v2204_v33 = vmax.f32 %v2077_v55, 0.006  ;;  %2668 = vpow2.f32 %v4526_v0  ;;  %v2285_v48 = vrot.slane %v2284_v7, 2  ;;  %v1676_v28 = vmul.f32 1.442695, %v1663_v31 }
 0x1fb   :  { %v1431_v53 = vmul.f32 %v2657_v29, %v1430_v17  ;;  %v2280_v35 = vrot.slane %v2279_v49, 1  ;;  %v1702_v59 = vsub.f32 %v4468_v1, %v1694_v14  ;;  %v2081_v9 = vmul.f32 0.5, %v2080_v34  ;;  %v4628_v54 = vpop.xlane.xlu2 %1488 }
 0x1fc   :  { %v2212_v26 = vmul.f32 %v2204_v33, %v3030_v63  ;;  %v2286_v3 = vadd.f32 %v2285_v48, %v2284_v7  ;;  %v2149_v43 = vmul.f32 %v2141_v5, %v3053_v18  ;;  %2670 = vpow2.f32 %v1676_v28  ;;  %v4605_v63 = vpop.xlane.xlu1 %1751 }
 0x1fd   :  { %v1432_v45 = vmul.f32 %v1431_v53, %v4530_v4  ;;  %v2667_v50 = vpop.eup %2666  ;;  %v4601_v0 = vadd.f32 %v1702_v59, %v4034_v57  ;;  %vm2339_vm4 = vcmask 1041409   ;;  %v2082_v32 = vsub.f32 1.5, %v2081_v9 }
 0x1fe   :  { %v2222_v29 = vmul.f32 1.442695, %v2212_v26  ;;  %v2281_v61 = vadd.f32 %v2280_v35, %v2279_v49  ;;  %v2287_v13 = vrot.slane %v2286_v3, 1  ;;  %v1943_v1 = vmul.f32 %v2667_v50, %v4579_v16 }
 0x1ff   :  { %2672 = vrsqrt.f32 %v4594_v44  ;;  %vm1433_vm5 = vcmp.eq.f32.partialorder %v4530_v4, inf  ;;  %vm1435_vm6 = vcmp.eq.f32.partialorder %v4530_v4, 0.0  ;;  %v2083_v30 = vmul.f32 %v2663_v20, %v2082_v32 }
 0x200   :  { %2674 = vpow2.f32 %v2222_v29  ;;  %v4609_v23 = vpop.eup %2668  ;;  %v2288_v57 = vadd.f32 %v2287_v13, %v2286_v3  ;;  %v2160_v37 = vmul.f32 1.442695, %v2149_v43  ;;  %v1434_v46 = vsel %vm1433_vm5, %v4530_v4, %v1432_v45 }
 0x201   :  { %v1944_v38 = vmul.f32 %v2667_v50, %v1943_v1  ;;  %v1436_v22 = vand.u32 2147483648, %v4530_v4  ;;  %v2084_v25 = vmul.f32 %v2083_v30, %v4548_v19  ;;  %vm2085_vm7 = vcmp.eq.f32.partialorder %v4548_v19, inf }
 0x202   :  { %2676 = vrsqrt.f32 %v4605_v63  ;;  %v2671_v60 = vpop.eup %2670  ;;  %v4619_v20 = vsel %vm2339_vm4, %v2288_v57, %v2281_v61  ;;  %vm2087_vm8 = vcmp.eq.f32.partialorder %v4548_v19, 0.0  ;;  %v2088_v11 = vand.u32 2147483648, %v4548_v19 }
 0x203   :  { %v1945_v40 = vmul.f32 0.5, %v1944_v38  ;;  %v1695_v56 = vmul.f32 2.0, %v2671_v60  ;;  %v1437_v6 = vsel %vm1435_vm6, %v1436_v22, %v1434_v46  ;;  %v2086_v2 = vsel %vm2085_vm7, %v4548_v19, %v2084_v25  ;;  %v4664_v22 = vpop.xlane.xlu0 %2031 }
 0x204   :  { %2678 = vrsqrt.f32 %v4612_v42  ;;  %v2089_v15 = vsel %vm2087_vm8, %v2088_v11, %v2086_v2  ;;  %vm1949_vm9 = vcmp.eq.f32.partialorder %v4579_v16, inf  ;;  %vm1951_vm10 = vcmp.eq.f32.partialorder %v4579_v16, 0.0  ;;  %v4655_v29 = vpop.xlane.xlu1 %1352 }
 0x205   :  { %v2673_v52 = vpop.eup %2672  ;;  %2680 = vpow2.f32 %v2160_v37  ;;  %v1946_v5 = vsub.f32 1.5, %v1945_v40  ;;  %v1703_v7 = vsub.f32 %v4492_v51, %v1695_v56  ;;  %v2205_v31 = vmax.f32 %v2089_v15, 0.006  ;;  %v43_v51 = vld [vmem:[%s4878_s3 + $0x8] sm:$0xf] }
 0x206   :  { %v2675_v36 = vpop.eup %2674  ;;  %v1955_v4 = vmul.f32 %v2673_v52, %v4594_v44  ;;  %v1624_v19 = vmax.f32 %v1437_v6, 0.006  ;;  %v1952_v49 = vand.u32 2147483648, %v4579_v16  ;;  %2682 = vrsqrt.f32 %v4628_v54 }
 0x207   :  { %v2244_v55 = vmul.f32 2.0, %v2675_v36  ;;  %v1947_v17 = vmul.f32 %v2667_v50, %v1946_v5  ;;  %v4635_v33 = vadd.f32 %v1703_v7, %v4141_v39  ;;  %v2213_v34 = vmul.f32 %v2205_v31, %v3053_v18 }
 0x208   :  { %v2677_v14 = vpop.eup %2676  ;;  %v1956_v48 = vmul.f32 %v2673_v52, %v1955_v4  ;;  %vm1961_vm11 = vcmp.eq.f32.partialorder %v4594_v44, inf  ;;  %vm1963_vm12 = vcmp.eq.f32.partialorder %v4594_v44, 0.0  ;;  %v1964_v9 = vand.u32 2147483648, %v4594_v44 }
 0x209   :  { %v2252_v28 = vsub.f32 %v4576_v27, %v2244_v55  ;;  %v1948_v53 = vmul.f32 %v1947_v17, %v4579_v16  ;;  %v1811_v35 = vmul.f32 %v2677_v14, %v4605_v63  ;;  %v2224_v39 = vmul.f32 1.442695, %v2213_v34 }
 0x20a   :  { %v2679_v59 = vpop.eup %2678  ;;  %v1957_v26 = vmul.f32 0.5, %v1956_v48  ;;  %v1632_v32 = vmul.f32 %v1624_v19, %v3164_v8  ;;  %vm1817_vm13 = vcmp.eq.f32.partialorder %v4605_v63, inf  ;;  %vm1819_vm14 = vcmp.eq.f32.partialorder %v4605_v63, 0.0 }
 0x20b   :  { %v4648_v3 = vpop.eup %2680  ;;  %v2260_v43 = vadd.f32 %v2252_v28, %v4451_v47  ;;  %v1950_v27 = vsel %vm1949_vm9, %v4579_v16, %v1948_v53  ;;  %v1812_v45 = vmul.f32 %v2677_v14, %v1811_v35  ;;  %v1563_v50 = vmul.f32 %v2679_v59, %v4612_v42 }
 0x20c   :  { %2684 = vpow2.f32 %v2224_v39  ;;  %v1953_v61 = vsel %vm1951_vm10, %v1952_v49, %v1950_v27  ;;  %v1958_v13 = vsub.f32 1.5, %v1957_v26  ;;  %v2683_v37 = vpop.eup %2682  ;;  %v1820_v38 = vand.u32 2147483648, %v4605_v63 }
 0x20d   :  { %v2268_v1 = vmul.f32 %v2260_v43, %v43_v51  ;;  %v2173_v47 = vmax.f32 %v1953_v61, 0.006  ;;  %v1813_v30 = vmul.f32 0.5, %v1812_v45  ;;  %v1564_v57 = vmul.f32 %v2679_v59, %v1563_v50 }
 0x20e   :  { %v1959_v46 = vmul.f32 %v2673_v52, %v1958_v13  ;;  %2686 = vrsqrt.f32 %v4655_v29  ;;  %v1646_v56 = vmul.f32 1.442695, %v1632_v32  ;;  %v1575_v2 = vmul.f32 %v2683_v37, %v4628_v54 }
 0x20f   :  { %v2289_v16 = vsel %vm2274_vm0, %v2268_v1, 0.0  ;;  %v2181_v25 = vmul.f32 %v2173_v47, %v3053_v18  ;;  %v1814_v60 = vsub.f32 1.5, %v1813_v30  ;;  %v1565_v11 = vmul.f32 0.5, %v1564_v57 }
 0x210   :  { %v2290_v40 = vrot.slane %v2289_v16, 4  ;;  %v1960_v6 = vmul.f32 %v1959_v46, %v4594_v44  ;;  %vm2341_vm15 = vcmask 1042434   ;;  %2688 = vrsqrt.f32 %v4664_v22 }
 0x211   :  { %v2192_v52 = vmul.f32 1.442695, %v2181_v25  ;;  %v1815_v15 = vmul.f32 %v2677_v14, %v1814_v60  ;;  %v1566_v5 = vsub.f32 1.5, %v1565_v11  ;;  %vm1569_vm1 = vcmp.eq.f32.partialorder %v4612_v42, inf }
 0x212   :  { %v2685_v36 = vpop.eup %2684  ;;  %v2291_v7 = vadd.f32 %v2290_v40, %v2289_v16  ;;  %v1962_v18 = vsel %vm1961_vm11, %v4594_v44, %v1960_v6  ;;  %v1576_v31 = vmul.f32 %v2683_v37, %v1575_v2  ;;  %vm1571_vm2 = vcmp.eq.f32.partialorder %v4612_v42, 0.0  ;;  %v4700_v40 = vpop.xlane.xlu2 %2034 }
 0x213   :  { %2690 = vpow2.f32 %v2192_v52  ;;  %v1965_v4 = vsel %vm1963_vm12, %v1964_v9, %v1962_v18  ;;  %v1816_v55 = vmul.f32 %v1815_v15, %v4605_v63  ;;  %v1567_v49 = vmul.f32 %v2679_v59, %v1566_v5 }
 0x214   :  { %v2687_v19 = vpop.eup %2686  ;;  %v2292_v17 = vrot.slane %v2291_v7, 2  ;;  %2692 = vpow2.f32 %v1646_v56  ;;  %v1577_v14 = vmul.f32 0.5, %v1576_v31  ;;  %v2174_v34 = vmax.f32 %v1965_v4, 0.006 }
 0x215   :  { %v1818_v48 = vsel %vm1817_vm13, %v4605_v63, %v1816_v55  ;;  %v1572_v51 = vand.u32 2147483648, %v4612_v42  ;;  %v1439_v28 = vmul.f32 %v2687_v19, %v4655_v29  ;;  %v1568_v35 = vmul.f32 %v1567_v49, %v4612_v42 }
 0x216   :  { %v2293_v44 = vadd.f32 %v2292_v17, %v2291_v7  ;;  %v1821_v53 = vsel %vm1819_vm14, %v1820_v38, %v1818_v48  ;;  %vm1581_vm3 = vcmp.eq.f32.partialorder %v4628_v54, inf  ;;  %v2689_v39 = vpop.eup %2688  ;;  %v1578_v26 = vsub.f32 1.5, %v1577_v14  ;;  %v4718_v7 = vpop.xlane.xlu1 %1898 }
 0x217   :  { %v2142_v59 = vmax.f32 %v1821_v53, 0.006  ;;  %vm1583_vm4 = vcmp.eq.f32.partialorder %v4628_v54, 0.0  ;;  %v1440_v9 = vmul.f32 %v2687_v19, %v1439_v28  ;;  %v2245_v27 = vmul.f32 2.0, %v2685_v36  ;;  %v4728_v14 = vpop.xlane.xlu0 %1754 }
 0x218   :  { %v2294_v43 = vrot.slane %v2293_v44, 1  ;;  %v1570_v45 = vsel %vm1569_vm1, %v4612_v42, %v1568_v35  ;;  %v2091_v50 = vmul.f32 %v2689_v39, %v4664_v22  ;;  %v2182_v32 = vmul.f32 %v2174_v34, %v3024_v41 }
 0x219   :  { %v2691_v63 = vpop.eup %2690  ;;  %v1573_v61 = vsel %vm1571_vm2, %v1572_v51, %v1570_v45  ;;  %v1579_v13 = vmul.f32 %v2683_v37, %v1578_v26  ;;  %v1441_v1 = vmul.f32 0.5, %v1440_v9  ;;  %v1584_v38 = vand.u32 2147483648, %v4628_v54 }
 0x21a   :  { %v2693_v47 = vpop.eup %2692  ;;  %v2295_v30 = vadd.f32 %v2294_v43, %v2293_v44  ;;  %v2237_v57 = vadd.f32 %v2691_v63, %v4648_v3  ;;  %v1656_v46 = vmax.f32 %v1573_v61, 0.006  ;;  %v2150_v16 = vmul.f32 %v2142_v59, %v3024_v41  ;;  %v44_v3 = vld [vmem:[%s4878_s3 + $0xc] sm:$0xf]  ;;  %v4739_v9 = vpop.xlane.xlu2 %2037 }
 0x21b   :  { %v1580_v25 = vmul.f32 %v1579_v13, %v4628_v54  ;;  %v1442_v60 = vsub.f32 1.5, %v1441_v1  ;;  %v2092_v11 = vmul.f32 %v2689_v39, %v2091_v50  ;;  %vm1445_vm5 = vcmp.eq.f32.partialorder %v4655_v29, inf }
 0x21c   :  { %v4704_v42 = vsel %vm2341_vm15, %v2295_v30, %v4619_v20  ;;  %v2253_v37 = vsub.f32 %v2237_v57, %v2245_v27  ;;  %v1664_v56 = vmul.f32 %v1656_v46, %v3164_v8  ;;  %v2194_v6 = vmul.f32 1.442695, %v2182_v32 }
 0x21d   :  { %v1582_v2 = vsel %vm1581_vm3, %v4628_v54, %v1580_v25  ;;  %v1443_v52 = vmul.f32 %v2687_v19, %v1442_v60  ;;  %v2093_v15 = vmul.f32 0.5, %v2092_v11  ;;  %2694 = vrsqrt.f32 %v4700_v40 }
 0x21e   :  { %v2261_v5 = vadd.f32 %v2253_v37, %v4446_v12  ;;  %v1678_v20 = vmul.f32 1.442695, %v1664_v56  ;;  %v1585_v36 = vsel %vm1583_vm4, %v1584_v38, %v1582_v2  ;;  %v2162_v18 = vmul.f32 1.442695, %v2150_v16  ;;  %v4753_v2 = vpop.xlane.xlu1 %1901 }
 0x21f   :  { %v1657_v31 = vmax.f32 %v1585_v36, 0.006  ;;  %v1444_v4 = vmul.f32 %v1443_v52, %v4655_v29  ;;  %v2094_v55 = vsub.f32 1.5, %v2093_v15  ;;  %vm1447_vm6 = vcmp.eq.f32.partialorder %v4655_v29, 0.0  ;;  %v4757_v36 = vpop.xlane.xlu0 %1757 }
 0x220   :  { %v2269_v17 = vmul.f32 %v2261_v5, %v44_v3  ;;  %2696 = vpow2.f32 %v1678_v20  ;;  %v1448_v19 = vand.u32 2147483648, %v4655_v29  ;;  %v1616_v34 = vmul.f32 1.442695, %v4406_v58 }
 0x221   :  { %v1665_v12 = vmul.f32 %v1657_v31, %v3137_v62  ;;  %v1446_v54 = vsel %vm1445_vm5, %v4655_v29, %v1444_v4  ;;  %v2095_v49 = vmul.f32 %v2689_v39, %v2094_v55  ;;  %2698 = vrsqrt.f32 %v4718_v7 }
 0x222   :  { %v2296_v48 = vsel %vm2274_vm0, %v2269_v17, 0.0  ;;  %2700 = vpow2.f32 %v2194_v6  ;;  %v1449_v51 = vsel %vm1447_vm6, %v1448_v19, %v1446_v54  ;;  %vm2097_vm7 = vcmp.eq.f32.partialorder %v4664_v22, inf }
 0x223   :  { %v2297_v28 = vrot.slane %v2296_v48, 4  ;;  %2702 = vpow2.f32 %v2162_v18  ;;  %v1625_v44 = vmax.f32 %v1449_v51, 0.006  ;;  %v2096_v53 = vmul.f32 %v2095_v49, %v4664_v22  ;;  %v2695_v35 = vpop.eup %2694 }
 0x224   :  { %vm2099_vm8 = vcmp.eq.f32.partialorder %v4664_v22, 0.0  ;;  %v2100_v29 = vand.u32 2147483648, %v4664_v22  ;;  %2704 = vrsqrt.f32 %v4728_v14  ;;  %v1680_v58 = vmul.f32 1.442695, %v1665_v12 }
 0x225   :  { %v2298_v39 = vadd.f32 %v2297_v28, %v2296_v48  ;;  %v1633_v59 = vmul.f32 %v1625_v44, %v3137_v62  ;;  %v2098_v26 = vsel %vm2097_vm7, %v4664_v22, %v2096_v53  ;;  %2706 = vpow2.f32 %v1616_v34  ;;  %v4769_v48 = vpop.xlane.xlu2 %2040 }
 0x226   :  { %v2697_v43 = vpop.eup %2696  ;;  %v1688_v27 = vadd.f32 %v2693_v47, %v4609_v23  ;;  %v2101_v45 = vsel %vm2099_vm8, %v2100_v29, %v2098_v26  ;;  %v2103_v50 = vmul.f32 %v2695_v35, %v4700_v40  ;;  %vm2343_vm9 = vcmask 1043459  }
 0x227   :  { %v2699_v63 = vpop.eup %2698  ;;  %v2299_v32 = vrot.slane %v2298_v39, 2  ;;  %v1696_v61 = vmul.f32 2.0, %v2697_v43  ;;  %v2206_v13 = vmax.f32 %v2101_v45, 0.006  ;;  %v1648_v30 = vmul.f32 1.442695, %v1633_v59 }
 0x228   :  { %v2701_v1 = vpop.eup %2700  ;;  %v2104_v57 = vmul.f32 %v2695_v35, %v2103_v50  ;;  %v1967_v46 = vmul.f32 %v2699_v63, %v4718_v7  ;;  %2708 = vrsqrt.f32 %v4739_v9  ;;  %vm2109_vm10 = vcmp.eq.f32.partialorder %v4700_v40, inf }
 0x229   :  { %v2703_v22 = vpop.eup %2702  ;;  %v2300_v38 = vadd.f32 %v2299_v32, %v2298_v39  ;;  %v1704_v16 = vsub.f32 %v1688_v27, %v1696_v61  ;;  %2710 = vpow2.f32 %v1680_v58  ;;  %v2214_v23 = vmul.f32 %v2206_v13, %v3024_v41 }
 0x22a   :  { %v2705_v47 = vpop.eup %2704  ;;  %v2105_v25 = vmul.f32 0.5, %v2104_v57  ;;  %vm2111_vm11 = vcmp.eq.f32.partialorder %v4700_v40, 0.0  ;;  %v2112_v60 = vand.u32 2147483648, %v4700_v40  ;;  %v1968_v11 = vmul.f32 %v2699_v63, %v1967_v46 }
 0x22b   :  { %v2301_v37 = vrot.slane %v2300_v38, 1  ;;  %v4750_v56 = vadd.f32 %v1704_v16, %v4125_v24  ;;  %v2226_v3 = vmul.f32 1.442695, %v2214_v23  ;;  %v1823_v6 = vmul.f32 %v2705_v47, %v4728_v14  ;;  %v2707_v52 = vpop.eup %2706 }
 0x22c   :  { %2712 = vpow2.f32 %v1648_v30  ;;  %v2106_v41 = vsub.f32 1.5, %v2105_v25  ;;  %v1969_v15 = vmul.f32 0.5, %v1968_v11  ;;  %vm1973_vm12 = vcmp.eq.f32.partialorder %v4718_v7, inf }
 0x22d   :  { %v2302_v5 = vadd.f32 %v2301_v37, %v2300_v38  ;;  %2714 = vpow2.f32 %v2226_v3  ;;  %vm1975_vm13 = vcmp.eq.f32.partialorder %v4718_v7, 0.0  ;;  %v1824_v20 = vmul.f32 %v2705_v47, %v1823_v6  ;;  %v45_v38 = vld [vmem:[%s4878_s3 + $0x10] sm:$0xf] }
 0x22e   :  { %v2709_v24 = vpop.eup %2708  ;;  %v2238_v18 = vadd.f32 %v2703_v22, %v2701_v1  ;;  %v2107_v31 = vmul.f32 %v2695_v35, %v2106_v41  ;;  %v1970_v4 = vsub.f32 1.5, %v1969_v15  ;;  %2716 = vrsqrt.f32 %v4753_v2 }
 0x22f   :  { %v2711_v55 = vpop.eup %2710  ;;  %v4762_v17 = vsel %vm2343_vm9, %v2302_v5, %v4704_v42  ;;  %v1976_v19 = vand.u32 2147483648, %v4718_v7  ;;  %v1825_v12 = vmul.f32 0.5, %v1824_v20  ;;  %v2115_v54 = vmul.f32 %v2709_v24, %v4739_v9 }
 0x230   :  { %v2108_v49 = vmul.f32 %v2107_v31, %v4700_v40  ;;  %v1971_v34 = vmul.f32 %v2699_v63, %v1970_v4  ;;  %vm1829_vm14 = vcmp.eq.f32.partialorder %v4728_v14, inf  ;;  %2718 = vrsqrt.f32 %v4757_v36  ;;  %v4810_v4 = vpop.xlane.xlu1 %1904 }
 0x231   :  { %v1826_v51 = vsub.f32 1.5, %v1825_v12  ;;  %vm1831_vm15 = vcmp.eq.f32.partialorder %v4728_v14, 0.0  ;;  %v1832_v42 = vand.u32 2147483648, %v4728_v14  ;;  %v2116_v28 = vmul.f32 %v2709_v24, %v2115_v54 }
 0x232   :  { %v2713_v44 = vpop.eup %2712  ;;  %v4773_v53 = vmul.f32 2.0, %v2711_v55  ;;  %v2110_v35 = vsel %vm2109_vm10, %v4700_v40, %v2108_v49  ;;  %v1972_v29 = vmul.f32 %v1971_v34, %v4718_v7  ;;  %vm2121_vm1 = vcmp.eq.f32.partialorder %v4739_v9, inf }
 0x233   :  { %v2715_v39 = vpop.eup %2714  ;;  %v2113_v58 = vsel %vm2111_vm11, %v2112_v60, %v2110_v35  ;;  %v1827_v59 = vmul.f32 %v2705_v47, %v1826_v51  ;;  %v2117_v26 = vmul.f32 0.5, %v2116_v28  ;;  %vm2123_vm2 = vcmp.eq.f32.partialorder %v4739_v9, 0.0 }
 0x234   :  { %2720 = vrsqrt.f32 %v4769_v48  ;;  %v2717_v43 = vpop.eup %2716  ;;  %v2246_v27 = vmul.f32 2.0, %v2715_v39  ;;  %v2207_v45 = vmax.f32 %v2113_v58, 0.006  ;;  %v1974_v50 = vsel %vm1973_vm12, %v4718_v7, %v1972_v29 }
 0x235   :  { %v2124_v63 = vand.u32 2147483648, %v4739_v9  ;;  %v1977_v32 = vsel %vm1975_vm13, %v1976_v19, %v1974_v50  ;;  %v1828_v40 = vmul.f32 %v1827_v59, %v4728_v14  ;;  %v2118_v61 = vsub.f32 1.5, %v2117_v26 }
 0x236   :  { %v1979_v13 = vmul.f32 %v2717_v43, %v4753_v2  ;;  %v2719_v1 = vpop.eup %2718  ;;  %v1689_v30 = vadd.f32 %v2713_v44, %v2707_v52  ;;  %v2254_v57 = vsub.f32 %v2238_v18, %v2246_v27  ;;  %v2215_v46 = vmul.f32 %v2207_v45, %v3043_v10  ;;  %v4824_v27 = vpop.xlane.xlu0 %1760 }
 0x237   :  { %v2175_v22 = vmax.f32 %v1977_v32, 0.006  ;;  %v1830_v7 = vsel %vm1829_vm14, %v4728_v14, %v1828_v40  ;;  %v2119_v16 = vmul.f32 %v2709_v24, %v2118_v61  ;;  %v1835_v47 = vmul.f32 %v2719_v1, %v4757_v36 }
 0x238   :  { %v1980_v23 = vmul.f32 %v2717_v43, %v1979_v13  ;;  %v2262_v25 = vadd.f32 %v2254_v57, %v4601_v0  ;;  %v2228_v60 = vmul.f32 1.442695, %v2215_v46  ;;  %v1833_v37 = vsel %vm1831_vm15, %v1832_v42, %v1830_v7 }
 0x239   :  { %v2183_v11 = vmul.f32 %v2175_v22, %v3043_v10  ;;  %v2143_v6 = vmax.f32 %v1833_v37, 0.006  ;;  %v2120_v52 = vmul.f32 %v2119_v16, %v4739_v9  ;;  %v1836_v15 = vmul.f32 %v2719_v1, %v1835_v47 }
 0x23a   :  { %v2721_v3 = vpop.eup %2720  ;;  %v1981_v41 = vmul.f32 0.5, %v1980_v23  ;;  %v2270_v5 = vmul.f32 %v2262_v25, %v45_v38  ;;  %2722 = vpow2.f32 %v2228_v60  ;;  %vm1985_vm3 = vcmp.eq.f32.partialorder %v4753_v2, inf }
 0x23b   :  { %v2196_v20 = vmul.f32 1.442695, %v2183_v11  ;;  %v2127_v24 = vmul.f32 %v2721_v3, %v4769_v48  ;;  %v2151_v18 = vmul.f32 %v2143_v6, %v3043_v10  ;;  %v2122_v0 = vsel %vm2121_vm1, %v4739_v9, %v2120_v52  ;;  %v46_v6 = vld [vmem:[%s4878_s3 + $0x14] sm:$0xf] }
 0x23c   :  { %v1982_v31 = vsub.f32 1.5, %v1981_v41  ;;  %v1837_v14 = vmul.f32 0.5, %v1836_v15  ;;  %v2303_v55 = vsel %vm2274_vm0, %v2270_v5, 0.0  ;;  %v2125_v19 = vsel %vm2123_vm2, %v2124_v63, %v2122_v0 }
 0x23d   :  { %2724 = vpow2.f32 %v2196_v20  ;;  %v2128_v12 = vmul.f32 %v2721_v3, %v2127_v24  ;;  %v2304_v54 = vrot.slane %v2303_v55, 4  ;;  %v2164_v49 = vmul.f32 1.442695, %v2151_v18 }
 0x23e   :  { %v2208_v34 = vmax.f32 %v2125_v19, 0.006  ;;  %v1983_v51 = vmul.f32 %v2717_v43, %v1982_v31  ;;  %v1838_v10 = vsub.f32 1.5, %v1837_v14  ;;  %2726 = vrsqrt.f32 %v4810_v4 }
 0x23f   :  { %v2129_v42 = vmul.f32 0.5, %v2128_v12  ;;  %v1705_v28 = vsub.f32 %v1689_v30, %v4773_v53  ;;  %v2305_v44 = vadd.f32 %v2304_v54, %v2303_v55  ;;  %2728 = vpow2.f32 %v2164_v49 }
 0x240   :  { %v1984_v35 = vmul.f32 %v1983_v51, %v4753_v2  ;;  %v2723_v29 = vpop.eup %2722  ;;  %v2216_v9 = vmul.f32 %v2208_v34, %v3164_v8  ;;  %v1988_v39 = vand.u32 2147483648, %v4753_v2  ;;  %v1839_v58 = vmul.f32 %v2719_v1, %v1838_v10 }
 0x241   :  { %v2130_v59 = vsub.f32 1.5, %v2129_v42  ;;  %v2306_v26 = vrot.slane %v2305_v44, 2  ;;  %vm1987_vm4 = vcmp.eq.f32.partialorder %v4753_v2, 0.0  ;;  %vm1841_vm5 = vcmp.eq.f32.partialorder %v4757_v36, inf }
 0x242   :  { %v1986_v43 = vsel %vm1985_vm3, %v4753_v2, %v1984_v35  ;;  %v1840_v50 = vmul.f32 %v1839_v58, %v4757_v36  ;;  %vm1843_vm6 = vcmp.eq.f32.partialorder %v4757_v36, 0.0  ;;  %v1844_v61 = vand.u32 2147483648, %v4757_v36 }
 0x243   :  { %v2725_v53 = vpop.eup %2724  ;;  %v1989_v45 = vsel %vm1987_vm4, %v1988_v39, %v1986_v43  ;;  %v2131_v63 = vmul.f32 %v2721_v3, %v2130_v59  ;;  %v2307_v32 = vadd.f32 %v2306_v26, %v2305_v44  ;;  %v4830_v13 = vadd.f32 %v1705_v28, %v4096_v21 }
 0x244   :  { %v2176_v40 = vmax.f32 %v1989_v45, 0.006  ;;  %v2727_v1 = vpop.eup %2726  ;;  %v2247_v2 = vmul.f32 2.0, %v2723_v29  ;;  %v2230_v30 = vmul.f32 1.442695, %v2216_v9  ;;  %v1842_v57 = vsel %vm1841_vm5, %v4757_v36, %v1840_v50 }
 0x245   :  { %2730 = vrsqrt.f32 %v4824_v27  ;;  %v2729_v46 = vpop.eup %2728  ;;  %v2308_v22 = vrot.slane %v2307_v32, 1  ;;  %v1845_v7 = vsel %vm1843_vm6, %v1844_v61, %v1842_v57  ;;  %v1991_v16 = vmul.f32 %v2727_v1, %v4810_v4 }
 0x246   :  { %v2184_v38 = vmul.f32 %v2176_v40, %v3164_v8  ;;  %vm2345_vm7 = vcmask 1044484   ;;  %v2239_v23 = vadd.f32 %v2729_v46, %v2725_v53  ;;  %v2144_v47 = vmax.f32 %v1845_v7, 0.006  ;;  %v47_v53 = vld [vmem:[%s4878_s3 + $0x18] sm:$0xf] }
 0x247   :  { %v2132_v21 = vmul.f32 %v2131_v63, %v4769_v48  ;;  %v2309_v25 = vadd.f32 %v2308_v22, %v2307_v32  ;;  %v1992_v11 = vmul.f32 %v2727_v1, %v1991_v16  ;;  %2732 = vpow2.f32 %v2230_v30 }
 0x248   :  { %v2198_v60 = vmul.f32 1.442695, %v2184_v38  ;;  %v2255_v37 = vsub.f32 %v2239_v23, %v2247_v2  ;;  %v2152_v36 = vmul.f32 %v2144_v47, %v3164_v8  ;;  %vm2133_vm8 = vcmp.eq.f32.partialorder %v4769_v48, inf }
 0x249   :  { %v2346_v3 = vsel %vm2345_vm7, %v2309_v25, %v4762_v17  ;;  %v1993_v52 = vmul.f32 0.5, %v1992_v11  ;;  %v2134_v20 = vsel %vm2133_vm8, %v4769_v48, %v2132_v21  ;;  %v2136_v24 = vand.u32 2147483648, %v4769_v48 }
 0x24a   :  { %v2263_v15 = vadd.f32 %v2255_v37, %v4635_v33  ;;  %2734 = vpow2.f32 %v2198_v60  ;;  %v2166_v5 = vmul.f32 1.442695, %v2152_v36  ;;  %vm2135_vm9 = vcmp.eq.f32.partialorder %v4769_v48, 0.0 }
 0x24b   :  { %v2731_v41 = vpop.eup %2730  ;;  %v1994_v18 = vsub.f32 1.5, %v1993_v52  ;;  %v2137_v0 = vsel %vm2135_vm9, %v2136_v24, %v2134_v20  ;;  %vm1997_vm10 = vcmp.eq.f32.partialorder %v4810_v4, inf  ;;  %vm1999_vm11 = vcmp.eq.f32.partialorder %v4810_v4, 0.0 }
 0x24c   :  { %v1847_v8 = vmul.f32 %v2731_v41, %v4824_v27  ;;  %v2271_v17 = vmul.f32 %v2263_v15, %v46_v6  ;;  %2736 = vpow2.f32 %v2166_v5  ;;  %v2209_v34 = vmax.f32 %v2137_v0, 0.006 }
 0x24d   :  { %v1995_v31 = vmul.f32 %v2727_v1, %v1994_v18  ;;  %v2733_v55 = vpop.eup %2732  ;;  %v2000_v51 = vand.u32 2147483648, %v4810_v4  ;;  %vm1853_vm12 = vcmp.eq.f32.partialorder %v4824_v27, inf  ;;  %v1856_v32 = vand.u32 2147483648, %v4824_v27 }
 0x24e   :  { %v1848_v14 = vmul.f32 %v2731_v41, %v1847_v8  ;;  %v2310_v19 = vsel %vm2274_vm0, %v2271_v17, 0.0  ;;  %v2248_v48 = vmul.f32 2.0, %v2733_v55  ;;  %v2217_v59 = vmul.f32 %v2209_v34, %v3137_v62 }
 0x24f   :  { %v2311_v33 = vrot.slane %v2310_v19, 4  ;;  %v1996_v12 = vmul.f32 %v1995_v31, %v4810_v4  ;;  %vm2347_vm13 = vcmask 1045509   ;;  %vm1855_vm14 = vcmp.eq.f32.partialorder %v4824_v27, 0.0 }
 0x250   :  { %v1849_v54 = vmul.f32 0.5, %v1848_v14  ;;  %v2735_v49 = vpop.eup %2734  ;;  %v2232_v40 = vmul.f32 1.442695, %v2217_v59  ;;  %vm2349_vm15 = vcmask 1046534   ;;  %vm2351_vm1 = vcmask 1047559  }
 0x251   :  { %v2312_v10 = vadd.f32 %v2311_v33, %v2310_v19  ;;  %v1998_v42 = vsel %vm1997_vm10, %v4810_v4, %v1996_v12  ;;  %vm2354_vm2 = vcmask 7168  }
 0x252   :  { %v1850_v28 = vsub.f32 1.5, %v1849_v54  ;;  %v2737_v44 = vpop.eup %2736  ;;  %v2001_v35 = vsel %vm1999_vm11, %v2000_v51, %v1998_v42  ;;  %2738 = vpow2.f32 %v2232_v40 }
 0x253   :  { %v2313_v29 = vrot.slane %v2312_v10, 2  ;;  %v2240_v9 = vadd.f32 %v2737_v44, %v2735_v49  ;;  %v2177_v39 = vmax.f32 %v2001_v35, 0.006 }
 0x254   :  { %v1851_v58 = vmul.f32 %v2731_v41, %v1850_v28 }
 0x255   :  { %v2314_v26 = vadd.f32 %v2313_v29, %v2312_v10  ;;  %v2256_v43 = vsub.f32 %v2240_v9, %v2248_v48  ;;  %v2185_v45 = vmul.f32 %v2177_v39, %v3137_v62 }
 0x256   :  { %v1852_v50 = vmul.f32 %v1851_v58, %v4824_v27 }
 0x257   :  { %v2315_v4 = vrot.slane %v2314_v26, 1  ;;  %v2264_v63 = vadd.f32 %v2256_v43, %v4750_v56  ;;  %v2200_v57 = vmul.f32 1.442695, %v2185_v45 }
 0x258   :  { %v1854_v61 = vsel %vm1853_vm12, %v4824_v27, %v1852_v50  ;;  %v2739_v21 = vpop.eup %2738 }
 0x259   :  { %v2316_v1 = vadd.f32 %v2315_v4, %v2314_v26  ;;  %v2272_v2 = vmul.f32 %v2264_v63, %v47_v53  ;;  %v1857_v30 = vsel %vm1855_vm14, %v1856_v32, %v1854_v61  ;;  %2740 = vpow2.f32 %v2200_v57 }
 0x25a   :  { %v2145_v46 = vmax.f32 %v1857_v30, 0.006  ;;  %v2249_v11 = vmul.f32 2.0, %v2739_v21 }
 0x25b   :  { %v2348_v22 = vsel %vm2347_vm13, %v2316_v1, %v2346_v3  ;;  %v2317_v38 = vsel %vm2274_vm0, %v2272_v2, 0.0 }
 0x25c   :  { %v2318_v7 = vrot.slane %v2317_v38, 4  ;;  %v2153_v56 = vmul.f32 %v2145_v46, %v3137_v62  ;;  %v48_v62 = vld [vmem:[%s4878_s3 + $0x1c] sm:$0xf] }
 0x25e   :  { %v2319_v16 = vadd.f32 %v2318_v7, %v2317_v38  ;;  %v2168_v23 = vmul.f32 1.442695, %v2153_v56 }
 0x25f   :  { %v2741_v27 = vpop.eup %2740 }
 0x260   :  { %v2320_v47 = vrot.slane %v2319_v16, 2  ;;  %2742 = vpow2.f32 %v2168_v23 }
 0x262   :  { %v2321_v25 = vadd.f32 %v2320_v47, %v2319_v16 }
 0x264   :  { %v2322_v60 = vrot.slane %v2321_v25, 1 }
 0x266   :  { %v2743_v37 = vpop.eup %2742  ;;  %v2323_v36 = vadd.f32 %v2322_v60, %v2321_v25 }
 0x267   :  { %v2241_v3 = vadd.f32 %v2743_v37, %v2741_v27 }
 0x268   :  { %v2350_v6 = vsel %vm2349_vm15, %v2323_v36, %v2348_v22 }
 0x269   :  { %v2257_v52 = vsub.f32 %v2241_v3, %v2249_v11 }
 0x26b   :  { %v2265_v41 = vadd.f32 %v2257_v52, %v4830_v13 }
 0x26d   :  { %v2273_v15 = vmul.f32 %v2265_v41, %v48_v62 }
 0x26f   :  { %v2324_v5 = vsel %vm2274_vm0, %v2273_v15, 0.0 }
 0x270   :  { %v2325_v20 = vrot.slane %v2324_v5, 4 }
 0x272   :  { %v2326_v24 = vadd.f32 %v2325_v20, %v2324_v5 }
 0x274   :  { %v2327_v18 = vrot.slane %v2326_v24, 2 }
 0x276   :  { %v2328_v8 = vadd.f32 %v2327_v18, %v2326_v24 }
 0x278   :  { %v2329_v17 = vrot.slane %v2328_v8, 1 }
 0x27a   :  { %v2330_v0 = vadd.f32 %v2329_v17, %v2328_v8 }
 0x27c   :  { %v2352_v31 = vsel %vm2351_vm1, %v2330_v0, %v2350_v6 }
 0x27d   :  { %2355 = vst.msk [vmem:[%s4879_s4] sm:$0xff] %vm2354_vm2, %v2352_v31 }

</bundles_post_ra>
